<compile_context>
chip_gen: v7x
topology: tpu7x:2x2x1
jax: 0.10.0
libtpu: 0.0.40
codegen_flags: <defaults>
</compile_context>

<pallas_src>
import jax
import jax.numpy as jnp
import numpy as np
from jax import lax
from jax.experimental import pallas as pl
from jax.experimental.pallas import tpu as pltpu


def _make_ae_kernel(hidden_size, seq_len):
    H = hidden_size
    S = seq_len
    G = 4 * H  # gate row width

    def gate_activate(gates, c):
        # PyTorch LSTM/LSTMCell gate order: i, f, g, o.
        # One sigmoid over the whole [1, 4H] row (EUP cost is per-issue, not
        # per-lane); i/f/o are lane slices, tanh only on the g slice.
        sg = jax.nn.sigmoid(gates)
        i = sg[:, 0 * H:1 * H]
        f = sg[:, 1 * H:2 * H]
        o = sg[:, 3 * H:4 * H]
        g = jnp.tanh(gates[:, 2 * H:3 * H])
        c_new = f * c + i * g
        h_new = o * jnp.tanh(c_new)
        return h_new, c_new

    def kernel(feat_ref,
               wih0_ref, b0_ref,
               w_e0_ref, whh1_ref, b1_ref,
               w_d0_ref, w_d1_ref, db0_ref, db1_ref, bfused_ref,
               wo_ref, bo_ref,
               out_ref,
               xg0_ref, dec_ref):
        z = jnp.zeros((1, H), jnp.float32)
        zg = jnp.zeros((1, G), jnp.float32)

        # ---------------- encoder: 2-layer LSTM over the sequence ------------
        # Non-recurrent layer-0 input projection hoisted out of the loop
        # (bias b0 folded into the slab).
        xg0_ref[...] = (jnp.dot(feat_ref[...], wih0_ref[...],
                                preferred_element_type=jnp.float32)
                        + b0_ref[...])                                 # [S, 4H]

        # Encoder loop invariants (live only during this loop).
        w_e0 = w_e0_ref[...]          # [whh0 | wih1]   [H, 8H]
        whh1 = whh1_ref[...]          #                 [H, 4H]
        b1 = b1_ref[...]              #                 [1, 4H]

        def enc_step(t, carry):
            # hw0 = h0_{t-1} @ whh0,  hw1 = h1_{t-1} @ whh1  (carried products)
            hw0, c0, hw1, c1, _, _ = carry
            g0 = xg0_ref[pl.ds(t, 1), :] + hw0
            h0, c0 = gate_activate(g0, c0)
            comb0 = jnp.dot(h0, w_e0, preferred_element_type=jnp.float32)  # [1, 8H]
            g1 = comb0[:, G:] + hw1 + b1
            h1, c1 = gate_activate(g1, c1)
            hw1 = jnp.dot(h1, whh1, preferred_element_type=jnp.float32)
            return comb0[:, :G], c0, hw1, c1, h0, h1

        _, c0e, _, c1e, h0e, h1e = lax.fori_loop(
            0, S, enc_step, (zg, z, zg, z, z, z), unroll=True)

        # ------------- decoder: 2-layer stacked LSTM cells --------------------
        # Decoder loop invariants (read after the encoder loop finished).
        w_d0 = w_d0_ref[...]          # [dwhh0 | dwih1]    [H, 8H]
        w_d1 = w_d1_ref[...]          # [dwhh1 | wfused]   [H, 8H]
        db1 = db1_ref[...]
        bfused = bfused_ref[...]      # bdout @ dwih0 + db0    [1, 4H]

        # Initial recurrent products from the encoder's final per-layer state.
        hw0d = jnp.dot(h0e, w_d0, preferred_element_type=jnp.float32)[:, :G]
        hw1d = jnp.dot(h1e, w_d1, preferred_element_type=jnp.float32)[:, :G]

        def dec_step(t, carry):
            # hw0d = dh0_{t-1} @ dwhh0, hw1d = dh1_{t-1} @ dwhh1,
            # xg   = x_t @ dwih0 + db0  (decoder 'out' Linear fused in)
            hw0d, dc0, hw1d, xg, dc1 = carry
            g0 = xg + hw0d
            dh0, dc0 = gate_activate(g0, dc0)
            comb0 = jnp.dot(dh0, w_d0, preferred_element_type=jnp.float32)  # [1, 8H]
            g1 = comb0[:, G:] + hw1d + db1
            dh1, dc1 = gate_activate(g1, dc1)
            # decoded_features.reverse(): store in reversed time order.
            dec_ref[pl.ds(S - 1 - t, 1), :] = dh1
            comb1 = jnp.dot(dh1, w_d1, preferred_element_type=jnp.float32)  # [1, 8H]
            return comb0[:, :G], dc0, comb1[:, :G], comb1[:, G:] + bfused, dc1

        # decoder init_hidden = encoder final per-layer (h, c); first input is
        # zeros -> its layer-0 input gate contribution is just the bias db0.
        lax.fori_loop(0, S, dec_step, (hw0d, c0e, hw1d, db0_ref[...], c1e),
                      unroll=True)

        # ------------------ final projection Linear(H -> I) ------------------
        out_ref[...] = (jnp.dot(dec_ref[...], wo_ref[...],
                                preferred_element_type=jnp.float32)
                        + bo_ref[...])

    return kernel


def init_params(key, input_size, hidden_size):
    H, I = hidden_size, input_size
    bound = 1.0 / np.sqrt(H)
    keys = iter(jax.random.split(key, 32))

    def u(shape):
        return jax.random.uniform(next(keys), shape, jnp.float32, -bound, bound)

    return dict(
        # encoder nn.LSTM(H, H, num_layers=2): per layer W_ih^T, W_hh^T, b_ih+b_hh
        wih0=u((H, 4 * H)), whh0=u((H, 4 * H)), b0=u((1, 4 * H)),
        wih1=u((H, 4 * H)), whh1=u((H, 4 * H)), b1=u((1, 4 * H)),
        # decoder StackedLSTMCell: layer0 LSTMCell(H, H), layer1 LSTMCell(H, H)
        dwih0=u((H, 4 * H)), dwhh0=u((H, 4 * H)), db0=u((1, 4 * H)),
        dwih1=u((H, 4 * H)), dwhh1=u((H, 4 * H)), db1=u((1, 4 * H)),
        # decoder out: Linear(H -> H)
        wdout=u((H, H)), bdout=u((1, H)),
        # AE output: Linear(H -> I)
        wo=u((H, I)), bo=u((1, I)),
        # NOTE: eLSTM.linear_mu / linear_var are unused in AE.forward -> omitted.
    )


def ae_forward(features, params):
    S, B, H_in = features.shape
    assert B == 1, "module semantics assume batch_size == 1"
    H = params["whh0"].shape[0]
    assert H_in == H, "AE feeds features of width hidden_size into eLSTM"
    I = params["wo"].shape[1]
    feat2d = features.reshape(S, H).astype(jnp.float32)

    # Fold the decoder 'out' Linear into the decoder layer-0 input weight
    # (exact: (h@W_out + b_out)@W_ih0 + db0 == h@(W_out@W_ih0) + (b_out@W_ih0 + db0)).
    wfused = params["wdout"] @ params["dwih0"]                      # [H, 4H]
    bfused = params["bdout"] @ params["dwih0"] + params["db0"]      # [1, 4H]

    # Shared-LHS weight fusion: concatenate along N so each recurrent step
    # issues one 256-wide dot per layer instead of two 128-wide ones.
    w_e0 = jnp.concatenate([params["whh0"], params["wih1"]], axis=1)    # [H, 8H]
    w_d0 = jnp.concatenate([params["dwhh0"], params["dwih1"]], axis=1)  # [H, 8H]
    w_d1 = jnp.concatenate([params["dwhh1"], wfused], axis=1)           # [H, 8H]

    args = [feat2d,
            params["wih0"], params["b0"],
            w_e0, params["whh1"], params["b1"],
            w_d0, w_d1, params["db0"], params["db1"], bfused,
            params["wo"], params["bo"]]

    out2d = pl.pallas_call(
        _make_ae_kernel(H, S),
        out_shape=jax.ShapeDtypeStruct((S, I), jnp.float32),
        in_specs=[pl.BlockSpec(memory_space=pltpu.MemorySpace.VMEM)] * len(args),
        out_specs=pl.BlockSpec(memory_space=pltpu.MemorySpace.VMEM),
        scratch_shapes=[pltpu.VMEM((S, 4 * H), jnp.float32),   # hoisted enc layer-0 gates
                        pltpu.VMEM((S, H), jnp.float32)],      # decoder last_h (reversed)
    )(*args)
    return out2d.reshape(S, 1, I)


def ae_reference(features, params):
    """Pure-JAX reference mirroring the (intended) PyTorch forward, unfused."""
    S, _, H = features.shape
    I = params["wo"].shape[1]
    x = features.reshape(S, H)

    def cell(xv, h, c, wih, whh, b):
        g = xv @ wih + h @ whh + b
        i = jax.nn.sigmoid(g[:, :H])
        f = jax.nn.sigmoid(g[:, H:2 * H])
        gg = jnp.tanh(g[:, 2 * H:3 * H])
        o = jax.nn.sigmoid(g[:, 3 * H:])
        c = f * c + i * gg
        return o * jnp.tanh(c), c

    z = jnp.zeros((1, H), jnp.float32)
    h0 = c0 = h1 = c1 = z
    for t in range(S):
        h0, c0 = cell(x[t:t + 1], h0, c0, params["wih0"], params["whh0"], params["b0"])
        h1, c1 = cell(h0, h1, c1, params["wih1"], params["whh1"], params["b1"])

    dh0, dc0, dh1, dc1 = h0, c0, h1, c1
    xin = z
    outs = []
    for _ in range(S):
        dh0, dc0 = cell(xin, dh0, dc0, params["dwih0"], params["dwhh0"], params["db0"])
        dh1, dc1 = cell(dh0, dh1, dc1, params["dwih1"], params["dwhh1"], params["db1"])
        outs.append(dh1)
        xin = dh1 @ params["wdout"] + params["bdout"]
    outs.reverse()
    dec = jnp.concatenate(outs, axis=0)
    return (dec @ params["wo"] + params["bo"]).reshape(S, 1, I)


if __name__ == "__main__":
    SEQ_LEN, INPUT_SIZE, HIDDEN_SIZE = 8, 48, 32
    key = jax.random.PRNGKey(0)
    kf, kp = jax.random.split(key)
    features = jax.random.normal(kf, (SEQ_LEN, 1, HIDDEN_SIZE), dtype=jnp.float32)
    params = init_params(kp, INPUT_SIZE, HIDDEN_SIZE)

    out = jax.block_until_ready(ae_forward(features, params))
    assert out.shape == (SEQ_LEN, 1, INPUT_SIZE)

    ref = ae_reference(features, params)
    np.testing.assert_allclose(np.asarray(out), np.asarray(ref), rtol=2e-4, atol=2e-4)
    print("KERNEL_OK")
</pallas_src>

<mosaic_0001>
module attributes {stable_mosaic.version = 11 : i64} {
  func.func @kernel(%arg0: memref<8x32xf32, #tpu.memory_space<vmem>>, %arg1: memref<32x128xf32, #tpu.memory_space<vmem>>, %arg2: memref<1x128xf32, #tpu.memory_space<vmem>>, %arg3: memref<32x256xf32, #tpu.memory_space<vmem>>, %arg4: memref<32x128xf32, #tpu.memory_space<vmem>>, %arg5: memref<1x128xf32, #tpu.memory_space<vmem>>, %arg6: memref<32x256xf32, #tpu.memory_space<vmem>>, %arg7: memref<32x256xf32, #tpu.memory_space<vmem>>, %arg8: memref<1x128xf32, #tpu.memory_space<vmem>>, %arg9: memref<1x128xf32, #tpu.memory_space<vmem>>, %arg10: memref<1x128xf32, #tpu.memory_space<vmem>>, %arg11: memref<32x48xf32, #tpu.memory_space<vmem>>, %arg12: memref<1x48xf32, #tpu.memory_space<vmem>>, %arg13: memref<8x48xf32, #tpu.memory_space<vmem>>, %arg14: memref<8x128xf32, #tpu.memory_space<vmem>>, %arg15: memref<8x32xf32, #tpu.memory_space<vmem>>) attributes {dimension_semantics = [], scalar_prefetch = 0 : i64, scratch_operands = 2 : i64, tpu.core_type = #tpu.core_type<tc>} {
    %cst = arith.constant 0.000000e+00 : f32
    %0 = vector.broadcast %cst : f32 to vector<1x32xf32>
    %cst_0 = arith.constant 0.000000e+00 : f32
    %1 = vector.broadcast %cst_0 : f32 to vector<1x128xf32>
    %c0 = arith.constant 0 : index
    %c0_1 = arith.constant 0 : index
    %2 = vector.load %arg0[%c0, %c0_1] : memref<8x32xf32, #tpu.memory_space<vmem>>, vector<8x32xf32>
    %c0_2 = arith.constant 0 : index
    %c0_3 = arith.constant 0 : index
    %3 = vector.load %arg1[%c0_2, %c0_3] : memref<32x128xf32, #tpu.memory_space<vmem>>, vector<32x128xf32>
    %cst_4 = arith.constant dense<0.000000e+00> : vector<8x128xf32>
    %4 = tpu.matmul %2, %3, %cst_4 {dimension_numbers = #tpu.dot_dimension_numbers<[1], [0], [0], [1], [0, 0, 1, 1], [], []>} : vector<8x32xf32>, vector<32x128xf32>, vector<8x128xf32> -> vector<8x128xf32>
    %c0_5 = arith.constant 0 : index
    %c0_6 = arith.constant 0 : index
    %5 = vector.load %arg2[%c0_5, %c0_6] : memref<1x128xf32, #tpu.memory_space<vmem>>, vector<1x128xf32>
    %6 = vector.broadcast %5 : vector<1x128xf32> to vector<8x128xf32>
    %7 = arith.addf %4, %6 : vector<8x128xf32>
    %c0_7 = arith.constant 0 : index
    %c0_8 = arith.constant 0 : index
    %8 = vector.load %arg14[%c0_7, %c0_8] : memref<8x128xf32, #tpu.memory_space<vmem>>, vector<8x128xf32>
    tpu.vector_store %arg14[%c0_7, %c0_8], %7 {strides = array<i32>} : memref<8x128xf32, #tpu.memory_space<vmem>>, vector<8x128xf32>,
    %c0_9 = arith.constant 0 : index
    %c0_10 = arith.constant 0 : index
    %9 = vector.load %arg3[%c0_9, %c0_10] : memref<32x256xf32, #tpu.memory_space<vmem>>, vector<32x256xf32>
    %c0_11 = arith.constant 0 : index
    %c0_12 = arith.constant 0 : index
    %10 = vector.load %arg4[%c0_11, %c0_12] : memref<32x128xf32, #tpu.memory_space<vmem>>, vector<32x128xf32>
    %c0_13 = arith.constant 0 : index
    %c0_14 = arith.constant 0 : index
    %11 = vector.load %arg5[%c0_13, %c0_14] : memref<1x128xf32, #tpu.memory_space<vmem>>, vector<1x128xf32>
    %c0_i32 = arith.constant 0 : i32
    %12 = arith.index_cast %c0_i32 : i32 to index
    %c0_15 = arith.constant 0 : index
    %13 = vector.load %arg14[%12, %c0_15] : memref<8x128xf32, #tpu.memory_space<vmem>>, vector<1x128xf32>
    %14 = arith.addf %13, %1 : vector<1x128xf32>
    %15 = arith.negf %14 : vector<1x128xf32>
    %16 = math.exp %15 : vector<1x128xf32>
    %cst_16 = arith.constant 1.000000e+00 : f32
    %17 = vector.broadcast %cst_16 : f32 to vector<1x128xf32>
    %18 = arith.addf %17, %16 : vector<1x128xf32>
    %19 = arith.divf %17, %18 : vector<1x128xf32>
    %20 = vector.extract_strided_slice %19 {offsets = [0, 0], sizes = [1, 32], strides = [1, 1]} : vector<1x128xf32> to vector<1x32xf32>
    %21 = vector.extract_strided_slice %19 {offsets = [0, 32], sizes = [1, 32], strides = [1, 1]} : vector<1x128xf32> to vector<1x32xf32>
    %22 = vector.extract_strided_slice %19 {offsets = [0, 96], sizes = [1, 32], strides = [1, 1]} : vector<1x128xf32> to vector<1x32xf32>
    %23 = vector.extract_strided_slice %14 {offsets = [0, 64], sizes = [1, 32], strides = [1, 1]} : vector<1x128xf32> to vector<1x32xf32>
    %24 = math.tanh %23 : vector<1x32xf32>
    %25 = arith.mulf %21, %0 : vector<1x32xf32>
    %26 = arith.mulf %20, %24 : vector<1x32xf32>
    %27 = arith.addf %25, %26 : vector<1x32xf32>
    %28 = math.tanh %27 : vector<1x32xf32>
    %29 = arith.mulf %22, %28 : vector<1x32xf32>
    %cst_17 = arith.constant dense<0.000000e+00> : vector<1x256xf32>
    %30 = tpu.matmul %29, %9, %cst_17 {dimension_numbers = #tpu.dot_dimension_numbers<[1], [0], [0], [1], [0, 0, 1, 1], [], []>} : vector<1x32xf32>, vector<32x256xf32>, vector<1x256xf32> -> vector<1x256xf32>
    %31 = vector.extract_strided_slice %30 {offsets = [0, 128], sizes = [1, 128], strides = [1, 1]} : vector<1x256xf32> to vector<1x128xf32>
    %32 = arith.addf %31, %1 : vector<1x128xf32>
    %33 = arith.addf %32, %11 : vector<1x128xf32>
    %34 = arith.negf %33 : vector<1x128xf32>
    %35 = math.exp %34 : vector<1x128xf32>
    %cst_18 = arith.constant 1.000000e+00 : f32
    %36 = vector.broadcast %cst_18 : f32 to vector<1x128xf32>
    %37 = arith.addf %36, %35 : vector<1x128xf32>
    %38 = arith.divf %36, %37 : vector<1x128xf32>
    %39 = vector.extract_strided_slice %38 {offsets = [0, 0], sizes = [1, 32], strides = [1, 1]} : vector<1x128xf32> to vector<1x32xf32>
    %40 = vector.extract_strided_slice %38 {offsets = [0, 32], sizes = [1, 32], strides = [1, 1]} : vector<1x128xf32> to vector<1x32xf32>
    %41 = vector.extract_strided_slice %38 {offsets = [0, 96], sizes = [1, 32], strides = [1, 1]} : vector<1x128xf32> to vector<1x32xf32>
    %42 = vector.extract_strided_slice %33 {offsets = [0, 64], sizes = [1, 32], strides = [1, 1]} : vector<1x128xf32> to vector<1x32xf32>
    %43 = math.tanh %42 : vector<1x32xf32>
    %44 = arith.mulf %40, %0 : vector<1x32xf32>
    %45 = arith.mulf %39, %43 : vector<1x32xf32>
    %46 = arith.addf %44, %45 : vector<1x32xf32>
    %47 = math.tanh %46 : vector<1x32xf32>
    %48 = arith.mulf %41, %47 : vector<1x32xf32>
    %cst_19 = arith.constant dense<0.000000e+00> : vector<1x128xf32>
    %49 = tpu.matmul %48, %10, %cst_19 {dimension_numbers = #tpu.dot_dimension_numbers<[1], [0], [0], [1], [0, 0, 1, 1], [], []>} : vector<1x32xf32>, vector<32x128xf32>, vector<1x128xf32> -> vector<1x128xf32>
    %50 = vector.extract_strided_slice %30 {offsets = [0, 0], sizes = [1, 128], strides = [1, 1]} : vector<1x256xf32> to vector<1x128xf32>
    %c1_i32 = arith.constant 1 : i32
    %51 = arith.index_cast %c1_i32 : i32 to index
    %c0_20 = arith.constant 0 : index
    %52 = vector.load %arg14[%51, %c0_20] : memref<8x128xf32, #tpu.memory_space<vmem>>, vector<1x128xf32>
    %53 = arith.addf %52, %50 : vector<1x128xf32>
    %54 = arith.negf %53 : vector<1x128xf32>
    %55 = math.exp %54 : vector<1x128xf32>
    %cst_21 = arith.constant 1.000000e+00 : f32
    %56 = vector.broadcast %cst_21 : f32 to vector<1x128xf32>
    %57 = arith.addf %56, %55 : vector<1x128xf32>
    %58 = arith.divf %56, %57 : vector<1x128xf32>
    %59 = vector.extract_strided_slice %58 {offsets = [0, 0], sizes = [1, 32], strides = [1, 1]} : vector<1x128xf32> to vector<1x32xf32>
    %60 = vector.extract_strided_slice %58 {offsets = [0, 32], sizes = [1, 32], strides = [1, 1]} : vector<1x128xf32> to vector<1x32xf32>
    %61 = vector.extract_strided_slice %58 {offsets = [0, 96], sizes = [1, 32], strides = [1, 1]} : vector<1x128xf32> to vector<1x32xf32>
    %62 = vector.extract_strided_slice %53 {offsets = [0, 64], sizes = [1, 32], strides = [1, 1]} : vector<1x128xf32> to vector<1x32xf32>
    %63 = math.tanh %62 : vector<1x32xf32>
    %64 = arith.mulf %60, %27 : vector<1x32xf32>
    %65 = arith.mulf %59, %63 : vector<1x32xf32>
    %66 = arith.addf %64, %65 : vector<1x32xf32>
    %67 = math.tanh %66 : vector<1x32xf32>
    %68 = arith.mulf %61, %67 : vector<1x32xf32>
    %cst_22 = arith.constant dense<0.000000e+00> : vector<1x256xf32>
    %69 = tpu.matmul %68, %9, %cst_22 {dimension_numbers = #tpu.dot_dimension_numbers<[1], [0], [0], [1], [0, 0, 1, 1], [], []>} : vector<1x32xf32>, vector<32x256xf32>, vector<1x256xf32> -> vector<1x256xf32>
    %70 = vector.extract_strided_slice %69 {offsets = [0, 128], sizes = [1, 128], strides = [1, 1]} : vector<1x256xf32> to vector<1x128xf32>
    %71 = arith.addf %70, %49 : vector<1x128xf32>
    %72 = arith.addf %71, %11 : vector<1x128xf32>
    %73 = arith.negf %72 : vector<1x128xf32>
    %74 = math.exp %73 : vector<1x128xf32>
    %cst_23 = arith.constant 1.000000e+00 : f32
    %75 = vector.broadcast %cst_23 : f32 to vector<1x128xf32>
    %76 = arith.addf %75, %74 : vector<1x128xf32>
    %77 = arith.divf %75, %76 : vector<1x128xf32>
    %78 = vector.extract_strided_slice %77 {offsets = [0, 0], sizes = [1, 32], strides = [1, 1]} : vector<1x128xf32> to vector<1x32xf32>
    %79 = vector.extract_strided_slice %77 {offsets = [0, 32], sizes = [1, 32], strides = [1, 1]} : vector<1x128xf32> to vector<1x32xf32>
    %80 = vector.extract_strided_slice %77 {offsets = [0, 96], sizes = [1, 32], strides = [1, 1]} : vector<1x128xf32> to vector<1x32xf32>
    %81 = vector.extract_strided_slice %72 {offsets = [0, 64], sizes = [1, 32], strides = [1, 1]} : vector<1x128xf32> to vector<1x32xf32>
    %82 = math.tanh %81 : vector<1x32xf32>
    %83 = arith.mulf %79, %46 : vector<1x32xf32>
    %84 = arith.mulf %78, %82 : vector<1x32xf32>
    %85 = arith.addf %83, %84 : vector<1x32xf32>
    %86 = math.tanh %85 : vector<1x32xf32>
    %87 = arith.mulf %80, %86 : vector<1x32xf32>
    %cst_24 = arith.constant dense<0.000000e+00> : vector<1x128xf32>
    %88 = tpu.matmul %87, %10, %cst_24 {dimension_numbers = #tpu.dot_dimension_numbers<[1], [0], [0], [1], [0, 0, 1, 1], [], []>} : vector<1x32xf32>, vector<32x128xf32>, vector<1x128xf32> -> vector<1x128xf32>
    %89 = vector.extract_strided_slice %69 {offsets = [0, 0], sizes = [1, 128], strides = [1, 1]} : vector<1x256xf32> to vector<1x128xf32>
    %c2_i32 = arith.constant 2 : i32
    %90 = arith.index_cast %c2_i32 : i32 to index
    %c0_25 = arith.constant 0 : index
    %91 = vector.load %arg14[%90, %c0_25] : memref<8x128xf32, #tpu.memory_space<vmem>>, vector<1x128xf32>
    %92 = arith.addf %91, %89 : vector<1x128xf32>
    %93 = arith.negf %92 : vector<1x128xf32>
    %94 = math.exp %93 : vector<1x128xf32>
    %cst_26 = arith.constant 1.000000e+00 : f32
    %95 = vector.broadcast %cst_26 : f32 to vector<1x128xf32>
    %96 = arith.addf %95, %94 : vector<1x128xf32>
    %97 = arith.divf %95, %96 : vector<1x128xf32>
    %98 = vector.extract_strided_slice %97 {offsets = [0, 0], sizes = [1, 32], strides = [1, 1]} : vector<1x128xf32> to vector<1x32xf32>
    %99 = vector.extract_strided_slice %97 {offsets = [0, 32], sizes = [1, 32], strides = [1, 1]} : vector<1x128xf32> to vector<1x32xf32>
    %100 = vector.extract_strided_slice %97 {offsets = [0, 96], sizes = [1, 32], strides = [1, 1]} : vector<1x128xf32> to vector<1x32xf32>
    %101 = vector.extract_strided_slice %92 {offsets = [0, 64], sizes = [1, 32], strides = [1, 1]} : vector<1x128xf32> to vector<1x32xf32>
    %102 = math.tanh %101 : vector<1x32xf32>
    %103 = arith.mulf %99, %66 : vector<1x32xf32>
    %104 = arith.mulf %98, %102 : vector<1x32xf32>
    %105 = arith.addf %103, %104 : vector<1x32xf32>
    %106 = math.tanh %105 : vector<1x32xf32>
    %107 = arith.mulf %100, %106 : vector<1x32xf32>
    %cst_27 = arith.constant dense<0.000000e+00> : vector<1x256xf32>
    %108 = tpu.matmul %107, %9, %cst_27 {dimension_numbers = #tpu.dot_dimension_numbers<[1], [0], [0], [1], [0, 0, 1, 1], [], []>} : vector<1x32xf32>, vector<32x256xf32>, vector<1x256xf32> -> vector<1x256xf32>
    %109 = vector.extract_strided_slice %108 {offsets = [0, 128], sizes = [1, 128], strides = [1, 1]} : vector<1x256xf32> to vector<1x128xf32>
    %110 = arith.addf %109, %88 : vector<1x128xf32>
    %111 = arith.addf %110, %11 : vector<1x128xf32>
    %112 = arith.negf %111 : vector<1x128xf32>
    %113 = math.exp %112 : vector<1x128xf32>
    %cst_28 = arith.constant 1.000000e+00 : f32
    %114 = vector.broadcast %cst_28 : f32 to vector<1x128xf32>
    %115 = arith.addf %114, %113 : vector<1x128xf32>
    %116 = arith.divf %114, %115 : vector<1x128xf32>
    %117 = vector.extract_strided_slice %116 {offsets = [0, 0], sizes = [1, 32], strides = [1, 1]} : vector<1x128xf32> to vector<1x32xf32>
    %118 = vector.extract_strided_slice %116 {offsets = [0, 32], sizes = [1, 32], strides = [1, 1]} : vector<1x128xf32> to vector<1x32xf32>
    %119 = vector.extract_strided_slice %116 {offsets = [0, 96], sizes = [1, 32], strides = [1, 1]} : vector<1x128xf32> to vector<1x32xf32>
    %120 = vector.extract_strided_slice %111 {offsets = [0, 64], sizes = [1, 32], strides = [1, 1]} : vector<1x128xf32> to vector<1x32xf32>
    %121 = math.tanh %120 : vector<1x32xf32>
    %122 = arith.mulf %118, %85 : vector<1x32xf32>
    %123 = arith.mulf %117, %121 : vector<1x32xf32>
    %124 = arith.addf %122, %123 : vector<1x32xf32>
    %125 = math.tanh %124 : vector<1x32xf32>
    %126 = arith.mulf %119, %125 : vector<1x32xf32>
    %cst_29 = arith.constant dense<0.000000e+00> : vector<1x128xf32>
    %127 = tpu.matmul %126, %10, %cst_29 {dimension_numbers = #tpu.dot_dimension_numbers<[1], [0], [0], [1], [0, 0, 1, 1], [], []>} : vector<1x32xf32>, vector<32x128xf32>, vector<1x128xf32> -> vector<1x128xf32>
    %128 = vector.extract_strided_slice %108 {offsets = [0, 0], sizes = [1, 128], strides = [1, 1]} : vector<1x256xf32> to vector<1x128xf32>
    %c3_i32 = arith.constant 3 : i32
    %129 = arith.index_cast %c3_i32 : i32 to index
    %c0_30 = arith.constant 0 : index
    %130 = vector.load %arg14[%129, %c0_30] : memref<8x128xf32, #tpu.memory_space<vmem>>, vector<1x128xf32>
    %131 = arith.addf %130, %128 : vector<1x128xf32>
    %132 = arith.negf %131 : vector<1x128xf32>
    %133 = math.exp %132 : vector<1x128xf32>
    %cst_31 = arith.constant 1.000000e+00 : f32
    %134 = vector.broadcast %cst_31 : f32 to vector<1x128xf32>
    %135 = arith.addf %134, %133 : vector<1x128xf32>
    %136 = arith.divf %134, %135 : vector<1x128xf32>
    %137 = vector.extract_strided_slice %136 {offsets = [0, 0], sizes = [1, 32], strides = [1, 1]} : vector<1x128xf32> to vector<1x32xf32>
    %138 = vector.extract_strided_slice %136 {offsets = [0, 32], sizes = [1, 32], strides = [1, 1]} : vector<1x128xf32> to vector<1x32xf32>
    %139 = vector.extract_strided_slice %136 {offsets = [0, 96], sizes = [1, 32], strides = [1, 1]} : vector<1x128xf32> to vector<1x32xf32>
    %140 = vector.extract_strided_slice %131 {offsets = [0, 64], sizes = [1, 32], strides = [1, 1]} : vector<1x128xf32> to vector<1x32xf32>
    %141 = math.tanh %140 : vector<1x32xf32>
    %142 = arith.mulf %138, %105 : vector<1x32xf32>
    %143 = arith.mulf %137, %141 : vector<1x32xf32>
    %144 = arith.addf %142, %143 : vector<1x32xf32>
    %145 = math.tanh %144 : vector<1x32xf32>
    %146 = arith.mulf %139, %145 : vector<1x32xf32>
    %cst_32 = arith.constant dense<0.000000e+00> : vector<1x256xf32>
    %147 = tpu.matmul %146, %9, %cst_32 {dimension_numbers = #tpu.dot_dimension_numbers<[1], [0], [0], [1], [0, 0, 1, 1], [], []>} : vector<1x32xf32>, vector<32x256xf32>, vector<1x256xf32> -> vector<1x256xf32>
    %148 = vector.extract_strided_slice %147 {offsets = [0, 128], sizes = [1, 128], strides = [1, 1]} : vector<1x256xf32> to vector<1x128xf32>
    %149 = arith.addf %148, %127 : vector<1x128xf32>
    %150 = arith.addf %149, %11 : vector<1x128xf32>
    %151 = arith.negf %150 : vector<1x128xf32>
    %152 = math.exp %151 : vector<1x128xf32>
    %cst_33 = arith.constant 1.000000e+00 : f32
    %153 = vector.broadcast %cst_33 : f32 to vector<1x128xf32>
    %154 = arith.addf %153, %152 : vector<1x128xf32>
    %155 = arith.divf %153, %154 : vector<1x128xf32>
    %156 = vector.extract_strided_slice %155 {offsets = [0, 0], sizes = [1, 32], strides = [1, 1]} : vector<1x128xf32> to vector<1x32xf32>
    %157 = vector.extract_strided_slice %155 {offsets = [0, 32], sizes = [1, 32], strides = [1, 1]} : vector<1x128xf32> to vector<1x32xf32>
    %158 = vector.extract_strided_slice %155 {offsets = [0, 96], sizes = [1, 32], strides = [1, 1]} : vector<1x128xf32> to vector<1x32xf32>
    %159 = vector.extract_strided_slice %150 {offsets = [0, 64], sizes = [1, 32], strides = [1, 1]} : vector<1x128xf32> to vector<1x32xf32>
    %160 = math.tanh %159 : vector<1x32xf32>
    %161 = arith.mulf %157, %124 : vector<1x32xf32>
    %162 = arith.mulf %156, %160 : vector<1x32xf32>
    %163 = arith.addf %161, %162 : vector<1x32xf32>
    %164 = math.tanh %163 : vector<1x32xf32>
    %165 = arith.mulf %158, %164 : vector<1x32xf32>
    %cst_34 = arith.constant dense<0.000000e+00> : vector<1x128xf32>
    %166 = tpu.matmul %165, %10, %cst_34 {dimension_numbers = #tpu.dot_dimension_numbers<[1], [0], [0], [1], [0, 0, 1, 1], [], []>} : vector<1x32xf32>, vector<32x128xf32>, vector<1x128xf32> -> vector<1x128xf32>
    %167 = vector.extract_strided_slice %147 {offsets = [0, 0], sizes = [1, 128], strides = [1, 1]} : vector<1x256xf32> to vector<1x128xf32>
    %c4_i32 = arith.constant 4 : i32
    %168 = arith.index_cast %c4_i32 : i32 to index
    %c0_35 = arith.constant 0 : index
    %169 = vector.load %arg14[%168, %c0_35] : memref<8x128xf32, #tpu.memory_space<vmem>>, vector<1x128xf32>
    %170 = arith.addf %169, %167 : vector<1x128xf32>
    %171 = arith.negf %170 : vector<1x128xf32>
    %172 = math.exp %171 : vector<1x128xf32>
    %cst_36 = arith.constant 1.000000e+00 : f32
    %173 = vector.broadcast %cst_36 : f32 to vector<1x128xf32>
    %174 = arith.addf %173, %172 : vector<1x128xf32>
    %175 = arith.divf %173, %174 : vector<1x128xf32>
    %176 = vector.extract_strided_slice %175 {offsets = [0, 0], sizes = [1, 32], strides = [1, 1]} : vector<1x128xf32> to vector<1x32xf32>
    %177 = vector.extract_strided_slice %175 {offsets = [0, 32], sizes = [1, 32], strides = [1, 1]} : vector<1x128xf32> to vector<1x32xf32>
    %178 = vector.extract_strided_slice %175 {offsets = [0, 96], sizes = [1, 32], strides = [1, 1]} : vector<1x128xf32> to vector<1x32xf32>
    %179 = vector.extract_strided_slice %170 {offsets = [0, 64], sizes = [1, 32], strides = [1, 1]} : vector<1x128xf32> to vector<1x32xf32>
    %180 = math.tanh %179 : vector<1x32xf32>
    %181 = arith.mulf %177, %144 : vector<1x32xf32>
    %182 = arith.mulf %176, %180 : vector<1x32xf32>
    %183 = arith.addf %181, %182 : vector<1x32xf32>
    %184 = math.tanh %183 : vector<1x32xf32>
    %185 = arith.mulf %178, %184 : vector<1x32xf32>
    %cst_37 = arith.constant dense<0.000000e+00> : vector<1x256xf32>
    %186 = tpu.matmul %185, %9, %cst_37 {dimension_numbers = #tpu.dot_dimension_numbers<[1], [0], [0], [1], [0, 0, 1, 1], [], []>} : vector<1x32xf32>, vector<32x256xf32>, vector<1x256xf32> -> vector<1x256xf32>
    %187 = vector.extract_strided_slice %186 {offsets = [0, 128], sizes = [1, 128], strides = [1, 1]} : vector<1x256xf32> to vector<1x128xf32>
    %188 = arith.addf %187, %166 : vector<1x128xf32>
    %189 = arith.addf %188, %11 : vector<1x128xf32>
    %190 = arith.negf %189 : vector<1x128xf32>
    %191 = math.exp %190 : vector<1x128xf32>
    %cst_38 = arith.constant 1.000000e+00 : f32
    %192 = vector.broadcast %cst_38 : f32 to vector<1x128xf32>
    %193 = arith.addf %192, %191 : vector<1x128xf32>
    %194 = arith.divf %192, %193 : vector<1x128xf32>
    %195 = vector.extract_strided_slice %194 {offsets = [0, 0], sizes = [1, 32], strides = [1, 1]} : vector<1x128xf32> to vector<1x32xf32>
    %196 = vector.extract_strided_slice %194 {offsets = [0, 32], sizes = [1, 32], strides = [1, 1]} : vector<1x128xf32> to vector<1x32xf32>
    %197 = vector.extract_strided_slice %194 {offsets = [0, 96], sizes = [1, 32], strides = [1, 1]} : vector<1x128xf32> to vector<1x32xf32>
    %198 = vector.extract_strided_slice %189 {offsets = [0, 64], sizes = [1, 32], strides = [1, 1]} : vector<1x128xf32> to vector<1x32xf32>
    %199 = math.tanh %198 : vector<1x32xf32>
    %200 = arith.mulf %196, %163 : vector<1x32xf32>
    %201 = arith.mulf %195, %199 : vector<1x32xf32>
    %202 = arith.addf %200, %201 : vector<1x32xf32>
    %203 = math.tanh %202 : vector<1x32xf32>
    %204 = arith.mulf %197, %203 : vector<1x32xf32>
    %cst_39 = arith.constant dense<0.000000e+00> : vector<1x128xf32>
    %205 = tpu.matmul %204, %10, %cst_39 {dimension_numbers = #tpu.dot_dimension_numbers<[1], [0], [0], [1], [0, 0, 1, 1], [], []>} : vector<1x32xf32>, vector<32x128xf32>, vector<1x128xf32> -> vector<1x128xf32>
    %206 = vector.extract_strided_slice %186 {offsets = [0, 0], sizes = [1, 128], strides = [1, 1]} : vector<1x256xf32> to vector<1x128xf32>
    %c5_i32 = arith.constant 5 : i32
    %207 = arith.index_cast %c5_i32 : i32 to index
    %c0_40 = arith.constant 0 : index
    %208 = vector.load %arg14[%207, %c0_40] : memref<8x128xf32, #tpu.memory_space<vmem>>, vector<1x128xf32>
    %209 = arith.addf %208, %206 : vector<1x128xf32>
    %210 = arith.negf %209 : vector<1x128xf32>
    %211 = math.exp %210 : vector<1x128xf32>
    %cst_41 = arith.constant 1.000000e+00 : f32
    %212 = vector.broadcast %cst_41 : f32 to vector<1x128xf32>
    %213 = arith.addf %212, %211 : vector<1x128xf32>
    %214 = arith.divf %212, %213 : vector<1x128xf32>
    %215 = vector.extract_strided_slice %214 {offsets = [0, 0], sizes = [1, 32], strides = [1, 1]} : vector<1x128xf32> to vector<1x32xf32>
    %216 = vector.extract_strided_slice %214 {offsets = [0, 32], sizes = [1, 32], strides = [1, 1]} : vector<1x128xf32> to vector<1x32xf32>
    %217 = vector.extract_strided_slice %214 {offsets = [0, 96], sizes = [1, 32], strides = [1, 1]} : vector<1x128xf32> to vector<1x32xf32>
    %218 = vector.extract_strided_slice %209 {offsets = [0, 64], sizes = [1, 32], strides = [1, 1]} : vector<1x128xf32> to vector<1x32xf32>
    %219 = math.tanh %218 : vector<1x32xf32>
    %220 = arith.mulf %216, %183 : vector<1x32xf32>
    %221 = arith.mulf %215, %219 : vector<1x32xf32>
    %222 = arith.addf %220, %221 : vector<1x32xf32>
    %223 = math.tanh %222 : vector<1x32xf32>
    %224 = arith.mulf %217, %223 : vector<1x32xf32>
    %cst_42 = arith.constant dense<0.000000e+00> : vector<1x256xf32>
    %225 = tpu.matmul %224, %9, %cst_42 {dimension_numbers = #tpu.dot_dimension_numbers<[1], [0], [0], [1], [0, 0, 1, 1], [], []>} : vector<1x32xf32>, vector<32x256xf32>, vector<1x256xf32> -> vector<1x256xf32>
    %226 = vector.extract_strided_slice %225 {offsets = [0, 128], sizes = [1, 128], strides = [1, 1]} : vector<1x256xf32> to vector<1x128xf32>
    %227 = arith.addf %226, %205 : vector<1x128xf32>
    %228 = arith.addf %227, %11 : vector<1x128xf32>
    %229 = arith.negf %228 : vector<1x128xf32>
    %230 = math.exp %229 : vector<1x128xf32>
    %cst_43 = arith.constant 1.000000e+00 : f32
    %231 = vector.broadcast %cst_43 : f32 to vector<1x128xf32>
    %232 = arith.addf %231, %230 : vector<1x128xf32>
    %233 = arith.divf %231, %232 : vector<1x128xf32>
    %234 = vector.extract_strided_slice %233 {offsets = [0, 0], sizes = [1, 32], strides = [1, 1]} : vector<1x128xf32> to vector<1x32xf32>
    %235 = vector.extract_strided_slice %233 {offsets = [0, 32], sizes = [1, 32], strides = [1, 1]} : vector<1x128xf32> to vector<1x32xf32>
    %236 = vector.extract_strided_slice %233 {offsets = [0, 96], sizes = [1, 32], strides = [1, 1]} : vector<1x128xf32> to vector<1x32xf32>
    %237 = vector.extract_strided_slice %228 {offsets = [0, 64], sizes = [1, 32], strides = [1, 1]} : vector<1x128xf32> to vector<1x32xf32>
    %238 = math.tanh %237 : vector<1x32xf32>
    %239 = arith.mulf %235, %202 : vector<1x32xf32>
    %240 = arith.mulf %234, %238 : vector<1x32xf32>
    %241 = arith.addf %239, %240 : vector<1x32xf32>
    %242 = math.tanh %241 : vector<1x32xf32>
    %243 = arith.mulf %236, %242 : vector<1x32xf32>
    %cst_44 = arith.constant dense<0.000000e+00> : vector<1x128xf32>
    %244 = tpu.matmul %243, %10, %cst_44 {dimension_numbers = #tpu.dot_dimension_numbers<[1], [0], [0], [1], [0, 0, 1, 1], [], []>} : vector<1x32xf32>, vector<32x128xf32>, vector<1x128xf32> -> vector<1x128xf32>
    %245 = vector.extract_strided_slice %225 {offsets = [0, 0], sizes = [1, 128], strides = [1, 1]} : vector<1x256xf32> to vector<1x128xf32>
    %c6_i32 = arith.constant 6 : i32
    %246 = arith.index_cast %c6_i32 : i32 to index
    %c0_45 = arith.constant 0 : index
    %247 = vector.load %arg14[%246, %c0_45] : memref<8x128xf32, #tpu.memory_space<vmem>>, vector<1x128xf32>
    %248 = arith.addf %247, %245 : vector<1x128xf32>
    %249 = arith.negf %248 : vector<1x128xf32>
    %250 = math.exp %249 : vector<1x128xf32>
    %cst_46 = arith.constant 1.000000e+00 : f32
    %251 = vector.broadcast %cst_46 : f32 to vector<1x128xf32>
    %252 = arith.addf %251, %250 : vector<1x128xf32>
    %253 = arith.divf %251, %252 : vector<1x128xf32>
    %254 = vector.extract_strided_slice %253 {offsets = [0, 0], sizes = [1, 32], strides = [1, 1]} : vector<1x128xf32> to vector<1x32xf32>
    %255 = vector.extract_strided_slice %253 {offsets = [0, 32], sizes = [1, 32], strides = [1, 1]} : vector<1x128xf32> to vector<1x32xf32>
    %256 = vector.extract_strided_slice %253 {offsets = [0, 96], sizes = [1, 32], strides = [1, 1]} : vector<1x128xf32> to vector<1x32xf32>
    %257 = vector.extract_strided_slice %248 {offsets = [0, 64], sizes = [1, 32], strides = [1, 1]} : vector<1x128xf32> to vector<1x32xf32>
    %258 = math.tanh %257 : vector<1x32xf32>
    %259 = arith.mulf %255, %222 : vector<1x32xf32>
    %260 = arith.mulf %254, %258 : vector<1x32xf32>
    %261 = arith.addf %259, %260 : vector<1x32xf32>
    %262 = math.tanh %261 : vector<1x32xf32>
    %263 = arith.mulf %256, %262 : vector<1x32xf32>
    %cst_47 = arith.constant dense<0.000000e+00> : vector<1x256xf32>
    %264 = tpu.matmul %263, %9, %cst_47 {dimension_numbers = #tpu.dot_dimension_numbers<[1], [0], [0], [1], [0, 0, 1, 1], [], []>} : vector<1x32xf32>, vector<32x256xf32>, vector<1x256xf32> -> vector<1x256xf32>
    %265 = vector.extract_strided_slice %264 {offsets = [0, 128], sizes = [1, 128], strides = [1, 1]} : vector<1x256xf32> to vector<1x128xf32>
    %266 = arith.addf %265, %244 : vector<1x128xf32>
    %267 = arith.addf %266, %11 : vector<1x128xf32>
    %268 = arith.negf %267 : vector<1x128xf32>
    %269 = math.exp %268 : vector<1x128xf32>
    %cst_48 = arith.constant 1.000000e+00 : f32
    %270 = vector.broadcast %cst_48 : f32 to vector<1x128xf32>
    %271 = arith.addf %270, %269 : vector<1x128xf32>
    %272 = arith.divf %270, %271 : vector<1x128xf32>
    %273 = vector.extract_strided_slice %272 {offsets = [0, 0], sizes = [1, 32], strides = [1, 1]} : vector<1x128xf32> to vector<1x32xf32>
    %274 = vector.extract_strided_slice %272 {offsets = [0, 32], sizes = [1, 32], strides = [1, 1]} : vector<1x128xf32> to vector<1x32xf32>
    %275 = vector.extract_strided_slice %272 {offsets = [0, 96], sizes = [1, 32], strides = [1, 1]} : vector<1x128xf32> to vector<1x32xf32>
    %276 = vector.extract_strided_slice %267 {offsets = [0, 64], sizes = [1, 32], strides = [1, 1]} : vector<1x128xf32> to vector<1x32xf32>
    %277 = math.tanh %276 : vector<1x32xf32>
    %278 = arith.mulf %274, %241 : vector<1x32xf32>
    %279 = arith.mulf %273, %277 : vector<1x32xf32>
    %280 = arith.addf %278, %279 : vector<1x32xf32>
    %281 = math.tanh %280 : vector<1x32xf32>
    %282 = arith.mulf %275, %281 : vector<1x32xf32>
    %cst_49 = arith.constant dense<0.000000e+00> : vector<1x128xf32>
    %283 = tpu.matmul %282, %10, %cst_49 {dimension_numbers = #tpu.dot_dimension_numbers<[1], [0], [0], [1], [0, 0, 1, 1], [], []>} : vector<1x32xf32>, vector<32x128xf32>, vector<1x128xf32> -> vector<1x128xf32>
    %284 = vector.extract_strided_slice %264 {offsets = [0, 0], sizes = [1, 128], strides = [1, 1]} : vector<1x256xf32> to vector<1x128xf32>
    %c7_i32 = arith.constant 7 : i32
    %285 = arith.index_cast %c7_i32 : i32 to index
    %c0_50 = arith.constant 0 : index
    %286 = vector.load %arg14[%285, %c0_50] : memref<8x128xf32, #tpu.memory_space<vmem>>, vector<1x128xf32>
    %287 = arith.addf %286, %284 : vector<1x128xf32>
    %288 = arith.negf %287 : vector<1x128xf32>
    %289 = math.exp %288 : vector<1x128xf32>
    %cst_51 = arith.constant 1.000000e+00 : f32
    %290 = vector.broadcast %cst_51 : f32 to vector<1x128xf32>
    %291 = arith.addf %290, %289 : vector<1x128xf32>
    %292 = arith.divf %290, %291 : vector<1x128xf32>
    %293 = vector.extract_strided_slice %292 {offsets = [0, 0], sizes = [1, 32], strides = [1, 1]} : vector<1x128xf32> to vector<1x32xf32>
    %294 = vector.extract_strided_slice %292 {offsets = [0, 32], sizes = [1, 32], strides = [1, 1]} : vector<1x128xf32> to vector<1x32xf32>
    %295 = vector.extract_strided_slice %292 {offsets = [0, 96], sizes = [1, 32], strides = [1, 1]} : vector<1x128xf32> to vector<1x32xf32>
    %296 = vector.extract_strided_slice %287 {offsets = [0, 64], sizes = [1, 32], strides = [1, 1]} : vector<1x128xf32> to vector<1x32xf32>
    %297 = math.tanh %296 : vector<1x32xf32>
    %298 = arith.mulf %294, %261 : vector<1x32xf32>
    %299 = arith.mulf %293, %297 : vector<1x32xf32>
    %300 = arith.addf %298, %299 : vector<1x32xf32>
    %301 = math.tanh %300 : vector<1x32xf32>
    %302 = arith.mulf %295, %301 : vector<1x32xf32>
    %cst_52 = arith.constant dense<0.000000e+00> : vector<1x256xf32>
    %303 = tpu.matmul %302, %9, %cst_52 {dimension_numbers = #tpu.dot_dimension_numbers<[1], [0], [0], [1], [0, 0, 1, 1], [], []>} : vector<1x32xf32>, vector<32x256xf32>, vector<1x256xf32> -> vector<1x256xf32>
    %304 = vector.extract_strided_slice %303 {offsets = [0, 128], sizes = [1, 128], strides = [1, 1]} : vector<1x256xf32> to vector<1x128xf32>
    %305 = arith.addf %304, %283 : vector<1x128xf32>
    %306 = arith.addf %305, %11 : vector<1x128xf32>
    %307 = arith.negf %306 : vector<1x128xf32>
    %308 = math.exp %307 : vector<1x128xf32>
    %cst_53 = arith.constant 1.000000e+00 : f32
    %309 = vector.broadcast %cst_53 : f32 to vector<1x128xf32>
    %310 = arith.addf %309, %308 : vector<1x128xf32>
    %311 = arith.divf %309, %310 : vector<1x128xf32>
    %312 = vector.extract_strided_slice %311 {offsets = [0, 0], sizes = [1, 32], strides = [1, 1]} : vector<1x128xf32> to vector<1x32xf32>
    %313 = vector.extract_strided_slice %311 {offsets = [0, 32], sizes = [1, 32], strides = [1, 1]} : vector<1x128xf32> to vector<1x32xf32>
    %314 = vector.extract_strided_slice %311 {offsets = [0, 96], sizes = [1, 32], strides = [1, 1]} : vector<1x128xf32> to vector<1x32xf32>
    %315 = vector.extract_strided_slice %306 {offsets = [0, 64], sizes = [1, 32], strides = [1, 1]} : vector<1x128xf32> to vector<1x32xf32>
    %316 = math.tanh %315 : vector<1x32xf32>
    %317 = arith.mulf %313, %280 : vector<1x32xf32>
    %318 = arith.mulf %312, %316 : vector<1x32xf32>
    %319 = arith.addf %317, %318 : vector<1x32xf32>
    %320 = math.tanh %319 : vector<1x32xf32>
    %321 = arith.mulf %314, %320 : vector<1x32xf32>
    %cst_54 = arith.constant dense<0.000000e+00> : vector<1x128xf32>
    %322 = tpu.matmul %321, %10, %cst_54 {dimension_numbers = #tpu.dot_dimension_numbers<[1], [0], [0], [1], [0, 0, 1, 1], [], []>} : vector<1x32xf32>, vector<32x128xf32>, vector<1x128xf32> -> vector<1x128xf32>
    %323 = vector.extract_strided_slice %303 {offsets = [0, 0], sizes = [1, 128], strides = [1, 1]} : vector<1x256xf32> to vector<1x128xf32>
    %c8_i32 = arith.constant 8 : i32
    %c0_55 = arith.constant 0 : index
    %c0_56 = arith.constant 0 : index
    %324 = vector.load %arg6[%c0_55, %c0_56] : memref<32x256xf32, #tpu.memory_space<vmem>>, vector<32x256xf32>
    %c0_57 = arith.constant 0 : index
    %c0_58 = arith.constant 0 : index
    %325 = vector.load %arg7[%c0_57, %c0_58] : memref<32x256xf32, #tpu.memory_space<vmem>>, vector<32x256xf32>
    %c0_59 = arith.constant 0 : index
    %c0_60 = arith.constant 0 : index
    %326 = vector.load %arg9[%c0_59, %c0_60] : memref<1x128xf32, #tpu.memory_space<vmem>>, vector<1x128xf32>
    %c0_61 = arith.constant 0 : index
    %c0_62 = arith.constant 0 : index
    %327 = vector.load %arg10[%c0_61, %c0_62] : memref<1x128xf32, #tpu.memory_space<vmem>>, vector<1x128xf32>
    %cst_63 = arith.constant dense<0.000000e+00> : vector<1x256xf32>
    %328 = tpu.matmul %302, %324, %cst_63 {dimension_numbers = #tpu.dot_dimension_numbers<[1], [0], [0], [1], [0, 0, 1, 1], [], []>} : vector<1x32xf32>, vector<32x256xf32>, vector<1x256xf32> -> vector<1x256xf32>
    %329 = vector.extract_strided_slice %328 {offsets = [0, 0], sizes = [1, 128], strides = [1, 1]} : vector<1x256xf32> to vector<1x128xf32>
    %cst_64 = arith.constant dense<0.000000e+00> : vector<1x256xf32>
    %330 = tpu.matmul %321, %325, %cst_64 {dimension_numbers = #tpu.dot_dimension_numbers<[1], [0], [0], [1], [0, 0, 1, 1], [], []>} : vector<1x32xf32>, vector<32x256xf32>, vector<1x256xf32> -> vector<1x256xf32>
    %331 = vector.extract_strided_slice %330 {offsets = [0, 0], sizes = [1, 128], strides = [1, 1]} : vector<1x256xf32> to vector<1x128xf32>
    %c0_65 = arith.constant 0 : index
    %c0_66 = arith.constant 0 : index
    %332 = vector.load %arg8[%c0_65, %c0_66] : memref<1x128xf32, #tpu.memory_space<vmem>>, vector<1x128xf32>
    %c0_i32_67 = arith.constant 0 : i32
    %333 = arith.addf %332, %329 : vector<1x128xf32>
    %334 = arith.negf %333 : vector<1x128xf32>
    %335 = math.exp %334 : vector<1x128xf32>
    %cst_68 = arith.constant 1.000000e+00 : f32
    %336 = vector.broadcast %cst_68 : f32 to vector<1x128xf32>
    %337 = arith.addf %336, %335 : vector<1x128xf32>
    %338 = arith.divf %336, %337 : vector<1x128xf32>
    %339 = vector.extract_strided_slice %338 {offsets = [0, 0], sizes = [1, 32], strides = [1, 1]} : vector<1x128xf32> to vector<1x32xf32>
    %340 = vector.extract_strided_slice %338 {offsets = [0, 32], sizes = [1, 32], strides = [1, 1]} : vector<1x128xf32> to vector<1x32xf32>
    %341 = vector.extract_strided_slice %338 {offsets = [0, 96], sizes = [1, 32], strides = [1, 1]} : vector<1x128xf32> to vector<1x32xf32>
    %342 = vector.extract_strided_slice %333 {offsets = [0, 64], sizes = [1, 32], strides = [1, 1]} : vector<1x128xf32> to vector<1x32xf32>
    %343 = math.tanh %342 : vector<1x32xf32>
    %344 = arith.mulf %340, %300 : vector<1x32xf32>
    %345 = arith.mulf %339, %343 : vector<1x32xf32>
    %346 = arith.addf %344, %345 : vector<1x32xf32>
    %347 = math.tanh %346 : vector<1x32xf32>
    %348 = arith.mulf %341, %347 : vector<1x32xf32>
    %cst_69 = arith.constant dense<0.000000e+00> : vector<1x256xf32>
    %349 = tpu.matmul %348, %324, %cst_69 {dimension_numbers = #tpu.dot_dimension_numbers<[1], [0], [0], [1], [0, 0, 1, 1], [], []>} : vector<1x32xf32>, vector<32x256xf32>, vector<1x256xf32> -> vector<1x256xf32>
    %350 = vector.extract_strided_slice %349 {offsets = [0, 128], sizes = [1, 128], strides = [1, 1]} : vector<1x256xf32> to vector<1x128xf32>
    %351 = arith.addf %350, %331 : vector<1x128xf32>
    %352 = arith.addf %351, %326 : vector<1x128xf32>
    %353 = arith.negf %352 : vector<1x128xf32>
    %354 = math.exp %353 : vector<1x128xf32>
    %cst_70 = arith.constant 1.000000e+00 : f32
    %355 = vector.broadcast %cst_70 : f32 to vector<1x128xf32>
    %356 = arith.addf %355, %354 : vector<1x128xf32>
    %357 = arith.divf %355, %356 : vector<1x128xf32>
    %358 = vector.extract_strided_slice %357 {offsets = [0, 0], sizes = [1, 32], strides = [1, 1]} : vector<1x128xf32> to vector<1x32xf32>
    %359 = vector.extract_strided_slice %357 {offsets = [0, 32], sizes = [1, 32], strides = [1, 1]} : vector<1x128xf32> to vector<1x32xf32>
    %360 = vector.extract_strided_slice %357 {offsets = [0, 96], sizes = [1, 32], strides = [1, 1]} : vector<1x128xf32> to vector<1x32xf32>
    %361 = vector.extract_strided_slice %352 {offsets = [0, 64], sizes = [1, 32], strides = [1, 1]} : vector<1x128xf32> to vector<1x32xf32>
    %362 = math.tanh %361 : vector<1x32xf32>
    %363 = arith.mulf %359, %319 : vector<1x32xf32>
    %364 = arith.mulf %358, %362 : vector<1x32xf32>
    %365 = arith.addf %363, %364 : vector<1x32xf32>
    %366 = math.tanh %365 : vector<1x32xf32>
    %367 = arith.mulf %360, %366 : vector<1x32xf32>
    %c7_i32_71 = arith.constant 7 : i32
    %368 = arith.subi %c7_i32_71, %c0_i32_67 : i32
    %369 = arith.index_cast %368 : i32 to index
    %c0_72 = arith.constant 0 : index
    %370 = vector.load %arg15[%369, %c0_72] : memref<8x32xf32, #tpu.memory_space<vmem>>, vector<1x32xf32>
    tpu.vector_store %arg15[%369, %c0_72], %367 {strides = array<i32>} : memref<8x32xf32, #tpu.memory_space<vmem>>, vector<1x32xf32>,
    %cst_73 = arith.constant dense<0.000000e+00> : vector<1x256xf32>
    %371 = tpu.matmul %367, %325, %cst_73 {dimension_numbers = #tpu.dot_dimension_numbers<[1], [0], [0], [1], [0, 0, 1, 1], [], []>} : vector<1x32xf32>, vector<32x256xf32>, vector<1x256xf32> -> vector<1x256xf32>
    %372 = vector.extract_strided_slice %349 {offsets = [0, 0], sizes = [1, 128], strides = [1, 1]} : vector<1x256xf32> to vector<1x128xf32>
    %373 = vector.extract_strided_slice %371 {offsets = [0, 0], sizes = [1, 128], strides = [1, 1]} : vector<1x256xf32> to vector<1x128xf32>
    %374 = vector.extract_strided_slice %371 {offsets = [0, 128], sizes = [1, 128], strides = [1, 1]} : vector<1x256xf32> to vector<1x128xf32>
    %375 = arith.addf %374, %327 : vector<1x128xf32>
    %c1_i32_74 = arith.constant 1 : i32
    %376 = arith.addf %375, %372 : vector<1x128xf32>
    %377 = arith.negf %376 : vector<1x128xf32>
    %378 = math.exp %377 : vector<1x128xf32>
    %cst_75 = arith.constant 1.000000e+00 : f32
    %379 = vector.broadcast %cst_75 : f32 to vector<1x128xf32>
    %380 = arith.addf %379, %378 : vector<1x128xf32>
    %381 = arith.divf %379, %380 : vector<1x128xf32>
    %382 = vector.extract_strided_slice %381 {offsets = [0, 0], sizes = [1, 32], strides = [1, 1]} : vector<1x128xf32> to vector<1x32xf32>
    %383 = vector.extract_strided_slice %381 {offsets = [0, 32], sizes = [1, 32], strides = [1, 1]} : vector<1x128xf32> to vector<1x32xf32>
    %384 = vector.extract_strided_slice %381 {offsets = [0, 96], sizes = [1, 32], strides = [1, 1]} : vector<1x128xf32> to vector<1x32xf32>
    %385 = vector.extract_strided_slice %376 {offsets = [0, 64], sizes = [1, 32], strides = [1, 1]} : vector<1x128xf32> to vector<1x32xf32>
    %386 = math.tanh %385 : vector<1x32xf32>
    %387 = arith.mulf %383, %346 : vector<1x32xf32>
    %388 = arith.mulf %382, %386 : vector<1x32xf32>
    %389 = arith.addf %387, %388 : vector<1x32xf32>
    %390 = math.tanh %389 : vector<1x32xf32>
    %391 = arith.mulf %384, %390 : vector<1x32xf32>
    %cst_76 = arith.constant dense<0.000000e+00> : vector<1x256xf32>
    %392 = tpu.matmul %391, %324, %cst_76 {dimension_numbers = #tpu.dot_dimension_numbers<[1], [0], [0], [1], [0, 0, 1, 1], [], []>} : vector<1x32xf32>, vector<32x256xf32>, vector<1x256xf32> -> vector<1x256xf32>
    %393 = vector.extract_strided_slice %392 {offsets = [0, 128], sizes = [1, 128], strides = [1, 1]} : vector<1x256xf32> to vector<1x128xf32>
    %394 = arith.addf %393, %373 : vector<1x128xf32>
    %395 = arith.addf %394, %326 : vector<1x128xf32>
    %396 = arith.negf %395 : vector<1x128xf32>
    %397 = math.exp %396 : vector<1x128xf32>
    %cst_77 = arith.constant 1.000000e+00 : f32
    %398 = vector.broadcast %cst_77 : f32 to vector<1x128xf32>
    %399 = arith.addf %398, %397 : vector<1x128xf32>
    %400 = arith.divf %398, %399 : vector<1x128xf32>
    %401 = vector.extract_strided_slice %400 {offsets = [0, 0], sizes = [1, 32], strides = [1, 1]} : vector<1x128xf32> to vector<1x32xf32>
    %402 = vector.extract_strided_slice %400 {offsets = [0, 32], sizes = [1, 32], strides = [1, 1]} : vector<1x128xf32> to vector<1x32xf32>
    %403 = vector.extract_strided_slice %400 {offsets = [0, 96], sizes = [1, 32], strides = [1, 1]} : vector<1x128xf32> to vector<1x32xf32>
    %404 = vector.extract_strided_slice %395 {offsets = [0, 64], sizes = [1, 32], strides = [1, 1]} : vector<1x128xf32> to vector<1x32xf32>
    %405 = math.tanh %404 : vector<1x32xf32>
    %406 = arith.mulf %402, %365 : vector<1x32xf32>
    %407 = arith.mulf %401, %405 : vector<1x32xf32>
    %408 = arith.addf %406, %407 : vector<1x32xf32>
    %409 = math.tanh %408 : vector<1x32xf32>
    %410 = arith.mulf %403, %409 : vector<1x32xf32>
    %c7_i32_78 = arith.constant 7 : i32
    %411 = arith.subi %c7_i32_78, %c1_i32_74 : i32
    %412 = arith.index_cast %411 : i32 to index
    %c0_79 = arith.constant 0 : index
    %413 = vector.load %arg15[%412, %c0_79] : memref<8x32xf32, #tpu.memory_space<vmem>>, vector<1x32xf32>
    tpu.vector_store %arg15[%412, %c0_79], %410 {strides = array<i32>} : memref<8x32xf32, #tpu.memory_space<vmem>>, vector<1x32xf32>,
    %cst_80 = arith.constant dense<0.000000e+00> : vector<1x256xf32>
    %414 = tpu.matmul %410, %325, %cst_80 {dimension_numbers = #tpu.dot_dimension_numbers<[1], [0], [0], [1], [0, 0, 1, 1], [], []>} : vector<1x32xf32>, vector<32x256xf32>, vector<1x256xf32> -> vector<1x256xf32>
    %415 = vector.extract_strided_slice %392 {offsets = [0, 0], sizes = [1, 128], strides = [1, 1]} : vector<1x256xf32> to vector<1x128xf32>
    %416 = vector.extract_strided_slice %414 {offsets = [0, 0], sizes = [1, 128], strides = [1, 1]} : vector<1x256xf32> to vector<1x128xf32>
    %417 = vector.extract_strided_slice %414 {offsets = [0, 128], sizes = [1, 128], strides = [1, 1]} : vector<1x256xf32> to vector<1x128xf32>
    %418 = arith.addf %417, %327 : vector<1x128xf32>
    %c2_i32_81 = arith.constant 2 : i32
    %419 = arith.addf %418, %415 : vector<1x128xf32>
    %420 = arith.negf %419 : vector<1x128xf32>
    %421 = math.exp %420 : vector<1x128xf32>
    %cst_82 = arith.constant 1.000000e+00 : f32
    %422 = vector.broadcast %cst_82 : f32 to vector<1x128xf32>
    %423 = arith.addf %422, %421 : vector<1x128xf32>
    %424 = arith.divf %422, %423 : vector<1x128xf32>
    %425 = vector.extract_strided_slice %424 {offsets = [0, 0], sizes = [1, 32], strides = [1, 1]} : vector<1x128xf32> to vector<1x32xf32>
    %426 = vector.extract_strided_slice %424 {offsets = [0, 32], sizes = [1, 32], strides = [1, 1]} : vector<1x128xf32> to vector<1x32xf32>
    %427 = vector.extract_strided_slice %424 {offsets = [0, 96], sizes = [1, 32], strides = [1, 1]} : vector<1x128xf32> to vector<1x32xf32>
    %428 = vector.extract_strided_slice %419 {offsets = [0, 64], sizes = [1, 32], strides = [1, 1]} : vector<1x128xf32> to vector<1x32xf32>
    %429 = math.tanh %428 : vector<1x32xf32>
    %430 = arith.mulf %426, %389 : vector<1x32xf32>
    %431 = arith.mulf %425, %429 : vector<1x32xf32>
    %432 = arith.addf %430, %431 : vector<1x32xf32>
    %433 = math.tanh %432 : vector<1x32xf32>
    %434 = arith.mulf %427, %433 : vector<1x32xf32>
    %cst_83 = arith.constant dense<0.000000e+00> : vector<1x256xf32>
    %435 = tpu.matmul %434, %324, %cst_83 {dimension_numbers = #tpu.dot_dimension_numbers<[1], [0], [0], [1], [0, 0, 1, 1], [], []>} : vector<1x32xf32>, vector<32x256xf32>, vector<1x256xf32> -> vector<1x256xf32>
    %436 = vector.extract_strided_slice %435 {offsets = [0, 128], sizes = [1, 128], strides = [1, 1]} : vector<1x256xf32> to vector<1x128xf32>
    %437 = arith.addf %436, %416 : vector<1x128xf32>
    %438 = arith.addf %437, %326 : vector<1x128xf32>
    %439 = arith.negf %438 : vector<1x128xf32>
    %440 = math.exp %439 : vector<1x128xf32>
    %cst_84 = arith.constant 1.000000e+00 : f32
    %441 = vector.broadcast %cst_84 : f32 to vector<1x128xf32>
    %442 = arith.addf %441, %440 : vector<1x128xf32>
    %443 = arith.divf %441, %442 : vector<1x128xf32>
    %444 = vector.extract_strided_slice %443 {offsets = [0, 0], sizes = [1, 32], strides = [1, 1]} : vector<1x128xf32> to vector<1x32xf32>
    %445 = vector.extract_strided_slice %443 {offsets = [0, 32], sizes = [1, 32], strides = [1, 1]} : vector<1x128xf32> to vector<1x32xf32>
    %446 = vector.extract_strided_slice %443 {offsets = [0, 96], sizes = [1, 32], strides = [1, 1]} : vector<1x128xf32> to vector<1x32xf32>
    %447 = vector.extract_strided_slice %438 {offsets = [0, 64], sizes = [1, 32], strides = [1, 1]} : vector<1x128xf32> to vector<1x32xf32>
    %448 = math.tanh %447 : vector<1x32xf32>
    %449 = arith.mulf %445, %408 : vector<1x32xf32>
    %450 = arith.mulf %444, %448 : vector<1x32xf32>
    %451 = arith.addf %449, %450 : vector<1x32xf32>
    %452 = math.tanh %451 : vector<1x32xf32>
    %453 = arith.mulf %446, %452 : vector<1x32xf32>
    %c7_i32_85 = arith.constant 7 : i32
    %454 = arith.subi %c7_i32_85, %c2_i32_81 : i32
    %455 = arith.index_cast %454 : i32 to index
    %c0_86 = arith.constant 0 : index
    %456 = vector.load %arg15[%455, %c0_86] : memref<8x32xf32, #tpu.memory_space<vmem>>, vector<1x32xf32>
    tpu.vector_store %arg15[%455, %c0_86], %453 {strides = array<i32>} : memref<8x32xf32, #tpu.memory_space<vmem>>, vector<1x32xf32>,
    %cst_87 = arith.constant dense<0.000000e+00> : vector<1x256xf32>
    %457 = tpu.matmul %453, %325, %cst_87 {dimension_numbers = #tpu.dot_dimension_numbers<[1], [0], [0], [1], [0, 0, 1, 1], [], []>} : vector<1x32xf32>, vector<32x256xf32>, vector<1x256xf32> -> vector<1x256xf32>
    %458 = vector.extract_strided_slice %435 {offsets = [0, 0], sizes = [1, 128], strides = [1, 1]} : vector<1x256xf32> to vector<1x128xf32>
    %459 = vector.extract_strided_slice %457 {offsets = [0, 0], sizes = [1, 128], strides = [1, 1]} : vector<1x256xf32> to vector<1x128xf32>
    %460 = vector.extract_strided_slice %457 {offsets = [0, 128], sizes = [1, 128], strides = [1, 1]} : vector<1x256xf32> to vector<1x128xf32>
    %461 = arith.addf %460, %327 : vector<1x128xf32>
    %c3_i32_88 = arith.constant 3 : i32
    %462 = arith.addf %461, %458 : vector<1x128xf32>
    %463 = arith.negf %462 : vector<1x128xf32>
    %464 = math.exp %463 : vector<1x128xf32>
    %cst_89 = arith.constant 1.000000e+00 : f32
    %465 = vector.broadcast %cst_89 : f32 to vector<1x128xf32>
    %466 = arith.addf %465, %464 : vector<1x128xf32>
    %467 = arith.divf %465, %466 : vector<1x128xf32>
    %468 = vector.extract_strided_slice %467 {offsets = [0, 0], sizes = [1, 32], strides = [1, 1]} : vector<1x128xf32> to vector<1x32xf32>
    %469 = vector.extract_strided_slice %467 {offsets = [0, 32], sizes = [1, 32], strides = [1, 1]} : vector<1x128xf32> to vector<1x32xf32>
    %470 = vector.extract_strided_slice %467 {offsets = [0, 96], sizes = [1, 32], strides = [1, 1]} : vector<1x128xf32> to vector<1x32xf32>
    %471 = vector.extract_strided_slice %462 {offsets = [0, 64], sizes = [1, 32], strides = [1, 1]} : vector<1x128xf32> to vector<1x32xf32>
    %472 = math.tanh %471 : vector<1x32xf32>
    %473 = arith.mulf %469, %432 : vector<1x32xf32>
    %474 = arith.mulf %468, %472 : vector<1x32xf32>
    %475 = arith.addf %473, %474 : vector<1x32xf32>
    %476 = math.tanh %475 : vector<1x32xf32>
    %477 = arith.mulf %470, %476 : vector<1x32xf32>
    %cst_90 = arith.constant dense<0.000000e+00> : vector<1x256xf32>
    %478 = tpu.matmul %477, %324, %cst_90 {dimension_numbers = #tpu.dot_dimension_numbers<[1], [0], [0], [1], [0, 0, 1, 1], [], []>} : vector<1x32xf32>, vector<32x256xf32>, vector<1x256xf32> -> vector<1x256xf32>
    %479 = vector.extract_strided_slice %478 {offsets = [0, 128], sizes = [1, 128], strides = [1, 1]} : vector<1x256xf32> to vector<1x128xf32>
    %480 = arith.addf %479, %459 : vector<1x128xf32>
    %481 = arith.addf %480, %326 : vector<1x128xf32>
    %482 = arith.negf %481 : vector<1x128xf32>
    %483 = math.exp %482 : vector<1x128xf32>
    %cst_91 = arith.constant 1.000000e+00 : f32
    %484 = vector.broadcast %cst_91 : f32 to vector<1x128xf32>
    %485 = arith.addf %484, %483 : vector<1x128xf32>
    %486 = arith.divf %484, %485 : vector<1x128xf32>
    %487 = vector.extract_strided_slice %486 {offsets = [0, 0], sizes = [1, 32], strides = [1, 1]} : vector<1x128xf32> to vector<1x32xf32>
    %488 = vector.extract_strided_slice %486 {offsets = [0, 32], sizes = [1, 32], strides = [1, 1]} : vector<1x128xf32> to vector<1x32xf32>
    %489 = vector.extract_strided_slice %486 {offsets = [0, 96], sizes = [1, 32], strides = [1, 1]} : vector<1x128xf32> to vector<1x32xf32>
    %490 = vector.extract_strided_slice %481 {offsets = [0, 64], sizes = [1, 32], strides = [1, 1]} : vector<1x128xf32> to vector<1x32xf32>
    %491 = math.tanh %490 : vector<1x32xf32>
    %492 = arith.mulf %488, %451 : vector<1x32xf32>
    %493 = arith.mulf %487, %491 : vector<1x32xf32>
    %494 = arith.addf %492, %493 : vector<1x32xf32>
    %495 = math.tanh %494 : vector<1x32xf32>
    %496 = arith.mulf %489, %495 : vector<1x32xf32>
    %c7_i32_92 = arith.constant 7 : i32
    %497 = arith.subi %c7_i32_92, %c3_i32_88 : i32
    %498 = arith.index_cast %497 : i32 to index
    %c0_93 = arith.constant 0 : index
    %499 = vector.load %arg15[%498, %c0_93] : memref<8x32xf32, #tpu.memory_space<vmem>>, vector<1x32xf32>
    tpu.vector_store %arg15[%498, %c0_93], %496 {strides = array<i32>} : memref<8x32xf32, #tpu.memory_space<vmem>>, vector<1x32xf32>,
    %cst_94 = arith.constant dense<0.000000e+00> : vector<1x256xf32>
    %500 = tpu.matmul %496, %325, %cst_94 {dimension_numbers = #tpu.dot_dimension_numbers<[1], [0], [0], [1], [0, 0, 1, 1], [], []>} : vector<1x32xf32>, vector<32x256xf32>, vector<1x256xf32> -> vector<1x256xf32>
    %501 = vector.extract_strided_slice %478 {offsets = [0, 0], sizes = [1, 128], strides = [1, 1]} : vector<1x256xf32> to vector<1x128xf32>
    %502 = vector.extract_strided_slice %500 {offsets = [0, 0], sizes = [1, 128], strides = [1, 1]} : vector<1x256xf32> to vector<1x128xf32>
    %503 = vector.extract_strided_slice %500 {offsets = [0, 128], sizes = [1, 128], strides = [1, 1]} : vector<1x256xf32> to vector<1x128xf32>
    %504 = arith.addf %503, %327 : vector<1x128xf32>
    %c4_i32_95 = arith.constant 4 : i32
    %505 = arith.addf %504, %501 : vector<1x128xf32>
    %506 = arith.negf %505 : vector<1x128xf32>
    %507 = math.exp %506 : vector<1x128xf32>
    %cst_96 = arith.constant 1.000000e+00 : f32
    %508 = vector.broadcast %cst_96 : f32 to vector<1x128xf32>
    %509 = arith.addf %508, %507 : vector<1x128xf32>
    %510 = arith.divf %508, %509 : vector<1x128xf32>
    %511 = vector.extract_strided_slice %510 {offsets = [0, 0], sizes = [1, 32], strides = [1, 1]} : vector<1x128xf32> to vector<1x32xf32>
    %512 = vector.extract_strided_slice %510 {offsets = [0, 32], sizes = [1, 32], strides = [1, 1]} : vector<1x128xf32> to vector<1x32xf32>
    %513 = vector.extract_strided_slice %510 {offsets = [0, 96], sizes = [1, 32], strides = [1, 1]} : vector<1x128xf32> to vector<1x32xf32>
    %514 = vector.extract_strided_slice %505 {offsets = [0, 64], sizes = [1, 32], strides = [1, 1]} : vector<1x128xf32> to vector<1x32xf32>
    %515 = math.tanh %514 : vector<1x32xf32>
    %516 = arith.mulf %512, %475 : vector<1x32xf32>
    %517 = arith.mulf %511, %515 : vector<1x32xf32>
    %518 = arith.addf %516, %517 : vector<1x32xf32>
    %519 = math.tanh %518 : vector<1x32xf32>
    %520 = arith.mulf %513, %519 : vector<1x32xf32>
    %cst_97 = arith.constant dense<0.000000e+00> : vector<1x256xf32>
    %521 = tpu.matmul %520, %324, %cst_97 {dimension_numbers = #tpu.dot_dimension_numbers<[1], [0], [0], [1], [0, 0, 1, 1], [], []>} : vector<1x32xf32>, vector<32x256xf32>, vector<1x256xf32> -> vector<1x256xf32>
    %522 = vector.extract_strided_slice %521 {offsets = [0, 128], sizes = [1, 128], strides = [1, 1]} : vector<1x256xf32> to vector<1x128xf32>
    %523 = arith.addf %522, %502 : vector<1x128xf32>
    %524 = arith.addf %523, %326 : vector<1x128xf32>
    %525 = arith.negf %524 : vector<1x128xf32>
    %526 = math.exp %525 : vector<1x128xf32>
    %cst_98 = arith.constant 1.000000e+00 : f32
    %527 = vector.broadcast %cst_98 : f32 to vector<1x128xf32>
    %528 = arith.addf %527, %526 : vector<1x128xf32>
    %529 = arith.divf %527, %528 : vector<1x128xf32>
    %530 = vector.extract_strided_slice %529 {offsets = [0, 0], sizes = [1, 32], strides = [1, 1]} : vector<1x128xf32> to vector<1x32xf32>
    %531 = vector.extract_strided_slice %529 {offsets = [0, 32], sizes = [1, 32], strides = [1, 1]} : vector<1x128xf32> to vector<1x32xf32>
    %532 = vector.extract_strided_slice %529 {offsets = [0, 96], sizes = [1, 32], strides = [1, 1]} : vector<1x128xf32> to vector<1x32xf32>
    %533 = vector.extract_strided_slice %524 {offsets = [0, 64], sizes = [1, 32], strides = [1, 1]} : vector<1x128xf32> to vector<1x32xf32>
    %534 = math.tanh %533 : vector<1x32xf32>
    %535 = arith.mulf %531, %494 : vector<1x32xf32>
    %536 = arith.mulf %530, %534 : vector<1x32xf32>
    %537 = arith.addf %535, %536 : vector<1x32xf32>
    %538 = math.tanh %537 : vector<1x32xf32>
    %539 = arith.mulf %532, %538 : vector<1x32xf32>
    %c7_i32_99 = arith.constant 7 : i32
    %540 = arith.subi %c7_i32_99, %c4_i32_95 : i32
    %541 = arith.index_cast %540 : i32 to index
    %c0_100 = arith.constant 0 : index
    %542 = vector.load %arg15[%541, %c0_100] : memref<8x32xf32, #tpu.memory_space<vmem>>, vector<1x32xf32>
    tpu.vector_store %arg15[%541, %c0_100], %539 {strides = array<i32>} : memref<8x32xf32, #tpu.memory_space<vmem>>, vector<1x32xf32>,
    %cst_101 = arith.constant dense<0.000000e+00> : vector<1x256xf32>
    %543 = tpu.matmul %539, %325, %cst_101 {dimension_numbers = #tpu.dot_dimension_numbers<[1], [0], [0], [1], [0, 0, 1, 1], [], []>} : vector<1x32xf32>, vector<32x256xf32>, vector<1x256xf32> -> vector<1x256xf32>
    %544 = vector.extract_strided_slice %521 {offsets = [0, 0], sizes = [1, 128], strides = [1, 1]} : vector<1x256xf32> to vector<1x128xf32>
    %545 = vector.extract_strided_slice %543 {offsets = [0, 0], sizes = [1, 128], strides = [1, 1]} : vector<1x256xf32> to vector<1x128xf32>
    %546 = vector.extract_strided_slice %543 {offsets = [0, 128], sizes = [1, 128], strides = [1, 1]} : vector<1x256xf32> to vector<1x128xf32>
    %547 = arith.addf %546, %327 : vector<1x128xf32>
    %c5_i32_102 = arith.constant 5 : i32
    %548 = arith.addf %547, %544 : vector<1x128xf32>
    %549 = arith.negf %548 : vector<1x128xf32>
    %550 = math.exp %549 : vector<1x128xf32>
    %cst_103 = arith.constant 1.000000e+00 : f32
    %551 = vector.broadcast %cst_103 : f32 to vector<1x128xf32>
    %552 = arith.addf %551, %550 : vector<1x128xf32>
    %553 = arith.divf %551, %552 : vector<1x128xf32>
    %554 = vector.extract_strided_slice %553 {offsets = [0, 0], sizes = [1, 32], strides = [1, 1]} : vector<1x128xf32> to vector<1x32xf32>
    %555 = vector.extract_strided_slice %553 {offsets = [0, 32], sizes = [1, 32], strides = [1, 1]} : vector<1x128xf32> to vector<1x32xf32>
    %556 = vector.extract_strided_slice %553 {offsets = [0, 96], sizes = [1, 32], strides = [1, 1]} : vector<1x128xf32> to vector<1x32xf32>
    %557 = vector.extract_strided_slice %548 {offsets = [0, 64], sizes = [1, 32], strides = [1, 1]} : vector<1x128xf32> to vector<1x32xf32>
    %558 = math.tanh %557 : vector<1x32xf32>
    %559 = arith.mulf %555, %518 : vector<1x32xf32>
    %560 = arith.mulf %554, %558 : vector<1x32xf32>
    %561 = arith.addf %559, %560 : vector<1x32xf32>
    %562 = math.tanh %561 : vector<1x32xf32>
    %563 = arith.mulf %556, %562 : vector<1x32xf32>
    %cst_104 = arith.constant dense<0.000000e+00> : vector<1x256xf32>
    %564 = tpu.matmul %563, %324, %cst_104 {dimension_numbers = #tpu.dot_dimension_numbers<[1], [0], [0], [1], [0, 0, 1, 1], [], []>} : vector<1x32xf32>, vector<32x256xf32>, vector<1x256xf32> -> vector<1x256xf32>
    %565 = vector.extract_strided_slice %564 {offsets = [0, 128], sizes = [1, 128], strides = [1, 1]} : vector<1x256xf32> to vector<1x128xf32>
    %566 = arith.addf %565, %545 : vector<1x128xf32>
    %567 = arith.addf %566, %326 : vector<1x128xf32>
    %568 = arith.negf %567 : vector<1x128xf32>
    %569 = math.exp %568 : vector<1x128xf32>
    %cst_105 = arith.constant 1.000000e+00 : f32
    %570 = vector.broadcast %cst_105 : f32 to vector<1x128xf32>
    %571 = arith.addf %570, %569 : vector<1x128xf32>
    %572 = arith.divf %570, %571 : vector<1x128xf32>
    %573 = vector.extract_strided_slice %572 {offsets = [0, 0], sizes = [1, 32], strides = [1, 1]} : vector<1x128xf32> to vector<1x32xf32>
    %574 = vector.extract_strided_slice %572 {offsets = [0, 32], sizes = [1, 32], strides = [1, 1]} : vector<1x128xf32> to vector<1x32xf32>
    %575 = vector.extract_strided_slice %572 {offsets = [0, 96], sizes = [1, 32], strides = [1, 1]} : vector<1x128xf32> to vector<1x32xf32>
    %576 = vector.extract_strided_slice %567 {offsets = [0, 64], sizes = [1, 32], strides = [1, 1]} : vector<1x128xf32> to vector<1x32xf32>
    %577 = math.tanh %576 : vector<1x32xf32>
    %578 = arith.mulf %574, %537 : vector<1x32xf32>
    %579 = arith.mulf %573, %577 : vector<1x32xf32>
    %580 = arith.addf %578, %579 : vector<1x32xf32>
    %581 = math.tanh %580 : vector<1x32xf32>
    %582 = arith.mulf %575, %581 : vector<1x32xf32>
    %c7_i32_106 = arith.constant 7 : i32
    %583 = arith.subi %c7_i32_106, %c5_i32_102 : i32
    %584 = arith.index_cast %583 : i32 to index
    %c0_107 = arith.constant 0 : index
    %585 = vector.load %arg15[%584, %c0_107] : memref<8x32xf32, #tpu.memory_space<vmem>>, vector<1x32xf32>
    tpu.vector_store %arg15[%584, %c0_107], %582 {strides = array<i32>} : memref<8x32xf32, #tpu.memory_space<vmem>>, vector<1x32xf32>,
    %cst_108 = arith.constant dense<0.000000e+00> : vector<1x256xf32>
    %586 = tpu.matmul %582, %325, %cst_108 {dimension_numbers = #tpu.dot_dimension_numbers<[1], [0], [0], [1], [0, 0, 1, 1], [], []>} : vector<1x32xf32>, vector<32x256xf32>, vector<1x256xf32> -> vector<1x256xf32>
    %587 = vector.extract_strided_slice %564 {offsets = [0, 0], sizes = [1, 128], strides = [1, 1]} : vector<1x256xf32> to vector<1x128xf32>
    %588 = vector.extract_strided_slice %586 {offsets = [0, 0], sizes = [1, 128], strides = [1, 1]} : vector<1x256xf32> to vector<1x128xf32>
    %589 = vector.extract_strided_slice %586 {offsets = [0, 128], sizes = [1, 128], strides = [1, 1]} : vector<1x256xf32> to vector<1x128xf32>
    %590 = arith.addf %589, %327 : vector<1x128xf32>
    %c6_i32_109 = arith.constant 6 : i32
    %591 = arith.addf %590, %587 : vector<1x128xf32>
    %592 = arith.negf %591 : vector<1x128xf32>
    %593 = math.exp %592 : vector<1x128xf32>
    %cst_110 = arith.constant 1.000000e+00 : f32
    %594 = vector.broadcast %cst_110 : f32 to vector<1x128xf32>
    %595 = arith.addf %594, %593 : vector<1x128xf32>
    %596 = arith.divf %594, %595 : vector<1x128xf32>
    %597 = vector.extract_strided_slice %596 {offsets = [0, 0], sizes = [1, 32], strides = [1, 1]} : vector<1x128xf32> to vector<1x32xf32>
    %598 = vector.extract_strided_slice %596 {offsets = [0, 32], sizes = [1, 32], strides = [1, 1]} : vector<1x128xf32> to vector<1x32xf32>
    %599 = vector.extract_strided_slice %596 {offsets = [0, 96], sizes = [1, 32], strides = [1, 1]} : vector<1x128xf32> to vector<1x32xf32>
    %600 = vector.extract_strided_slice %591 {offsets = [0, 64], sizes = [1, 32], strides = [1, 1]} : vector<1x128xf32> to vector<1x32xf32>
    %601 = math.tanh %600 : vector<1x32xf32>
    %602 = arith.mulf %598, %561 : vector<1x32xf32>
    %603 = arith.mulf %597, %601 : vector<1x32xf32>
    %604 = arith.addf %602, %603 : vector<1x32xf32>
    %605 = math.tanh %604 : vector<1x32xf32>
    %606 = arith.mulf %599, %605 : vector<1x32xf32>
    %cst_111 = arith.constant dense<0.000000e+00> : vector<1x256xf32>
    %607 = tpu.matmul %606, %324, %cst_111 {dimension_numbers = #tpu.dot_dimension_numbers<[1], [0], [0], [1], [0, 0, 1, 1], [], []>} : vector<1x32xf32>, vector<32x256xf32>, vector<1x256xf32> -> vector<1x256xf32>
    %608 = vector.extract_strided_slice %607 {offsets = [0, 128], sizes = [1, 128], strides = [1, 1]} : vector<1x256xf32> to vector<1x128xf32>
    %609 = arith.addf %608, %588 : vector<1x128xf32>
    %610 = arith.addf %609, %326 : vector<1x128xf32>
    %611 = arith.negf %610 : vector<1x128xf32>
    %612 = math.exp %611 : vector<1x128xf32>
    %cst_112 = arith.constant 1.000000e+00 : f32
    %613 = vector.broadcast %cst_112 : f32 to vector<1x128xf32>
    %614 = arith.addf %613, %612 : vector<1x128xf32>
    %615 = arith.divf %613, %614 : vector<1x128xf32>
    %616 = vector.extract_strided_slice %615 {offsets = [0, 0], sizes = [1, 32], strides = [1, 1]} : vector<1x128xf32> to vector<1x32xf32>
    %617 = vector.extract_strided_slice %615 {offsets = [0, 32], sizes = [1, 32], strides = [1, 1]} : vector<1x128xf32> to vector<1x32xf32>
    %618 = vector.extract_strided_slice %615 {offsets = [0, 96], sizes = [1, 32], strides = [1, 1]} : vector<1x128xf32> to vector<1x32xf32>
    %619 = vector.extract_strided_slice %610 {offsets = [0, 64], sizes = [1, 32], strides = [1, 1]} : vector<1x128xf32> to vector<1x32xf32>
    %620 = math.tanh %619 : vector<1x32xf32>
    %621 = arith.mulf %617, %580 : vector<1x32xf32>
    %622 = arith.mulf %616, %620 : vector<1x32xf32>
    %623 = arith.addf %621, %622 : vector<1x32xf32>
    %624 = math.tanh %623 : vector<1x32xf32>
    %625 = arith.mulf %618, %624 : vector<1x32xf32>
    %c7_i32_113 = arith.constant 7 : i32
    %626 = arith.subi %c7_i32_113, %c6_i32_109 : i32
    %627 = arith.index_cast %626 : i32 to index
    %c0_114 = arith.constant 0 : index
    %628 = vector.load %arg15[%627, %c0_114] : memref<8x32xf32, #tpu.memory_space<vmem>>, vector<1x32xf32>
    tpu.vector_store %arg15[%627, %c0_114], %625 {strides = array<i32>} : memref<8x32xf32, #tpu.memory_space<vmem>>, vector<1x32xf32>,
    %cst_115 = arith.constant dense<0.000000e+00> : vector<1x256xf32>
    %629 = tpu.matmul %625, %325, %cst_115 {dimension_numbers = #tpu.dot_dimension_numbers<[1], [0], [0], [1], [0, 0, 1, 1], [], []>} : vector<1x32xf32>, vector<32x256xf32>, vector<1x256xf32> -> vector<1x256xf32>
    %630 = vector.extract_strided_slice %607 {offsets = [0, 0], sizes = [1, 128], strides = [1, 1]} : vector<1x256xf32> to vector<1x128xf32>
    %631 = vector.extract_strided_slice %629 {offsets = [0, 0], sizes = [1, 128], strides = [1, 1]} : vector<1x256xf32> to vector<1x128xf32>
    %632 = vector.extract_strided_slice %629 {offsets = [0, 128], sizes = [1, 128], strides = [1, 1]} : vector<1x256xf32> to vector<1x128xf32>
    %633 = arith.addf %632, %327 : vector<1x128xf32>
    %c7_i32_116 = arith.constant 7 : i32
    %634 = arith.addf %633, %630 : vector<1x128xf32>
    %635 = arith.negf %634 : vector<1x128xf32>
    %636 = math.exp %635 : vector<1x128xf32>
    %cst_117 = arith.constant 1.000000e+00 : f32
    %637 = vector.broadcast %cst_117 : f32 to vector<1x128xf32>
    %638 = arith.addf %637, %636 : vector<1x128xf32>
    %639 = arith.divf %637, %638 : vector<1x128xf32>
    %640 = vector.extract_strided_slice %639 {offsets = [0, 0], sizes = [1, 32], strides = [1, 1]} : vector<1x128xf32> to vector<1x32xf32>
    %641 = vector.extract_strided_slice %639 {offsets = [0, 32], sizes = [1, 32], strides = [1, 1]} : vector<1x128xf32> to vector<1x32xf32>
    %642 = vector.extract_strided_slice %639 {offsets = [0, 96], sizes = [1, 32], strides = [1, 1]} : vector<1x128xf32> to vector<1x32xf32>
    %643 = vector.extract_strided_slice %634 {offsets = [0, 64], sizes = [1, 32], strides = [1, 1]} : vector<1x128xf32> to vector<1x32xf32>
    %644 = math.tanh %643 : vector<1x32xf32>
    %645 = arith.mulf %641, %604 : vector<1x32xf32>
    %646 = arith.mulf %640, %644 : vector<1x32xf32>
    %647 = arith.addf %645, %646 : vector<1x32xf32>
    %648 = math.tanh %647 : vector<1x32xf32>
    %649 = arith.mulf %642, %648 : vector<1x32xf32>
    %cst_118 = arith.constant dense<0.000000e+00> : vector<1x256xf32>
    %650 = tpu.matmul %649, %324, %cst_118 {dimension_numbers = #tpu.dot_dimension_numbers<[1], [0], [0], [1], [0, 0, 1, 1], [], []>} : vector<1x32xf32>, vector<32x256xf32>, vector<1x256xf32> -> vector<1x256xf32>
    %651 = vector.extract_strided_slice %650 {offsets = [0, 128], sizes = [1, 128], strides = [1, 1]} : vector<1x256xf32> to vector<1x128xf32>
    %652 = arith.addf %651, %631 : vector<1x128xf32>
    %653 = arith.addf %652, %326 : vector<1x128xf32>
    %654 = arith.negf %653 : vector<1x128xf32>
    %655 = math.exp %654 : vector<1x128xf32>
    %cst_119 = arith.constant 1.000000e+00 : f32
    %656 = vector.broadcast %cst_119 : f32 to vector<1x128xf32>
    %657 = arith.addf %656, %655 : vector<1x128xf32>
    %658 = arith.divf %656, %657 : vector<1x128xf32>
    %659 = vector.extract_strided_slice %658 {offsets = [0, 0], sizes = [1, 32], strides = [1, 1]} : vector<1x128xf32> to vector<1x32xf32>
    %660 = vector.extract_strided_slice %658 {offsets = [0, 32], sizes = [1, 32], strides = [1, 1]} : vector<1x128xf32> to vector<1x32xf32>
    %661 = vector.extract_strided_slice %658 {offsets = [0, 96], sizes = [1, 32], strides = [1, 1]} : vector<1x128xf32> to vector<1x32xf32>
    %662 = vector.extract_strided_slice %653 {offsets = [0, 64], sizes = [1, 32], strides = [1, 1]} : vector<1x128xf32> to vector<1x32xf32>
    %663 = math.tanh %662 : vector<1x32xf32>
    %664 = arith.mulf %660, %623 : vector<1x32xf32>
    %665 = arith.mulf %659, %663 : vector<1x32xf32>
    %666 = arith.addf %664, %665 : vector<1x32xf32>
    %667 = math.tanh %666 : vector<1x32xf32>
    %668 = arith.mulf %661, %667 : vector<1x32xf32>
    %c7_i32_120 = arith.constant 7 : i32
    %669 = arith.subi %c7_i32_120, %c7_i32_116 : i32
    %670 = arith.index_cast %669 : i32 to index
    %c0_121 = arith.constant 0 : index
    %671 = vector.load %arg15[%670, %c0_121] : memref<8x32xf32, #tpu.memory_space<vmem>>, vector<1x32xf32>
    tpu.vector_store %arg15[%670, %c0_121], %668 {strides = array<i32>} : memref<8x32xf32, #tpu.memory_space<vmem>>, vector<1x32xf32>,
    %cst_122 = arith.constant dense<0.000000e+00> : vector<1x256xf32>
    %672 = tpu.matmul %668, %325, %cst_122 {dimension_numbers = #tpu.dot_dimension_numbers<[1], [0], [0], [1], [0, 0, 1, 1], [], []>} : vector<1x32xf32>, vector<32x256xf32>, vector<1x256xf32> -> vector<1x256xf32>
    %673 = vector.extract_strided_slice %650 {offsets = [0, 0], sizes = [1, 128], strides = [1, 1]} : vector<1x256xf32> to vector<1x128xf32>
    %674 = vector.extract_strided_slice %672 {offsets = [0, 0], sizes = [1, 128], strides = [1, 1]} : vector<1x256xf32> to vector<1x128xf32>
    %675 = vector.extract_strided_slice %672 {offsets = [0, 128], sizes = [1, 128], strides = [1, 1]} : vector<1x256xf32> to vector<1x128xf32>
    %676 = arith.addf %675, %327 : vector<1x128xf32>
    %c8_i32_123 = arith.constant 8 : i32
    %c0_124 = arith.constant 0 : index
    %c0_125 = arith.constant 0 : index
    %677 = vector.load %arg15[%c0_124, %c0_125] : memref<8x32xf32, #tpu.memory_space<vmem>>, vector<8x32xf32>
    %c0_126 = arith.constant 0 : index
    %c0_127 = arith.constant 0 : index
    %678 = vector.load %arg11[%c0_126, %c0_127] : memref<32x48xf32, #tpu.memory_space<vmem>>, vector<32x48xf32>
    %cst_128 = arith.constant dense<0.000000e+00> : vector<8x48xf32>
    %679 = tpu.matmul %677, %678, %cst_128 {dimension_numbers = #tpu.dot_dimension_numbers<[1], [0], [0], [1], [0, 0, 1, 1], [], []>} : vector<8x32xf32>, vector<32x48xf32>, vector<8x48xf32> -> vector<8x48xf32>
    %c0_129 = arith.constant 0 : index
    %c0_130 = arith.constant 0 : index
    %680 = vector.load %arg12[%c0_129, %c0_130] : memref<1x48xf32, #tpu.memory_space<vmem>>, vector<1x48xf32>
    %681 = vector.broadcast %680 : vector<1x48xf32> to vector<8x48xf32>
    %682 = arith.addf %679, %681 : vector<8x48xf32>
    %c0_131 = arith.constant 0 : index
    %c0_132 = arith.constant 0 : index
    %683 = vector.load %arg13[%c0_131, %c0_132] : memref<8x48xf32, #tpu.memory_space<vmem>>, vector<8x48xf32>
    tpu.vector_store %arg13[%c0_131, %c0_132], %682 {strides = array<i32>} : memref<8x48xf32, #tpu.memory_space<vmem>>, vector<8x48xf32>,
    return
  }
}

</mosaic_0001>

<bundles_post_ra>
// kernel: tpu_custom_call.1
= control target key start
LH: loop header
LB: loop body
LE: loop exit
PB: predicated region body
PF: predicated region fallthrough
CT: control target
= control target key end

     0   :  { %18 = vsyncpa [#allocation5], 0  ;;  %s5204_s0 = inlined_call_operand.hbm [shape: f32[8,32], index: 0, kind: input, shape index: {}]   ;;  %s5205_s1 = inlined_call_operand.hbm [shape: f32[32,128], index: 1, kind: input, shape index: {}]   ;;  %s5206_s2 = inlined_call_operand.vmem [shape: f32[1,128], index: 2, kind: input, shape index: {}]   ;;  %s5207_s3 = inlined_call_operand.hbm [shape: f32[32,256], index: 3, kind: input, shape index: {}]   ;;  %s5208_s4 = inlined_call_operand.hbm [shape: f32[32,128], index: 4, kind: input, shape index: {}]   ;;  %s5209_s5 = inlined_call_operand.vmem [shape: f32[1,128], index: 5, kind: input, shape index: {}]   ;;  %s5210_s6 = inlined_call_operand.hbm [shape: f32[32,256], index: 6, kind: input, shape index: {}]   ;;  %s5211_s7 = inlined_call_operand.hbm [shape: f32[32,256], index: 7, kind: input, shape index: {}]   ;;  %s5212_s8 = inlined_call_operand.vmem [shape: f32[1,128], index: 8, kind: input, shape index: {}]   ;;  %s5213_s9 = inlined_call_operand.vmem [shape: f32[1,128], index: 9, kind: input, shape index: {}]   ;;  %s5214_s10 = inlined_call_operand.vmem [shape: f32[1,128], index: 10, kind: input, shape index: {}]   ;;  %s5215_s11 = inlined_call_operand.vmem [shape: f32[32,48], index: 11, kind: input, shape index: {}]   ;;  %s5216_s12 = inlined_call_operand.vmem [shape: f32[1,48], index: 12, kind: input, shape index: {}]   ;;  %s5217_s13 = inlined_call_operand.hbm [shape: f32[8,48], index: 13, kind: output, shape index: {}]  }
   0x1   :  { %19 = vsyncpa [#allocation8], 0 }
   0x2   :  { %20 = vsyncpa [#allocation11], 0 }
   0x3   :  { %21 = vsyncpa [#allocation14], 0 }
   0x4   :  { %22 = vsyncpa [#allocation6], 0  ;;  %s4522_s25 = smov [#allocation7]   ;;  %s4358_s29 = scalar_lea.hbm %s5205_s1, 512 }
   0x5   :  { %s38_s26 = sshll.u32 %s4522_s25, 4  ;;  %p4359_p0 = scmp.ne.s32.totalorder %s5205_s1, %s4358_s29  ;;  %s39_s26 = int_to_ptr.vmem [resolvable:$true] %s38_s26 }
   0x6   :  { %p4362_p1 = scmp.lt.u32.totalorder %s4358_s29, %s5205_s1 }
   0x8   :  { %p4364_p2 = pnand %p4362_p1, %p4359_p0 }
   0xa   :  { %4367 = shalt.err (!%p4364_p2)
}
   0xb   :  { %s4368_s17 = scalar_lea.vmem %s39_s26, 512  ;;  %p4373_p4 = scmp.lt.s32.totalorder %s39_s26, %s39_s26 }
   0xc   :  { %p4369_p3 = scmp.ne.s32.totalorder %s39_s26, %s4368_s17  ;;  %p4374_p5 = scmp.lt.s32.totalorder %s4368_s17, %s4368_s17 }
   0xe   :  { %p4375_p6 = por %p4374_p5, %p4373_p4 }
  0x10   :  { %p4376_p7 = pnand %p4375_p6, %p4369_p3 }
  0x12   :  { %4379 = shalt.err (!%p4376_p7)
}
  0x13   :  { %s4523_s18 = smov 128   ;;  %s4524_s19 = smov 8  }
  0x14   :  { %44 = dma.hbm_to_vmem [thread:$0]  %s5205_s1, 512, %s39_s26, [#allocation8], %s4523_s18, %s4523_s18, %s4524_s19  }
  0x15   :  { %s4525_s22 = smov [#allocation10]   ;;  %s4526_s24 = smov [#allocation4]  }
  0x16   :  { %s64_s23 = sshll.u32 %s4525_s22, 4  ;;  %s29_s25 = sshll.u32 %s4526_s24, 4  ;;  %s65_s23 = int_to_ptr.vmem [resolvable:$true] %s64_s23  ;;  %s30_s25 = int_to_ptr.vmem [resolvable:$true] %s29_s25 }
  0x17   :  { %s4380_s29 = scalar_lea.hbm %s5208_s4, 512 }
  0x18   :  { %p4381_p8 = scmp.ne.s32.totalorder %s5208_s4, %s4380_s29  ;;  %p4384_p9 = scmp.lt.u32.totalorder %s4380_s29, %s5208_s4 }
  0x1a   :  { %p4386_p10 = pnand %p4384_p9, %p4381_p8 }
  0x1c   :  { %4389 = shalt.err (!%p4386_p10)
}
  0x1d   :  { %s4390_s1 = scalar_lea.vmem %s65_s23, 512  ;;  %p4395_p12 = scmp.lt.s32.totalorder %s65_s23, %s65_s23 }
  0x1e   :  { %p4391_p11 = scmp.ne.s32.totalorder %s65_s23, %s4390_s1  ;;  %p4396_p13 = scmp.lt.s32.totalorder %s4390_s1, %s4390_s1 }
  0x20   :  { %p4397_p0 = por %p4396_p13, %p4395_p12 }
  0x22   :  { %p4398_p1 = pnand %p4397_p0, %p4391_p11 }
  0x24   :  { %4401 = shalt.err (!%p4398_p1)
}
  0x25   :  { %70 = dma.hbm_to_vmem [thread:$0]  %s5208_s4, 512, %s65_s23, [#allocation11], %s4523_s18, %s4523_s18, %s4524_s19  }
  0x26   :  { %s4402_s22 = scalar_lea.hbm %s5204_s0, 128 }
  0x27   :  { %p4403_p2 = scmp.ne.s32.totalorder %s5204_s0, %s4402_s22  ;;  %p4406_p3 = scmp.lt.u32.totalorder %s4402_s22, %s5204_s0 }
  0x29   :  { %p4408_p4 = pnand %p4406_p3, %p4403_p2 }
  0x2b   :  { %4411 = shalt.err (!%p4408_p4)
}
  0x2c   :  { %s4412_s30 = scalar_lea.vmem %s30_s25, 128  ;;  %p4417_p6 = scmp.lt.s32.totalorder %s30_s25, %s30_s25 }
  0x2d   :  { %p4413_p5 = scmp.ne.s32.totalorder %s30_s25, %s4412_s30  ;;  %p4418_p7 = scmp.lt.s32.totalorder %s4412_s30, %s4412_s30 }
  0x2f   :  { %p4419_p8 = por %p4418_p7, %p4417_p6 }
  0x31   :  { %p4420_p9 = pnand %p4419_p8, %p4413_p5 }
  0x33   :  { %4423 = shalt.err (!%p4420_p9)
}
  0x34   :  { %32 = dma.hbm_to_vmem [thread:$0]  %s5204_s0, 128, %s30_s25, [#allocation5]  }
  0x35   :  { %s4527_s19 = smov [#allocation9]   ;;  %s4424_s16 = scalar_lea.hbm %s5207_s3, 1024 }
  0x36   :  { %s52_s23 = sshll.u32 %s4527_s19, 4  ;;  %p4425_p10 = scmp.ne.s32.totalorder %s5207_s3, %s4424_s16  ;;  %s53_s23 = int_to_ptr.vmem [resolvable:$true] %s52_s23 }
  0x37   :  { %p4428_p11 = scmp.lt.u32.totalorder %s4424_s16, %s5207_s3 }
  0x39   :  { %p4430_p12 = pnand %p4428_p11, %p4425_p10 }
  0x3b   :  { %4433 = shalt.err (!%p4430_p12)
}
  0x3c   :  { %s4434_s21 = scalar_lea.vmem %s53_s23, 1024  ;;  %p4439_p0 = scmp.lt.s32.totalorder %s53_s23, %s53_s23 }
  0x3d   :  { %p4435_p13 = scmp.ne.s32.totalorder %s53_s23, %s4434_s21  ;;  %p4440_p1 = scmp.lt.s32.totalorder %s4434_s21, %s4434_s21 }
  0x3f   :  { %p4441_p2 = por %p4440_p1, %p4439_p0 }
  0x41   :  { %p4442_p3 = pnand %p4441_p2, %p4435_p13 }
  0x43   :  { %4445 = shalt.err (!%p4442_p3)
}
  0x44   :  { %s4528_s0 = smov 256   ;;  %s4529_s25 = smov 16  }
  0x45   :  { %58 = dma.hbm_to_vmem [thread:$0]  %s5207_s3, 1024, %s53_s23, [#allocation8], %s4528_s0, %s4528_s0, %s4529_s25  }
  0x46   :  { %s4530_s27 = smov [#allocation12]   ;;  %s4531_s29 = smov [#allocation13]  }
  0x47   :  { %s78_s28 = sshll.u32 %s4530_s27, 4  ;;  %s90_s30 = sshll.u32 %s4531_s29, 4  ;;  %s79_s28 = int_to_ptr.vmem [resolvable:$true] %s78_s28  ;;  %s4659_s30 = int_to_ptr.vmem [resolvable:$true] %s90_s30 }
  0x48   :  { %s4446_s19 = scalar_lea.hbm %s5210_s6, 1024 }
  0x49   :  { %p4447_p4 = scmp.ne.s32.totalorder %s5210_s6, %s4446_s19  ;;  %p4450_p5 = scmp.lt.u32.totalorder %s4446_s19, %s5210_s6 }
  0x4b   :  { %p4452_p6 = pnand %p4450_p5, %p4447_p4 }
  0x4d   :  { %4455 = shalt.err (!%p4452_p6)
}
  0x4e   :  { %s4456_s3 = scalar_lea.vmem %s79_s28, 1024  ;;  %p4461_p8 = scmp.lt.s32.totalorder %s79_s28, %s79_s28 }
  0x4f   :  { %p4457_p7 = scmp.ne.s32.totalorder %s79_s28, %s4456_s3  ;;  %p4462_p9 = scmp.lt.s32.totalorder %s4456_s3, %s4456_s3 }
  0x51   :  { %p4463_p10 = por %p4462_p9, %p4461_p8 }
  0x53   :  { %p4464_p11 = pnand %p4463_p10, %p4457_p7 }
  0x55   :  { %4467 = shalt.err (!%p4464_p11)
}
  0x56   :  { %84 = dma.hbm_to_vmem [thread:$0]  %s5210_s6, 1024, %s79_s28, [#allocation11], %s4528_s0, %s4528_s0, %s4529_s25  }
  0x57   :  { %s4468_s21 = scalar_lea.hbm %s5211_s7, 1024 }
  0x58   :  { %p4469_p12 = scmp.ne.s32.totalorder %s5211_s7, %s4468_s21  ;;  %p4472_p13 = scmp.lt.u32.totalorder %s4468_s21, %s5211_s7 }
  0x5a   :  { %p4474_p0 = pnand %p4472_p13, %p4469_p12 }
  0x5c   :  { %4477 = shalt.err (!%p4474_p0)
}
  0x5d   :  { %s4478_s4 = scalar_lea.vmem %s4659_s30, 1024  ;;  %p4483_p2 = scmp.lt.s32.totalorder %s4659_s30, %s4659_s30 }
  0x5e   :  { %p4479_p1 = scmp.ne.s32.totalorder %s4659_s30, %s4478_s4  ;;  %p4484_p3 = scmp.lt.s32.totalorder %s4478_s4, %s4478_s4 }
  0x60   :  { %p4485_p4 = por %p4484_p3, %p4483_p2 }
  0x62   :  { %p4486_p5 = pnand %p4485_p4, %p4479_p1 }
  0x64   :  { %4489 = shalt.err (!%p4486_p5)
}
  0x65   :  { %96 = dma.hbm_to_vmem [thread:$0]  %s5211_s7, 1024, %s4659_s30, [#allocation14], %s4528_s0, %s4528_s0, %s4529_s25  }
  0x66   :  { %4512 = dma.done.wait [#allocation5], 128  }
  0x67   :  { %4513 = vsyncadd [#allocation5], 4294967168 }
  0x68   :  { %4514 = dma.done.wait [#allocation8], 1536  }
  0x69   :  { %4515 = vsyncadd [#allocation8], 4294965760 }
  0x6a   :  { %4516 = dma.done.wait [#allocation11], 1536  }
  0x6b   :  { %4517 = vsyncadd [#allocation11], 4294965760 }
  0x6c   :  { %4518 = dma.done.wait [#allocation14], 1024  }
  0x6d   :  { %4519 = vsyncadd [#allocation14], 4294966272  ;;  %v4532_v0 = vmov 0.0|0.0   ;;  %vm4533_vm0 = vmmov 0   ;;  %v4534_v1 = vmov 0.0   ;;  %v126_v2 = vld [vmem:[#allocation7] sm:$0xff] }
  0x6e   :  { %3832 = vmatprep.subr.bf16.mxu0 %v4532_v0  ;;  %3741 = vmatprep.mubr.msk.f32.mxu0 %vm4533_vm0, %v4534_v1  ;;  %v127_v3 = vld [vmem:[#allocation7 + $0x8] sm:$0xff]  ;;  %v128_v4 = vld [vmem:[#allocation7 + $0x10] sm:$0xff]  ;;  %v129_v6 = vld [vmem:[#allocation7 + $0x18] sm:$0xff]  ;;  %vm137_vm1 = vcmask 261120   ;;  %s4535_s25 = smov 64   ;;  %s4536_s30 = smov 32  }
  0x6f   :  { %320 = vmatprep.mubr.f32.mxu1 %v4534_v1  ;;  %v3833_v5 = vpack.c.bf16 %v127_v3, %v126_v2  ;;  %v3836_v7 = vpack.c.bf16 %v129_v6, %v128_v4  ;;  %v125_v8 = vld [vmem:[#allocation4] sm:$0xff]  ;;  %v3620_v9 = vld [vmem:[%s5206_s2] ss:$0 sm:$0xff]  ;;  %v212_v26 = vld [vmem:[#allocation9] sm:$0xff]  ;;  %vm2072_vm2 = vcmask 253952   ;;  %vm3600_vm3 = vcmask 392192  }
  0x70   :  { %v213_v24 = vld [vmem:[#allocation9 + $0x8] sm:$0xff]  ;;  %v215_v25 = vld [vmem:[#allocation9 + $0x18] sm:$0xff]  ;;  %v214_v28 = vld [vmem:[#allocation9 + $0x10] sm:$0xff] }
  0x71   :  { %3834 = vmatpush3.bf16.msra.mxu0 %v3833_v5  ;;  %v4710_v27 = vpack.c.bf16 %v215_v25, %v213_v24  ;;  %v217_v29 = vld [vmem:[#allocation9 + $0x28] sm:$0xff]  ;;  %v219_v30 = vld [vmem:[#allocation9 + $0x38] sm:$0xff]  ;;  %v4712_v31 = vpack.c.bf16 %v214_v28, %v212_v26  ;;  %v216_v33 = vld [vmem:[#allocation9 + $0x20] sm:$0xff] }
  0x72   :  { %3835 = vmatprep.subr.bf16.mxu0 %v4532_v0  ;;  %v4714_v32 = vpack.c.bf16 %v219_v30, %v217_v29  ;;  %v218_v34 = vld [vmem:[#allocation9 + $0x30] sm:$0xff]  ;;  %v4734_v40 = vld [vmem:[%s5209_s5] sm:$0x1]  ;;  %v220_v4 = vld [vmem:[#allocation10] sm:$0xff] }
  0x73   :  { %3839 = vmatprep.subr.bf16.mxu1 %v4710_v27  ;;  %v4718_v35 = vpack.c.bf16 %v218_v34, %v216_v33  ;;  %v221_v5 = vld [vmem:[#allocation10 + $0x8] sm:$0xff]  ;;  %v222_v6 = vld [vmem:[#allocation10 + $0x10] sm:$0xff] }
  0x74   :  { %3841 = vmatpush1.bf16.msra.mxu1 %v4712_v31 }
  0x75   :  { %3837 = vmatpush3.bf16.msra.mxu0 %v3836_v7  ;;  %3843 = vmatprep.subr.bf16.mxu1 %v4714_v32  ;;  %v4747_v7 = vpack.c.bf16 %v221_v5, %v220_v4 }
  0x76   :  { %3846 = vmatprep.subr.bf16.mxu0 %v4532_v0 }
  0x78   :  { %3742 = vmatmul.mubr.msk.f32.vlgmr.msra.gmra.mrb[0].mxu0 %vm137_vm1, %v125_v8  ;;  %3845 = vmatpush1.bf16.msra.mxu1 %v4718_v35  ;;  %v223_v8 = vld [vmem:[#allocation10 + $0x18] sm:$0xff] }
  0x79   :  { %3752 = vmatprep.mubr.msk.f32.mxu0 %vm4533_vm0, %v4534_v1  ;;  %3853 = vmatprep.subr.bf16.mxu1 %v4710_v27 }
  0x7a   :  { %3848 = vmatpush3.bf16.msra.mxu0 %v4747_v7 }
  0x7b   :  { %3849 = vmatprep.subr.bf16.mxu0 %v4532_v0 }
 0x14b   :  { %v207_v10 = vpop.f32.mrb[0].mxu0 }
 0x14c   :  { %v208_v11 = vadd.f32 %v3620_v9, %v207_v10  ;;  %v3743_v12 = vpop.f32.mrb[1].mxu0  ;;  %v4750_v9 = vpack.c.bf16 %v223_v8, %v222_v6 }
 0x14e   :  { %211 = vst [vmem:[#allocation2] sm:$0xff] %v208_v11  ;;  %3851 = vmatpush3.bf16.msra.mxu0 %v4750_v9 }
 0x14f   :  { %3860 = vmatprep.subr.bf16.mxu0 %v4532_v0 }
 0x155   :  { %v225_v13 = vld [vmem:[#allocation2] sm:$0x1]  ;;  %v428_v42 = vld [vmem:[#allocation2 + $0x1] sm:$0x1] }
 0x156   :  { %4102 = vtanh.f32 %v225_v13  ;;  %v3622_v15 = vmul.f32 -1.442695, %v225_v13 }
 0x158   :  { %4104 = vpow2.f32 %v3622_v15 }
 0x160   :  { %v4103_v14 = vpop.eup %4102 }
 0x161   :  { %236 = vrot.lane.b32.xlu0 %v4103_v14, %s4535_s25 }
 0x162   :  { %v4105_v16 = vpop.eup %4104 }
 0x163   :  { %v230_v17 = vadd.f32 1.0, %v4105_v16 }
 0x165   :  { %4106 = vrcp.f32 %v230_v17 }
 0x16f   :  { %v4107_v18 = vpop.eup %4106 }
 0x170   :  { %v234_v21 = vmul.f32 0.0, %v4107_v18 }
 0x1d3   :  { %v237_v19 = vpop.permute.xlu0 %236 }
 0x1d4   :  { %v239_v20 = vmul.f32 %v4107_v18, %v237_v19  ;;  %v631_v19 = vld [vmem:[#allocation2 + $0x2] sm:$0x1] }
 0x1d6   :  { %241 = vrot.lane.b32.xlu0 %v239_v20, %s4536_s30 }
 0x248   :  { %v242_v22 = vpop.permute.xlu0 %241 }
 0x249   :  { %v244_v23 = vadd.f32 %v242_v22, %v234_v21 }
 0x24b   :  { %4108 = vtanh.f32 %v244_v23 }
 0x255   :  { %v4109_v36 = vpop.eup %4108 }
 0x256   :  { %247 = vrot.lane.b32.xlu1 %v4109_v36, %s4535_s25 }
 0x2c8   :  { %v248_v37 = vpop.permute.xlu1 %247 }
 0x2c9   :  { %v250_v38 = vmul.f32 %v4107_v18, %v248_v37 }
 0x2cb   :  { %252 = vrot.lane.b32.xlu1 %v250_v38, %s4536_s30 }
 0x33d   :  { %v253_v39 = vpop.permute.xlu1 %252 }
 0x33e   :  { %3623 = vmatmul.mubr.msk.f32.vlgmr.msra.gmra.mrb[0].mxu1 %vm137_vm1, %v253_v39 }
 0x33f   :  { %3855 = vmatpush1.bf16.msra.mxu1 %v4712_v31  ;;  %523 = vmatprep.mubr.f32.mxu1 %v4534_v1 }
 0x340   :  { %3857 = vmatprep.subr.bf16.mxu1 %v4714_v32 }
 0x343   :  { %3859 = vmatpush1.bf16.msra.mxu1 %v4718_v35 }
 0x344   :  { %3867 = vmatprep.subr.bf16.mxu1 %v4710_v27 }
 0x411   :  { %v322_v41 = vpop.f32.mrb[0].mxu1 }
 0x412   :  { %v429_v43 = vadd.f32 %v428_v42, %v322_v41  ;;  %v324_v44 = vpop.f32.mrb[1].mxu1 }
 0x413   :  { %v328_v45 = vadd.f32 %v324_v44, %v4734_v40 }
 0x414   :  { %4110 = vtanh.f32 %v429_v43  ;;  %v3626_v48 = vmul.f32 -1.442695, %v429_v43 }
 0x415   :  { %4112 = vtanh.f32 %v328_v45  ;;  %v3624_v49 = vmul.f32 -1.442695, %v328_v45 }
 0x416   :  { %4114 = vpow2.f32 %v3626_v48 }
 0x417   :  { %4116 = vpow2.f32 %v3624_v49 }
 0x41e   :  { %v4111_v46 = vpop.eup %4110 }
 0x41f   :  { %v4113_v47 = vpop.eup %4112  ;;  %439 = vrot.lane.b32.xlu0 %v4111_v46, %s4535_s25 }
 0x420   :  { %338 = vrot.lane.b32.xlu1 %v4113_v47, %s4535_s25  ;;  %v4115_v50 = vpop.eup %4114 }
 0x421   :  { %v4117_v51 = vpop.eup %4116  ;;  %v433_v52 = vadd.f32 1.0, %v4115_v50 }
 0x422   :  { %v332_v53 = vadd.f32 1.0, %v4117_v51 }
 0x423   :  { %4118 = vrcp.f32 %v433_v52 }
 0x424   :  { %4120 = vrcp.f32 %v332_v53 }
 0x42d   :  { %v4119_v54 = vpop.eup %4118 }
 0x42e   :  { %v4121_v56 = vpop.eup %4120  ;;  %v437_v60 = vmul.f32 %v4119_v54, %v244_v23 }
 0x42f   :  { %v336_v62 = vmul.f32 0.0, %v4121_v56 }
 0x491   :  { %v440_v55 = vpop.permute.xlu0 %439 }
 0x492   :  { %v442_v57 = vmul.f32 %v4119_v54, %v440_v55  ;;  %v339_v58 = vpop.permute.xlu1 %338 }
 0x493   :  { %v341_v59 = vmul.f32 %v4121_v56, %v339_v58 }
 0x494   :  { %444 = vrot.lane.b32.xlu0 %v442_v57, %s4536_s30 }
 0x495   :  { %343 = vrot.lane.b32.xlu1 %v341_v59, %s4536_s30 }
 0x506   :  { %v445_v61 = vpop.permute.xlu0 %444 }
 0x507   :  { %v4741_v63 = vadd.f32 %v445_v61, %v437_v60  ;;  %v344_v2 = vpop.permute.xlu1 %343  ;;  %v834_v60 = vld [vmem:[#allocation2 + $0x3] sm:$0x1] }
 0x508   :  { %v4743_v3 = vadd.f32 %v344_v2, %v336_v62 }
 0x509   :  { %4122 = vtanh.f32 %v4741_v63 }
 0x50a   :  { %4124 = vtanh.f32 %v4743_v3 }
 0x513   :  { %v4123_v10 = vpop.eup %4122 }
 0x514   :  { %v4125_v11 = vpop.eup %4124  ;;  %450 = vrot.lane.b32.xlu0 %v4123_v10, %s4535_s25 }
 0x515   :  { %349 = vrot.lane.b32.xlu1 %v4125_v11, %s4535_s25 }
 0x586   :  { %v451_v12 = vpop.permute.xlu0 %450 }
 0x587   :  { %v453_v13 = vmul.f32 %v4119_v54, %v451_v12  ;;  %v350_v14 = vpop.permute.xlu1 %349 }
 0x588   :  { %v352_v15 = vmul.f32 %v4121_v56, %v350_v14 }
 0x589   :  { %455 = vrot.lane.b32.xlu0 %v453_v13, %s4536_s30 }
 0x58a   :  { %354 = vrot.lane.b32.xlu1 %v352_v15, %s4536_s30 }
 0x5fb   :  { %v456_v16 = vpop.permute.xlu0 %455 }
 0x5fc   :  { %3627 = vmatmul.mubr.msk.f32.vlgmr.msra.gmra.mrb[2].mxu1 %vm137_vm1, %v456_v16  ;;  %v355_v17 = vpop.permute.xlu1 %354 }
 0x5fd   :  { %3753 = vmatmul.mubr.msk.f32.vlgmr.msra.gmra.mrb[2].mxu0 %vm137_vm1, %v355_v17  ;;  %3869 = vmatpush1.bf16.msra.mxu1 %v4712_v31 }
 0x5fe   :  { %3862 = vmatpush3.bf16.msra.mxu0 %v4747_v7  ;;  %3871 = vmatprep.subr.bf16.mxu1 %v4714_v32 }
 0x5ff   :  { %726 = vmatprep.mubr.f32.mxu1 %v4534_v1  ;;  %3863 = vmatprep.subr.bf16.mxu0 %v4532_v0 }
 0x600   :  { %3763 = vmatprep.mubr.msk.f32.mxu0 %vm4533_vm0, %v4534_v1 }
 0x601   :  { %3873 = vmatpush1.bf16.msra.mxu1 %v4718_v35 }
 0x602   :  { %3865 = vmatpush3.bf16.msra.mxu0 %v4750_v9  ;;  %3881 = vmatprep.subr.bf16.mxu1 %v4710_v27 }
 0x603   :  { %3874 = vmatprep.subr.bf16.mxu0 %v4532_v0 }
 0x6cf   :  { %v525_v18 = vpop.f32.mrb[2].mxu1 }
 0x6d0   :  { %v632_v20 = vadd.f32 %v631_v19, %v525_v18  ;;  %v424_v21 = vpop.f32.mrb[2].mxu0  ;;  %v527_v22 = vpop.f32.mrb[3].mxu1 }
 0x6d1   :  { %v530_v23 = vadd.f32 %v527_v22, %v424_v21  ;;  %v3754_v24 = vpop.f32.mrb[3].mxu0 }
 0x6d2   :  { %4126 = vtanh.f32 %v632_v20  ;;  %v3630_v29 = vmul.f32 -1.442695, %v632_v20 }
 0x6d3   :  { %v531_v25 = vadd.f32 %v530_v23, %v4734_v40 }
 0x6d5   :  { %4128 = vtanh.f32 %v531_v25  ;;  %v3628_v30 = vmul.f32 -1.442695, %v531_v25 }
 0x6d6   :  { %4130 = vpow2.f32 %v3630_v29 }
 0x6d7   :  { %4132 = vpow2.f32 %v3628_v30 }
 0x6dc   :  { %v4127_v26 = vpop.eup %4126 }
 0x6dd   :  { %642 = vrot.lane.b32.xlu0 %v4127_v26, %s4535_s25 }
 0x6df   :  { %v4129_v28 = vpop.eup %4128 }
 0x6e0   :  { %541 = vrot.lane.b32.xlu1 %v4129_v28, %s4535_s25  ;;  %v4131_v33 = vpop.eup %4130 }
 0x6e1   :  { %v4133_v34 = vpop.eup %4132  ;;  %v636_v36 = vadd.f32 1.0, %v4131_v33 }
 0x6e2   :  { %v535_v37 = vadd.f32 1.0, %v4133_v34 }
 0x6e3   :  { %4134 = vrcp.f32 %v636_v36 }
 0x6e4   :  { %4136 = vrcp.f32 %v535_v37 }
 0x6ed   :  { %v4135_v38 = vpop.eup %4134 }
 0x6ee   :  { %v4137_v42 = vpop.eup %4136  ;;  %v640_v45 = vmul.f32 %v4135_v38, %v4741_v63 }
 0x6ef   :  { %v539_v48 = vmul.f32 %v4137_v42, %v4743_v3 }
 0x74f   :  { %v643_v39 = vpop.permute.xlu0 %642 }
 0x750   :  { %v645_v41 = vmul.f32 %v4135_v38, %v643_v39 }
 0x752   :  { %647 = vrot.lane.b32.xlu0 %v645_v41, %s4536_s30  ;;  %v542_v43 = vpop.permute.xlu1 %541  ;;  %v1037_v41 = vld [vmem:[#allocation2 + $0x4] sm:$0x1] }
 0x753   :  { %v544_v44 = vmul.f32 %v4137_v42, %v542_v43 }
 0x755   :  { %546 = vrot.lane.b32.xlu1 %v544_v44, %s4536_s30 }
 0x7c4   :  { %v648_v46 = vpop.permute.xlu0 %647 }
 0x7c5   :  { %v650_v47 = vadd.f32 %v648_v46, %v640_v45 }
 0x7c7   :  { %4138 = vtanh.f32 %v650_v47  ;;  %v547_v49 = vpop.permute.xlu1 %546 }
 0x7c8   :  { %v549_v50 = vadd.f32 %v547_v49, %v539_v48 }
 0x7ca   :  { %4140 = vtanh.f32 %v549_v50 }
 0x7d1   :  { %v4139_v51 = vpop.eup %4138 }
 0x7d2   :  { %653 = vrot.lane.b32.xlu0 %v4139_v51, %s4535_s25 }
 0x7d4   :  { %v4141_v52 = vpop.eup %4140 }
 0x7d5   :  { %552 = vrot.lane.b32.xlu1 %v4141_v52, %s4535_s25 }
 0x844   :  { %v654_v53 = vpop.permute.xlu0 %653 }
 0x845   :  { %v656_v54 = vmul.f32 %v4135_v38, %v654_v53 }
 0x847   :  { %658 = vrot.lane.b32.xlu0 %v656_v54, %s4536_s30  ;;  %v553_v55 = vpop.permute.xlu1 %552 }
 0x848   :  { %v555_v56 = vmul.f32 %v4137_v42, %v553_v55 }
 0x84a   :  { %557 = vrot.lane.b32.xlu1 %v555_v56, %s4536_s30 }
 0x8b9   :  { %v659_v57 = vpop.permute.xlu0 %658 }
 0x8ba   :  { %3631 = vmatmul.mubr.msk.f32.vlgmr.msra.gmra.mrb[4].mxu1 %vm137_vm1, %v659_v57 }
 0x8bb   :  { %3883 = vmatpush1.bf16.msra.mxu1 %v4712_v31  ;;  %929 = vmatprep.mubr.f32.mxu1 %v4534_v1 }
 0x8bc   :  { %v558_v58 = vpop.permute.xlu1 %557  ;;  %3885 = vmatprep.subr.bf16.mxu1 %v4714_v32 }
 0x8bd   :  { %3764 = vmatmul.mubr.msk.f32.vlgmr.msra.gmra.mrb[4].mxu0 %vm137_vm1, %v558_v58 }
 0x8be   :  { %3876 = vmatpush3.bf16.msra.mxu0 %v4747_v7  ;;  %3774 = vmatprep.mubr.msk.f32.mxu0 %vm4533_vm0, %v4534_v1 }
 0x8bf   :  { %3887 = vmatpush1.bf16.msra.mxu1 %v4718_v35  ;;  %3877 = vmatprep.subr.bf16.mxu0 %v4532_v0 }
 0x8c0   :  { %3895 = vmatprep.subr.bf16.mxu1 %v4710_v27 }
 0x8c2   :  { %3879 = vmatpush3.bf16.msra.mxu0 %v4750_v9 }
 0x8c3   :  { %3888 = vmatprep.subr.bf16.mxu0 %v4532_v0 }
 0x98d   :  { %v728_v59 = vpop.f32.mrb[4].mxu1 }
 0x98e   :  { %v835_v61 = vadd.f32 %v834_v60, %v728_v59  ;;  %v730_v62 = vpop.f32.mrb[5].mxu1 }
 0x990   :  { %4142 = vtanh.f32 %v835_v61  ;;  %v627_v63 = vpop.f32.mrb[4].mxu0  ;;  %v3634_v8 = vmul.f32 -1.442695, %v835_v61 }
 0x991   :  { %v733_v2 = vadd.f32 %v730_v62, %v627_v63  ;;  %v3765_v3 = vpop.f32.mrb[5].mxu0 }
 0x993   :  { %v734_v4 = vadd.f32 %v733_v2, %v4734_v40 }
 0x995   :  { %4144 = vtanh.f32 %v734_v4  ;;  %v3632_v10 = vmul.f32 -1.442695, %v734_v4 }
 0x996   :  { %4146 = vpow2.f32 %v3634_v8 }
 0x997   :  { %4148 = vpow2.f32 %v3632_v10 }
 0x99a   :  { %v4143_v5 = vpop.eup %4142 }
 0x99b   :  { %845 = vrot.lane.b32.xlu0 %v4143_v5, %s4535_s25 }
 0x99f   :  { %v4145_v6 = vpop.eup %4144 }
 0x9a0   :  { %744 = vrot.lane.b32.xlu1 %v4145_v6, %s4535_s25  ;;  %v4147_v11 = vpop.eup %4146 }
 0x9a1   :  { %v839_v12 = vadd.f32 1.0, %v4147_v11  ;;  %v4149_v13 = vpop.eup %4148 }
 0x9a2   :  { %v738_v14 = vadd.f32 1.0, %v4149_v13 }
 0x9a3   :  { %4150 = vrcp.f32 %v839_v12 }
 0x9a4   :  { %4152 = vrcp.f32 %v738_v14 }
 0x9ad   :  { %v4151_v15 = vpop.eup %4150 }
 0x9ae   :  { %v4153_v18 = vpop.eup %4152  ;;  %v843_v21 = vmul.f32 %v4151_v15, %v650_v47 }
 0x9af   :  { %v742_v24 = vmul.f32 %v4153_v18, %v549_v50 }
 0xa0d   :  { %v846_v16 = vpop.permute.xlu0 %845 }
 0xa0e   :  { %v848_v17 = vmul.f32 %v4151_v15, %v846_v16 }
 0xa10   :  { %850 = vrot.lane.b32.xlu0 %v848_v17, %s4536_s30  ;;  %v1240_v17 = vld [vmem:[#allocation2 + $0x5] sm:$0x1] }
 0xa12   :  { %v745_v19 = vpop.permute.xlu1 %744 }
 0xa13   :  { %v747_v20 = vmul.f32 %v4153_v18, %v745_v19 }
 0xa15   :  { %749 = vrot.lane.b32.xlu1 %v747_v20, %s4536_s30 }
 0xa82   :  { %v851_v22 = vpop.permute.xlu0 %850 }
 0xa83   :  { %v853_v23 = vadd.f32 %v851_v22, %v843_v21 }
 0xa85   :  { %4154 = vtanh.f32 %v853_v23 }
 0xa87   :  { %v750_v25 = vpop.permute.xlu1 %749 }
 0xa88   :  { %v752_v26 = vadd.f32 %v750_v25, %v742_v24 }
 0xa8a   :  { %4156 = vtanh.f32 %v752_v26 }
 0xa8f   :  { %v4155_v28 = vpop.eup %4154 }
 0xa90   :  { %856 = vrot.lane.b32.xlu0 %v4155_v28, %s4535_s25 }
 0xa94   :  { %v4157_v29 = vpop.eup %4156 }
 0xa95   :  { %755 = vrot.lane.b32.xlu1 %v4157_v29, %s4535_s25 }
 0xb02   :  { %v857_v30 = vpop.permute.xlu0 %856 }
 0xb03   :  { %v859_v33 = vmul.f32 %v4151_v15, %v857_v30 }
 0xb05   :  { %861 = vrot.lane.b32.xlu0 %v859_v33, %s4536_s30 }
 0xb07   :  { %v756_v34 = vpop.permute.xlu1 %755 }
 0xb08   :  { %v758_v36 = vmul.f32 %v4153_v18, %v756_v34 }
 0xb0a   :  { %760 = vrot.lane.b32.xlu1 %v758_v36, %s4536_s30 }
 0xb77   :  { %v862_v37 = vpop.permute.xlu0 %861 }
 0xb78   :  { %3635 = vmatmul.mubr.msk.f32.vlgmr.msra.gmra.mrb[6].mxu1 %vm137_vm1, %v862_v37 }
 0xb79   :  { %3897 = vmatpush1.bf16.msra.mxu1 %v4712_v31  ;;  %1132 = vmatprep.mubr.f32.mxu1 %v4534_v1 }
 0xb7a   :  { %3899 = vmatprep.subr.bf16.mxu1 %v4714_v32 }
 0xb7c   :  { %v761_v38 = vpop.permute.xlu1 %760 }
 0xb7d   :  { %3775 = vmatmul.mubr.msk.f32.vlgmr.msra.gmra.mrb[6].mxu0 %vm137_vm1, %v761_v38  ;;  %3901 = vmatpush1.bf16.msra.mxu1 %v4718_v35 }
 0xb7e   :  { %3890 = vmatpush3.bf16.msra.mxu0 %v4747_v7  ;;  %3785 = vmatprep.mubr.msk.f32.mxu0 %vm4533_vm0, %v4534_v1 }
 0xb7f   :  { %3891 = vmatprep.subr.bf16.mxu0 %v4532_v0  ;;  %3909 = vmatprep.subr.bf16.mxu1 %v4710_v27 }
 0xb82   :  { %3893 = vmatpush3.bf16.msra.mxu0 %v4750_v9 }
 0xb83   :  { %3902 = vmatprep.subr.bf16.mxu0 %v4532_v0 }
 0xc4b   :  { %v931_v39 = vpop.f32.mrb[6].mxu1 }
 0xc4c   :  { %v1038_v42 = vadd.f32 %v1037_v41, %v931_v39  ;;  %v933_v43 = vpop.f32.mrb[7].mxu1 }
 0xc4e   :  { %4158 = vtanh.f32 %v1038_v42  ;;  %v3638_v50 = vmul.f32 -1.442695, %v1038_v42 }
 0xc50   :  { %v830_v44 = vpop.f32.mrb[6].mxu0 }
 0xc51   :  { %v936_v45 = vadd.f32 %v933_v43, %v830_v44  ;;  %v3776_v46 = vpop.f32.mrb[7].mxu0 }
 0xc53   :  { %v937_v47 = vadd.f32 %v936_v45, %v4734_v40 }
 0xc55   :  { %4160 = vtanh.f32 %v937_v47  ;;  %v3636_v51 = vmul.f32 -1.442695, %v937_v47 }
 0xc56   :  { %4162 = vpow2.f32 %v3638_v50 }
 0xc57   :  { %4164 = vpow2.f32 %v3636_v51 }
 0xc58   :  { %v4159_v48 = vpop.eup %4158 }
 0xc59   :  { %1048 = vrot.lane.b32.xlu0 %v4159_v48, %s4535_s25 }
 0xc5f   :  { %v4161_v49 = vpop.eup %4160 }
 0xc60   :  { %947 = vrot.lane.b32.xlu1 %v4161_v49, %s4535_s25  ;;  %v4163_v52 = vpop.eup %4162 }
 0xc61   :  { %v1042_v53 = vadd.f32 1.0, %v4163_v52  ;;  %v4165_v54 = vpop.eup %4164 }
 0xc62   :  { %v941_v55 = vadd.f32 1.0, %v4165_v54 }
 0xc63   :  { %4166 = vrcp.f32 %v1042_v53 }
 0xc64   :  { %4168 = vrcp.f32 %v941_v55 }
 0xc6d   :  { %v4167_v56 = vpop.eup %4166 }
 0xc6e   :  { %v4169_v59 = vpop.eup %4168  ;;  %v1046_v62 = vmul.f32 %v4167_v56, %v853_v23 }
 0xc6f   :  { %v945_v3 = vmul.f32 %v4169_v59, %v752_v26 }
 0xccb   :  { %v1049_v57 = vpop.permute.xlu0 %1048 }
 0xccc   :  { %v1051_v58 = vmul.f32 %v4167_v56, %v1049_v57 }
 0xcce   :  { %1053 = vrot.lane.b32.xlu0 %v1051_v58, %s4536_s30  ;;  %v1443_v58 = vld [vmem:[#allocation2 + $0x6] sm:$0x1] }
 0xcd2   :  { %v948_v60 = vpop.permute.xlu1 %947 }
 0xcd3   :  { %v950_v61 = vmul.f32 %v4169_v59, %v948_v60 }
 0xcd5   :  { %952 = vrot.lane.b32.xlu1 %v950_v61, %s4536_s30 }
 0xd40   :  { %v1054_v63 = vpop.permute.xlu0 %1053 }
 0xd41   :  { %v1056_v2 = vadd.f32 %v1054_v63, %v1046_v62 }
 0xd43   :  { %4170 = vtanh.f32 %v1056_v2 }
 0xd47   :  { %v953_v4 = vpop.permute.xlu1 %952 }
 0xd48   :  { %v955_v5 = vadd.f32 %v953_v4, %v945_v3 }
 0xd4a   :  { %4172 = vtanh.f32 %v955_v5 }
 0xd4d   :  { %v4171_v6 = vpop.eup %4170 }
 0xd4e   :  { %1059 = vrot.lane.b32.xlu0 %v4171_v6, %s4535_s25 }
 0xd54   :  { %v4173_v8 = vpop.eup %4172 }
 0xd55   :  { %958 = vrot.lane.b32.xlu1 %v4173_v8, %s4535_s25 }
 0xdc0   :  { %v1060_v10 = vpop.permute.xlu0 %1059 }
 0xdc1   :  { %v1062_v11 = vmul.f32 %v4167_v56, %v1060_v10 }
 0xdc3   :  { %1064 = vrot.lane.b32.xlu0 %v1062_v11, %s4536_s30 }
 0xdc7   :  { %v959_v12 = vpop.permute.xlu1 %958 }
 0xdc8   :  { %v961_v13 = vmul.f32 %v4169_v59, %v959_v12 }
 0xdca   :  { %963 = vrot.lane.b32.xlu1 %v961_v13, %s4536_s30 }
 0xe35   :  { %v1065_v14 = vpop.permute.xlu0 %1064 }
 0xe36   :  { %3639 = vmatmul.mubr.msk.f32.vlgmr.msra.gmra.mrb[8].mxu1 %vm137_vm1, %v1065_v14 }
 0xe37   :  { %3911 = vmatpush1.bf16.msra.mxu1 %v4712_v31  ;;  %1335 = vmatprep.mubr.f32.mxu1 %v4534_v1 }
 0xe38   :  { %3913 = vmatprep.subr.bf16.mxu1 %v4714_v32 }
 0xe3b   :  { %3915 = vmatpush1.bf16.msra.mxu1 %v4718_v35 }
 0xe3c   :  { %v964_v15 = vpop.permute.xlu1 %963  ;;  %3923 = vmatprep.subr.bf16.mxu1 %v4710_v27 }
 0xe3d   :  { %3786 = vmatmul.mubr.msk.f32.vlgmr.msra.gmra.mrb[8].mxu0 %vm137_vm1, %v964_v15 }
 0xe3e   :  { %3904 = vmatpush3.bf16.msra.mxu0 %v4747_v7  ;;  %3796 = vmatprep.mubr.msk.f32.mxu0 %vm4533_vm0, %v4534_v1 }
 0xe3f   :  { %3905 = vmatprep.subr.bf16.mxu0 %v4532_v0 }
 0xe42   :  { %3907 = vmatpush3.bf16.msra.mxu0 %v4750_v9 }
 0xe43   :  { %3916 = vmatprep.subr.bf16.mxu0 %v4532_v0 }
 0xf09   :  { %v1134_v16 = vpop.f32.mrb[8].mxu1 }
 0xf0a   :  { %v1241_v18 = vadd.f32 %v1240_v17, %v1134_v16  ;;  %v1136_v19 = vpop.f32.mrb[9].mxu1 }
 0xf0c   :  { %4174 = vtanh.f32 %v1241_v18  ;;  %v3642_v26 = vmul.f32 -1.442695, %v1241_v18 }
 0xf10   :  { %v1033_v20 = vpop.f32.mrb[8].mxu0 }
 0xf11   :  { %v1139_v21 = vadd.f32 %v1136_v19, %v1033_v20  ;;  %v3787_v22 = vpop.f32.mrb[9].mxu0 }
 0xf13   :  { %v1140_v23 = vadd.f32 %v1139_v21, %v4734_v40 }
 0xf15   :  { %4176 = vtanh.f32 %v1140_v23  ;;  %v3640_v28 = vmul.f32 -1.442695, %v1140_v23 }
 0xf16   :  { %v4175_v24 = vpop.eup %4174  ;;  %4178 = vpow2.f32 %v3642_v26 }
 0xf17   :  { %1251 = vrot.lane.b32.xlu0 %v4175_v24, %s4535_s25  ;;  %4180 = vpow2.f32 %v3640_v28 }
 0xf1f   :  { %v4177_v25 = vpop.eup %4176 }
 0xf20   :  { %1150 = vrot.lane.b32.xlu1 %v4177_v25, %s4535_s25  ;;  %v4179_v29 = vpop.eup %4178 }
 0xf21   :  { %v1245_v30 = vadd.f32 1.0, %v4179_v29  ;;  %v4181_v33 = vpop.eup %4180 }
 0xf22   :  { %v1144_v34 = vadd.f32 1.0, %v4181_v33 }
 0xf23   :  { %4182 = vrcp.f32 %v1245_v30 }
 0xf24   :  { %4184 = vrcp.f32 %v1144_v34 }
 0xf2d   :  { %v4183_v36 = vpop.eup %4182 }
 0xf2e   :  { %v4185_v39 = vpop.eup %4184  ;;  %v1249_v43 = vmul.f32 %v4183_v36, %v1056_v2 }
 0xf2f   :  { %v1148_v46 = vmul.f32 %v4185_v39, %v955_v5 }
 0xf89   :  { %v1252_v37 = vpop.permute.xlu0 %1251 }
 0xf8a   :  { %v1254_v38 = vmul.f32 %v4183_v36, %v1252_v37 }
 0xf8c   :  { %1256 = vrot.lane.b32.xlu0 %v1254_v38, %s4536_s30 }
 0xf92   :  { %v1151_v41 = vpop.permute.xlu1 %1150 }
 0xf93   :  { %v1153_v42 = vmul.f32 %v4185_v39, %v1151_v41 }
 0xf95   :  { %1155 = vrot.lane.b32.xlu1 %v1153_v42, %s4536_s30 }
 0xffe   :  { %v1257_v44 = vpop.permute.xlu0 %1256 }
 0xfff   :  { %v1259_v45 = vadd.f32 %v1257_v44, %v1249_v43 }
0x1001   :  { %4186 = vtanh.f32 %v1259_v45 }
0x1007   :  { %v1156_v47 = vpop.permute.xlu1 %1155 }
0x1008   :  { %v1158_v48 = vadd.f32 %v1156_v47, %v1148_v46 }
0x100a   :  { %4188 = vtanh.f32 %v1158_v48 }
0x100b   :  { %v4187_v49 = vpop.eup %4186 }
0x100c   :  { %1262 = vrot.lane.b32.xlu0 %v4187_v49, %s4535_s25 }
0x1014   :  { %v4189_v50 = vpop.eup %4188 }
0x1015   :  { %1161 = vrot.lane.b32.xlu1 %v4189_v50, %s4535_s25 }
0x107e   :  { %v1263_v51 = vpop.permute.xlu0 %1262 }
0x107f   :  { %v1265_v52 = vmul.f32 %v4183_v36, %v1263_v51 }
0x1081   :  { %1267 = vrot.lane.b32.xlu0 %v1265_v52, %s4536_s30 }
0x1087   :  { %v1162_v53 = vpop.permute.xlu1 %1161 }
0x1088   :  { %v1164_v54 = vmul.f32 %v4185_v39, %v1162_v53 }
0x108a   :  { %1166 = vrot.lane.b32.xlu1 %v1164_v54, %s4536_s30 }
0x10f3   :  { %v1268_v55 = vpop.permute.xlu0 %1267 }
0x10f4   :  { %3643 = vmatmul.mubr.msk.f32.vlgmr.msra.gmra.mrb[10].mxu1 %vm137_vm1, %v1268_v55 }
0x10f5   :  { %3925 = vmatpush1.bf16.msra.mxu1 %v4712_v31  ;;  %1538 = vmatprep.mubr.f32.mxu1 %v4534_v1 }
0x10f6   :  { %3927 = vmatprep.subr.bf16.mxu1 %v4714_v32 }
0x10f9   :  { %3929 = vmatpush1.bf16.msra.mxu1 %v4718_v35 }
0x10fa   :  { %3937 = vmatprep.subr.bf16.mxu1 %v4710_v27 }
0x10fc   :  { %v1167_v56 = vpop.permute.xlu1 %1166 }
0x10fd   :  { %3797 = vmatmul.mubr.msk.f32.vlgmr.msra.gmra.mrb[10].mxu0 %vm137_vm1, %v1167_v56 }
0x10fe   :  { %3918 = vmatpush3.bf16.msra.mxu0 %v4747_v7  ;;  %3807 = vmatprep.mubr.msk.f32.mxu0 %vm4533_vm0, %v4534_v1 }
0x10ff   :  { %3919 = vmatprep.subr.bf16.mxu0 %v4532_v0 }
0x1102   :  { %3921 = vmatpush3.bf16.msra.mxu0 %v4750_v9 }
0x1103   :  { %3930 = vmatprep.subr.bf16.mxu0 %v4532_v0 }
0x11c7   :  { %v1337_v57 = vpop.f32.mrb[10].mxu1 }
0x11c8   :  { %v1444_v59 = vadd.f32 %v1443_v58, %v1337_v57  ;;  %v1339_v60 = vpop.f32.mrb[11].mxu1 }
0x11ca   :  { %4190 = vtanh.f32 %v1444_v59  ;;  %v3646_v4 = vmul.f32 -1.442695, %v1444_v59 }
0x11d0   :  { %v1236_v27 = vpop.f32.mrb[10].mxu0 }
0x11d1   :  { %v1342_v61 = vadd.f32 %v1339_v60, %v1236_v27  ;;  %v3798_v62 = vpop.f32.mrb[11].mxu0 }
0x11d2   :  { %v1776_v62 = vld [vmem:[#allocation12 + $0x18] sm:$0xff] }
0x11d3   :  { %v1343_v63 = vadd.f32 %v1342_v61, %v4734_v40  ;;  %v1774_v61 = vld [vmem:[#allocation12 + $0x8] sm:$0xff] }
0x11d4   :  { %v4191_v2 = vpop.eup %4190 }
0x11d5   :  { %4192 = vtanh.f32 %v1343_v63  ;;  %1454 = vrot.lane.b32.xlu0 %v4191_v2, %s4535_s25  ;;  %v3644_v5 = vmul.f32 -1.442695, %v1343_v63  ;;  %v4895_v63 = vpack.c.bf16 %v1776_v62, %v1774_v61  ;;  %v1963_v61 = vlaneseq }
0x11d6   :  { %4194 = vpow2.f32 %v3646_v4 }
0x11d7   :  { %4196 = vpow2.f32 %v3644_v5 }
0x11df   :  { %v4193_v3 = vpop.eup %4192 }
0x11e0   :  { %1353 = vrot.lane.b32.xlu1 %v4193_v3, %s4535_s25  ;;  %v4195_v6 = vpop.eup %4194 }
0x11e1   :  { %v1448_v8 = vadd.f32 1.0, %v4195_v6  ;;  %v4197_v10 = vpop.eup %4196 }
0x11e2   :  { %v1347_v11 = vadd.f32 1.0, %v4197_v10  ;;  %v1775_v10 = vld [vmem:[#allocation12 + $0x10] sm:$0xff] }
0x11e3   :  { %4198 = vrcp.f32 %v1448_v8  ;;  %v1773_v8 = vld [vmem:[#allocation12] sm:$0xff] }
0x11e4   :  { %4200 = vrcp.f32 %v1347_v11  ;;  %v1778_v11 = vld [vmem:[#allocation12 + $0x28] sm:$0xff] }
0x11ed   :  { %v4199_v12 = vpop.eup %4198 }
0x11ee   :  { %v4201_v15 = vpop.eup %4200  ;;  %v1452_v18 = vmul.f32 %v4199_v12, %v1259_v45 }
0x11ef   :  { %v1351_v21 = vmul.f32 %v4201_v15, %v1158_v48 }
0x1247   :  { %v1455_v13 = vpop.permute.xlu0 %1454 }
0x1248   :  { %v1457_v14 = vmul.f32 %v4199_v12, %v1455_v13  ;;  %v4902_v13 = vpack.c.bf16 %v1775_v10, %v1773_v8 }
0x124a   :  { %1459 = vrot.lane.b32.xlu0 %v1457_v14, %s4536_s30 }
0x1252   :  { %v1354_v16 = vpop.permute.xlu1 %1353 }
0x1253   :  { %v1356_v17 = vmul.f32 %v4201_v15, %v1354_v16  ;;  %v1779_v16 = vld [vmem:[#allocation12 + $0x30] sm:$0xff] }
0x1255   :  { %1358 = vrot.lane.b32.xlu1 %v1356_v17, %s4536_s30 }
0x12bc   :  { %v1460_v19 = vpop.permute.xlu0 %1459 }
0x12bd   :  { %v1462_v20 = vadd.f32 %v1460_v19, %v1452_v18 }
0x12bf   :  { %4202 = vtanh.f32 %v1462_v20 }
0x12c7   :  { %v1359_v22 = vpop.permute.xlu1 %1358 }
0x12c8   :  { %v1361_v23 = vadd.f32 %v1359_v22, %v1351_v21 }
0x12c9   :  { %v4203_v24 = vpop.eup %4202 }
0x12ca   :  { %4204 = vtanh.f32 %v1361_v23  ;;  %1465 = vrot.lane.b32.xlu0 %v4203_v24, %s4535_s25 }
0x12d4   :  { %v4205_v25 = vpop.eup %4204 }
0x12d5   :  { %1364 = vrot.lane.b32.xlu1 %v4205_v25, %s4535_s25  ;;  %v1936_v25 = vld [vmem:[%s5212_s8] sm:$0x1] }
0x133c   :  { %v1466_v26 = vpop.permute.xlu0 %1465 }
0x133d   :  { %v1468_v28 = vmul.f32 %v4199_v12, %v1466_v26  ;;  %v1780_v12 = vld [vmem:[#allocation12 + $0x38] sm:$0xff] }
0x133e   :  { %v4904_v14 = vpack.c.bf16 %v1780_v12, %v1778_v11 }
0x133f   :  { %1470 = vrot.lane.b32.xlu0 %v1468_v28, %s4536_s30 }
0x1347   :  { %v1365_v29 = vpop.permute.xlu1 %1364 }
0x1348   :  { %v1367_v30 = vmul.f32 %v4201_v15, %v1365_v29  ;;  %v1777_v15 = vld [vmem:[#allocation12 + $0x20] sm:$0xff] }
0x1349   :  { %v4908_v18 = vpack.c.bf16 %v1779_v16, %v1777_v15 }
0x134a   :  { %1369 = vrot.lane.b32.xlu1 %v1367_v30, %s4536_s30 }
0x13b1   :  { %v1471_v33 = vpop.permute.xlu0 %1470 }
0x13b2   :  { %3647 = vmatmul.mubr.msk.f32.vlgmr.msra.gmra.mrb[12].mxu1 %vm137_vm1, %v1471_v33 }
0x13b3   :  { %3939 = vmatpush1.bf16.msra.mxu1 %v4712_v31  ;;  %1741 = vmatprep.mubr.f32.mxu1 %v4534_v1  ;;  %v1646_v31 = vld [vmem:[#allocation2 + $0x7] sm:$0x1] }
0x13b4   :  { %3941 = vmatprep.subr.bf16.mxu1 %v4714_v32 }
0x13b7   :  { %3943 = vmatpush1.bf16.msra.mxu1 %v4718_v35 }
0x13bc   :  { %v1370_v34 = vpop.permute.xlu1 %1369 }
0x13bd   :  { %3808 = vmatmul.mubr.msk.f32.vlgmr.msra.gmra.mrb[12].mxu0 %vm137_vm1, %v1370_v34 }
0x13be   :  { %3932 = vmatpush3.bf16.msra.mxu0 %v4747_v7  ;;  %3818 = vmatprep.mubr.msk.f32.mxu0 %vm4533_vm0, %v4534_v1 }
0x13bf   :  { %3933 = vmatprep.subr.bf16.mxu0 %v4532_v0 }
0x13c2   :  { %3935 = vmatpush3.bf16.msra.mxu0 %v4750_v9 }
0x13c3   :  { %3945 = vmatprep.subr.bf16.mxu0 %v4895_v63 }
0x1485   :  { %v1540_v36 = vpop.f32.mrb[12].mxu1 }
0x1486   :  { %v1647_v37 = vadd.f32 %v1646_v31, %v1540_v36  ;;  %v1542_v38 = vpop.f32.mrb[13].mxu1 }
0x1488   :  { %4206 = vtanh.f32 %v1647_v37  ;;  %v3650_v43 = vmul.f32 -1.442695, %v1647_v37 }
0x1490   :  { %v1439_v32 = vpop.f32.mrb[12].mxu0 }
0x1491   :  { %v1545_v39 = vadd.f32 %v1542_v38, %v1439_v32  ;;  %v3809_v35 = vpop.f32.mrb[13].mxu0 }
0x1492   :  { %v4207_v41 = vpop.eup %4206 }
0x1493   :  { %v1546_v42 = vadd.f32 %v1545_v39, %v4734_v40  ;;  %1657 = vrot.lane.b32.xlu1 %v4207_v41, %s4535_s25 }
0x1495   :  { %4208 = vtanh.f32 %v1546_v42  ;;  %v3648_v9 = vmul.f32 -1.442695, %v1546_v42 }
0x1496   :  { %4210 = vpow2.f32 %v3650_v43 }
0x1497   :  { %4212 = vpow2.f32 %v3648_v9 }
0x149f   :  { %v4209_v7 = vpop.eup %4208 }
0x14a0   :  { %1556 = vrot.lane.b32.xlu0 %v4209_v7, %s4535_s25  ;;  %v4211_v44 = vpop.eup %4210 }
0x14a1   :  { %v1651_v45 = vadd.f32 1.0, %v4211_v44  ;;  %v4213_v46 = vpop.eup %4212 }
0x14a2   :  { %v1550_v47 = vadd.f32 1.0, %v4213_v46 }
0x14a3   :  { %4214 = vrcp.f32 %v1651_v45 }
0x14a4   :  { %4216 = vrcp.f32 %v1550_v47 }
0x14ad   :  { %v4215_v48 = vpop.eup %4214 }
0x14ae   :  { %v4217_v51 = vpop.eup %4216  ;;  %v1655_v54 = vmul.f32 %v4215_v48, %v1462_v20 }
0x14af   :  { %v1554_v57 = vmul.f32 %v4217_v51, %v1361_v23 }
0x1505   :  { %v1658_v49 = vpop.permute.xlu1 %1657 }
0x1506   :  { %v1660_v50 = vmul.f32 %v4215_v48, %v1658_v49  ;;  %v1784_v49 = vld [vmem:[#allocation13 + $0x18] sm:$0xff] }
0x1508   :  { %1662 = vrot.lane.b32.xlu1 %v1660_v50, %s4536_s30  ;;  %v1781_v50 = vld [vmem:[#allocation13] sm:$0xff] }
0x1512   :  { %v1557_v52 = vpop.permute.xlu0 %1556 }
0x1513   :  { %v1559_v53 = vmul.f32 %v4217_v51, %v1557_v52  ;;  %v1783_v52 = vld [vmem:[#allocation13 + $0x10] sm:$0xff] }
0x1515   :  { %1561 = vrot.lane.b32.xlu0 %v1559_v53, %s4536_s30  ;;  %v1786_v53 = vld [vmem:[#allocation13 + $0x28] sm:$0xff] }
0x157a   :  { %v1663_v55 = vpop.permute.xlu1 %1662 }
0x157b   :  { %v4887_v56 = vadd.f32 %v1663_v55, %v1655_v54  ;;  %v1788_v54 = vld [vmem:[#allocation13 + $0x38] sm:$0xff] }
0x157d   :  { %4218 = vtanh.f32 %v4887_v56 }
0x1587   :  { %v4219_v58 = vpop.eup %4218  ;;  %v1562_v59 = vpop.permute.xlu0 %1561 }
0x1588   :  { %v4890_v60 = vadd.f32 %v1562_v59, %v1554_v57  ;;  %1668 = vrot.lane.b32.xlu1 %v4219_v58, %s4535_s25  ;;  %v4938_v57 = vpack.c.bf16 %v1783_v52, %v1781_v50  ;;  %v4940_v58 = vpack.c.bf16 %v1788_v54, %v1786_v53  ;;  %v1785_v59 = vld [vmem:[#allocation13 + $0x20] sm:$0xff] }
0x158a   :  { %4220 = vtanh.f32 %v4890_v60 }
0x1594   :  { %v4221_v27 = vpop.eup %4220 }
0x1595   :  { %1567 = vrot.lane.b32.xlu0 %v4221_v27, %s4535_s25 }
0x15fa   :  { %v1669_v2 = vpop.permute.xlu1 %1668 }
0x15fb   :  { %v1671_v3 = vmul.f32 %v4215_v48, %v1669_v2  ;;  %v1782_v48 = vld [vmem:[#allocation13 + $0x8] sm:$0xff] }
0x15fd   :  { %1673 = vrot.lane.b32.xlu1 %v1671_v3, %s4536_s30  ;;  %v1964_v3 = vshrl.u32 %v1963_v61, 7 }
0x1607   :  { %v1568_v4 = vpop.permute.xlu0 %1567 }
0x1608   :  { %v1570_v5 = vmul.f32 %v4217_v51, %v1568_v4  ;;  %v4936_v51 = vpack.c.bf16 %v1784_v49, %v1782_v48  ;;  %v1965_v4 = vsub.s32 0, %v1964_v3 }
0x160a   :  { %1572 = vrot.lane.b32.xlu0 %v1570_v5, %s4536_s30  ;;  %3953 = vmatprep.subr.bf16.mxu1 %v4936_v51 }
0x166f   :  { %v1674_v6 = vpop.permute.xlu1 %1673 }
0x1670   :  { %3651 = vmatmul.mubr.msk.f32.vlgmr.msra.gmra.mrb[14].mxu1 %vm137_vm1, %v1674_v6 }
0x1671   :  { %1930 = vmatprep.mubr.f32.mxu1 %v4534_v1  ;;  %3955 = vmatpush1.bf16.msra.mxu1 %v4938_v57 }
0x1672   :  { %3957 = vmatprep.subr.bf16.mxu1 %v4940_v58 }
0x167c   :  { %v1573_v17 = vpop.permute.xlu0 %1572 }
0x167d   :  { %3819 = vmatmul.mubr.msk.f32.vlgmr.msra.gmra.mrb[14].mxu0 %vm137_vm1, %v1573_v17  ;;  %v4968_v17 = vld [vmem:[%s5213_s9] sm:$0x1] }
0x167e   :  { %3947 = vmatpush1.bf16.msra.mxu0 %v4902_v13  ;;  %1855 = vmatprep.mubr.f32.mxu0 %v4534_v1 }
0x167f   :  { %3949 = vmatprep.subr.bf16.mxu0 %v4904_v14 }
0x1682   :  { %3951 = vmatpush1.bf16.msra.mxu0 %v4908_v18 }
0x1683   :  { %3961 = vmatprep.subr.bf16.mxu0 %v4895_v63 }
0x1685   :  { %3653 = vmatmul.mubr.msk.f32.vlgmr.msra.gmra.mrb[16].mxu0 %vm137_vm1, %v1674_v6 }
0x1686   :  { %3963 = vmatpush1.bf16.msra.mxu0 %v4902_v13  ;;  %2035 = vmatprep.mubr.f32.mxu0 %v4534_v1 }
0x1687   :  { %3965 = vmatprep.subr.bf16.mxu0 %v4904_v14 }
0x168a   :  { %3967 = vmatpush1.bf16.msra.mxu0 %v4908_v18 }
0x168b   :  { %3977 = vmatprep.subr.bf16.mxu0 %v4895_v63 }
0x1743   :  { %v1743_v19 = vpop.f32.mrb[14].mxu1 }
0x1744   :  { %v1744_v20 = vpop.f32.mrb[15].mxu1 }
0x1750   :  { %v1642_v21 = vpop.f32.mrb[14].mxu0 }
0x1751   :  { %v1747_v22 = vadd.f32 %v1744_v20, %v1642_v21  ;;  %v3820_v23 = vpop.f32.mrb[15].mxu0 }
0x1753   :  { %v1748_v24 = vadd.f32 %v1747_v22, %v4734_v40 }
0x1755   :  { %4222 = vtanh.f32 %v1748_v24  ;;  %v3652_v34 = vmul.f32 -1.442695, %v1748_v24 }
0x1758   :  { %v1857_v26 = vpop.f32.mrb[16].mxu0 }
0x1759   :  { %v1937_v28 = vadd.f32 %v1936_v25, %v1857_v26  ;;  %v1859_v29 = vpop.f32.mrb[17].mxu0 }
0x175b   :  { %4224 = vtanh.f32 %v1937_v28  ;;  %v3655_v36 = vmul.f32 -1.442695, %v1937_v28 }
0x175c   :  { %4226 = vpow2.f32 %v3652_v34 }
0x175d   :  { %4228 = vpow2.f32 %v3655_v36 }
0x175f   :  { %v4223_v30 = vpop.eup %4222 }
0x1760   :  { %1758 = vrot.lane.b32.xlu1 %v4223_v30, %s4535_s25 }
0x1765   :  { %v4225_v33 = vpop.eup %4224 }
0x1766   :  { %1947 = vrot.lane.b32.xlu0 %v4225_v33, %s4535_s25  ;;  %v4227_v40 = vpop.eup %4226 }
0x1767   :  { %v1752_v31 = vadd.f32 1.0, %v4227_v40  ;;  %v4229_v37 = vpop.eup %4228 }
0x1768   :  { %v1941_v38 = vadd.f32 1.0, %v4229_v37 }
0x1769   :  { %4230 = vrcp.f32 %v1752_v31 }
0x176a   :  { %4232 = vrcp.f32 %v1941_v38  ;;  %v4989_v38 = vld [vmem:[%s5214_s10] sm:$0x1] }
0x1773   :  { %v4231_v32 = vpop.eup %4230 }
0x1774   :  { %v4233_v41 = vpop.eup %4232  ;;  %v1756_v43 = vmul.f32 %v4231_v32, %v4890_v60 }
0x1775   :  { %v1945_v45 = vmul.f32 %v4233_v41, %v4887_v56  ;;  %v1787_v56 = vld [vmem:[#allocation13 + $0x30] sm:$0xff] }
0x1776   :  { %v4945_v60 = vpack.c.bf16 %v1787_v56, %v1785_v59 }
0x1778   :  { %3959 = vmatpush1.bf16.msra.mxu1 %v4945_v60 }
0x1779   :  { %3969 = vmatprep.subr.bf16.mxu1 %v4936_v51 }
0x17d2   :  { %v1759_v39 = vpop.permute.xlu1 %1758 }
0x17d3   :  { %v1761_v35 = vmul.f32 %v4231_v32, %v1759_v39 }
0x17d5   :  { %1763 = vrot.lane.b32.xlu1 %v1761_v35, %s4536_s30 }
0x17d8   :  { %v1948_v42 = vpop.permute.xlu0 %1947 }
0x17d9   :  { %v1950_v7 = vmul.f32 %v4233_v41, %v1948_v42 }
0x17db   :  { %1952 = vrot.lane.b32.xlu0 %v1950_v7, %s4536_s30 }
0x1847   :  { %v1764_v9 = vpop.permute.xlu1 %1763 }
0x1848   :  { %v4929_v44 = vadd.f32 %v1764_v9, %v1756_v43 }
0x184a   :  { %4234 = vtanh.f32 %v4929_v44 }
0x184d   :  { %v1953_v46 = vpop.permute.xlu0 %1952 }
0x184e   :  { %v4933_v47 = vadd.f32 %v1953_v46, %v1945_v45 }
0x1850   :  { %4236 = vtanh.f32 %v4933_v47 }
0x1854   :  { %v4235_v55 = vpop.eup %4234 }
0x1855   :  { %1769 = vrot.lane.b32.xlu1 %v4235_v55, %s4535_s25 }
0x185a   :  { %v4237_v27 = vpop.eup %4236 }
0x185b   :  { %1958 = vrot.lane.b32.xlu0 %v4237_v27, %s4535_s25 }
0x18c7   :  { %v1770_v62 = vpop.permute.xlu1 %1769 }
0x18c8   :  { %v1772_v2 = vmul.f32 %v4231_v32, %v1770_v62 }
0x18ca   :  { %1862 = vrot.lane.b32.xlu1 %v1772_v2, %s4536_s30 }
0x18cd   :  { %v1959_v5 = vpop.permute.xlu0 %1958 }
0x18ce   :  { %v1961_v6 = vmul.f32 %v4233_v41, %v1959_v5 }
0x18d0   :  { %v1966_v8 = vrot.slane %v1961_v6, %v1965_v4 }
0x18d2   :  { %1967 = vrot.lane.b32.xlu0 %v1966_v8, %s4536_s30 }
0x193c   :  { %v1863_v10 = vpop.permute.xlu1 %1862 }
0x193d   :  { %3654 = vmatmul.mubr.msk.f32.vlgmr.msra.gmra.mrb[16].mxu1 %vm137_vm1, %v1863_v10 }
0x193e   :  { %3971 = vmatpush1.bf16.msra.mxu1 %v4938_v57  ;;  %2140 = vmatprep.mubr.f32.mxu1 %v4534_v1 }
0x193f   :  { %3973 = vmatprep.subr.bf16.mxu1 %v4940_v58 }
0x1942   :  { %3975 = vmatpush1.bf16.msra.mxu1 %v4945_v60 }
0x1943   :  { %3985 = vmatprep.subr.bf16.mxu1 %v4936_v51 }
0x1944   :  { %v1968_v11 = vpop.permute.xlu0 %1967 }
0x1945   :  { %3656 = vmatmul.mubr.msk.f32.vlgmr.msra.gmra.mrb[18].mxu0 %vm137_vm1, %v1968_v11 }
0x1946   :  { %3979 = vmatpush1.bf16.msra.mxu0 %v4902_v13  ;;  %2242 = vmatprep.mubr.f32.mxu0 %v4534_v1 }
0x1947   :  { %3981 = vmatprep.subr.bf16.mxu0 %v4904_v14 }
0x194a   :  { %3983 = vmatpush1.bf16.msra.mxu0 %v4908_v18 }
0x194b   :  { %3993 = vmatprep.subr.bf16.mxu0 %v4895_v63 }
0x1a10   :  { %v1932_v12 = vpop.f32.mrb[16].mxu1 }
0x1a11   :  { %v1934_v15 = vpop.f32.mrb[17].mxu1 }
0x1a18   :  { %v2037_v16 = vpop.f32.mrb[18].mxu0 }
0x1a19   :  { %v2039_v19 = vpop.f32.mrb[19].mxu0 }
0x1a1a   :  { %v2042_v20 = vadd.f32 %v2039_v19, %v1932_v12 }
0x1a1c   :  { %v2043_v21 = vadd.f32 %v2042_v20, %v4968_v17 }
0x1a1e   :  { %4238 = vtanh.f32 %v2043_v21  ;;  %v3657_v23 = vmul.f32 -1.442695, %v2043_v21 }
0x1a20   :  { %4240 = vpow2.f32 %v3657_v23 }
0x1a28   :  { %v4239_v22 = vpop.eup %4238 }
0x1a29   :  { %2053 = vrot.lane.b32.xlu0 %v4239_v22, %s4535_s25 }
0x1a2a   :  { %v4241_v24 = vpop.eup %4240 }
0x1a2b   :  { %v2047_v25 = vadd.f32 1.0, %v4241_v24 }
0x1a2d   :  { %4242 = vrcp.f32 %v2047_v25 }
0x1a37   :  { %v4243_v26 = vpop.eup %4242 }
0x1a38   :  { %v2051_v30 = vmul.f32 %v4243_v26, %v4929_v44 }
0x1a9b   :  { %v2054_v28 = vpop.permute.xlu0 %2053 }
0x1a9c   :  { %v2056_v29 = vmul.f32 %v4243_v26, %v2054_v28 }
0x1a9e   :  { %2058 = vrot.lane.b32.xlu1 %v2056_v29, %s4536_s30 }
0x1b10   :  { %v2059_v33 = vpop.permute.xlu1 %2058 }
0x1b11   :  { %v4974_v34 = vadd.f32 %v2059_v33, %v2051_v30 }
0x1b13   :  { %4244 = vtanh.f32 %v4974_v34 }
0x1b1d   :  { %v4245_v36 = vpop.eup %4244 }
0x1b1e   :  { %2064 = vrot.lane.b32.xlu0 %v4245_v36, %s4535_s25 }
0x1b90   :  { %v2065_v40 = vpop.permute.xlu0 %2064 }
0x1b91   :  { %v2067_v31 = vmul.f32 %v4243_v26, %v2065_v40 }
0x1b93   :  { %2069 = vrot.lane.b32.xlu1 %v2067_v31, %s4536_s30 }
0x1c05   :  { %v2070_v37 = vpop.permute.xlu1 %2069 }
0x1c06   :  { %2073 = vst.msk [vmem:[#allocation3 + $0x7] sm:$0x1] %vm2072_vm2, %v2070_v37  ;;  %3658 = vmatmul.mubr.msk.f32.vlgmr.msra.gmra.mrb[18].mxu1 %vm137_vm1, %v2070_v37 }
0x1c07   :  { %3987 = vmatpush1.bf16.msra.mxu1 %v4938_v57  ;;  %2346 = vmatprep.mubr.f32.mxu1 %v4534_v1 }
0x1c08   :  { %3989 = vmatprep.subr.bf16.mxu1 %v4940_v58 }
0x1c0b   :  { %3991 = vmatpush1.bf16.msra.mxu1 %v4945_v60 }
0x1c0c   :  { %4001 = vmatprep.subr.bf16.mxu1 %v4936_v51 }
0x1cd9   :  { %v2142_v32 = vpop.f32.mrb[18].mxu1 }
0x1cda   :  { %v2144_v39 = vpop.f32.mrb[19].mxu1 }
0x1cdb   :  { %v2147_v35 = vadd.f32 %v2144_v39, %v4989_v38 }
0x1cdd   :  { %v2148_v41 = vadd.f32 %v2147_v35, %v2037_v16 }
0x1cdf   :  { %4246 = vtanh.f32 %v2148_v41  ;;  %v3659_v7 = vmul.f32 -1.442695, %v2148_v41 }
0x1ce1   :  { %4248 = vpow2.f32 %v3659_v7 }
0x1ce9   :  { %v4247_v42 = vpop.eup %4246 }
0x1cea   :  { %2158 = vrot.lane.b32.xlu0 %v4247_v42, %s4535_s25 }
0x1ceb   :  { %v4249_v43 = vpop.eup %4248 }
0x1cec   :  { %v2152_v9 = vadd.f32 1.0, %v4249_v43 }
0x1cee   :  { %4250 = vrcp.f32 %v2152_v9 }
0x1cf8   :  { %v4251_v44 = vpop.eup %4250 }
0x1cf9   :  { %v2156_v48 = vmul.f32 %v4251_v44, %v4933_v47 }
0x1d5c   :  { %v2159_v45 = vpop.permute.xlu0 %2158 }
0x1d5d   :  { %v2161_v46 = vmul.f32 %v4251_v44, %v2159_v45 }
0x1d5f   :  { %2163 = vrot.lane.b32.xlu1 %v2161_v46, %s4536_s30 }
0x1dd1   :  { %v2164_v49 = vpop.permute.xlu1 %2163 }
0x1dd2   :  { %v4995_v50 = vadd.f32 %v2164_v49, %v2156_v48 }
0x1dd4   :  { %4252 = vtanh.f32 %v4995_v50 }
0x1dde   :  { %v4253_v52 = vpop.eup %4252 }
0x1ddf   :  { %2169 = vrot.lane.b32.xlu0 %v4253_v52, %s4535_s25 }
0x1e51   :  { %v2170_v53 = vpop.permute.xlu0 %2169 }
0x1e52   :  { %v2172_v54 = vmul.f32 %v4251_v44, %v2170_v53 }
0x1e54   :  { %2174 = vrot.lane.b32.xlu1 %v2172_v54, %s4536_s30 }
0x1ec6   :  { %v2175_v55 = vpop.permute.xlu1 %2174 }
0x1ec7   :  { %3660 = vmatmul.mubr.msk.f32.vlgmr.msra.gmra.mrb[20].mxu0 %vm137_vm1, %v2175_v55 }
0x1ec8   :  { %3995 = vmatpush1.bf16.msra.mxu0 %v4902_v13  ;;  %2448 = vmatprep.mubr.f32.mxu0 %v4534_v1 }
0x1ec9   :  { %3997 = vmatprep.subr.bf16.mxu0 %v4904_v14 }
0x1ecc   :  { %3999 = vmatpush1.bf16.msra.mxu0 %v4908_v18 }
0x1ecd   :  { %4009 = vmatprep.subr.bf16.mxu0 %v4895_v63 }
0x1f9a   :  { %v2244_v47 = vpop.f32.mrb[20].mxu0 }
0x1f9b   :  { %v2246_v59 = vpop.f32.mrb[21].mxu0 }
0x1f9c   :  { %v2249_v56 = vadd.f32 %v2246_v59, %v2142_v32 }
0x1f9e   :  { %v2250_v27 = vadd.f32 %v2249_v56, %v4968_v17 }
0x1fa0   :  { %4254 = vtanh.f32 %v2250_v27  ;;  %v3661_v62 = vmul.f32 -1.442695, %v2250_v27 }
0x1fa2   :  { %4256 = vpow2.f32 %v3661_v62 }
0x1faa   :  { %v4255_v61 = vpop.eup %4254 }
0x1fab   :  { %2260 = vrot.lane.b32.xlu0 %v4255_v61, %s4535_s25 }
0x1fac   :  { %v4257_v2 = vpop.eup %4256 }
0x1fad   :  { %v2254_v3 = vadd.f32 1.0, %v4257_v2 }
0x1faf   :  { %4258 = vrcp.f32 %v2254_v3 }
0x1fb9   :  { %v4259_v4 = vpop.eup %4258 }
0x1fba   :  { %v2258_v8 = vmul.f32 %v4259_v4, %v4974_v34 }
0x201d   :  { %v2261_v5 = vpop.permute.xlu0 %2260 }
0x201e   :  { %v2263_v6 = vmul.f32 %v4259_v4, %v2261_v5 }
0x2020   :  { %2265 = vrot.lane.b32.xlu1 %v2263_v6, %s4536_s30 }
0x2092   :  { %v2266_v10 = vpop.permute.xlu1 %2265 }
0x2093   :  { %v5010_v11 = vadd.f32 %v2266_v10, %v2258_v8 }
0x2095   :  { %4260 = vtanh.f32 %v5010_v11 }
0x209f   :  { %v4261_v12 = vpop.eup %4260 }
0x20a0   :  { %2271 = vrot.lane.b32.xlu0 %v4261_v12, %s4535_s25 }
0x2112   :  { %v2272_v15 = vpop.permute.xlu0 %2271 }
0x2113   :  { %v2274_v16 = vmul.f32 %v4259_v4, %v2272_v15 }
0x2115   :  { %2276 = vrot.lane.b32.xlu1 %v2274_v16, %s4536_s30 }
0x2187   :  { %v2277_v19 = vpop.permute.xlu1 %2276 }
0x2188   :  { %2279 = vst.msk [vmem:[#allocation3 + $0x6] sm:$0x1] %vm2072_vm2, %v2277_v19  ;;  %3662 = vmatmul.mubr.msk.f32.vlgmr.msra.gmra.mrb[20].mxu1 %vm137_vm1, %v2277_v19 }
0x2189   :  { %4003 = vmatpush1.bf16.msra.mxu1 %v4938_v57  ;;  %2552 = vmatprep.mubr.f32.mxu1 %v4534_v1 }
0x218a   :  { %4005 = vmatprep.subr.bf16.mxu1 %v4940_v58 }
0x218d   :  { %4007 = vmatpush1.bf16.msra.mxu1 %v4945_v60 }
0x218e   :  { %4017 = vmatprep.subr.bf16.mxu1 %v4936_v51 }
0x225b   :  { %v2348_v20 = vpop.f32.mrb[20].mxu1 }
0x225c   :  { %v2350_v21 = vpop.f32.mrb[21].mxu1 }
0x225d   :  { %v2353_v22 = vadd.f32 %v2350_v21, %v4989_v38 }
0x225f   :  { %v2354_v23 = vadd.f32 %v2353_v22, %v2244_v47 }
0x2261   :  { %4262 = vtanh.f32 %v2354_v23  ;;  %v3663_v25 = vmul.f32 -1.442695, %v2354_v23 }
0x2263   :  { %4264 = vpow2.f32 %v3663_v25 }
0x226b   :  { %v4263_v24 = vpop.eup %4262 }
0x226c   :  { %2364 = vrot.lane.b32.xlu0 %v4263_v24, %s4535_s25 }
0x226d   :  { %v4265_v26 = vpop.eup %4264 }
0x226e   :  { %v2358_v28 = vadd.f32 1.0, %v4265_v26 }
0x2270   :  { %4266 = vrcp.f32 %v2358_v28 }
0x227a   :  { %v4267_v29 = vpop.eup %4266 }
0x227b   :  { %v2362_v34 = vmul.f32 %v4267_v29, %v4995_v50 }
0x22de   :  { %v2365_v30 = vpop.permute.xlu0 %2364 }
0x22df   :  { %v2367_v33 = vmul.f32 %v4267_v29, %v2365_v30 }
0x22e1   :  { %2369 = vrot.lane.b32.xlu1 %v2367_v33, %s4536_s30 }
0x2353   :  { %v2370_v36 = vpop.permute.xlu1 %2369 }
0x2354   :  { %v5026_v40 = vadd.f32 %v2370_v36, %v2362_v34 }
0x2356   :  { %4268 = vtanh.f32 %v5026_v40 }
0x2360   :  { %v4269_v31 = vpop.eup %4268 }
0x2361   :  { %2375 = vrot.lane.b32.xlu0 %v4269_v31, %s4535_s25 }
0x23d3   :  { %v2376_v37 = vpop.permute.xlu0 %2375 }
0x23d4   :  { %v2378_v32 = vmul.f32 %v4267_v29, %v2376_v37 }
0x23d6   :  { %2380 = vrot.lane.b32.xlu1 %v2378_v32, %s4536_s30 }
0x2448   :  { %v2381_v39 = vpop.permute.xlu1 %2380 }
0x2449   :  { %3664 = vmatmul.mubr.msk.f32.vlgmr.msra.gmra.mrb[22].mxu0 %vm137_vm1, %v2381_v39 }
0x244a   :  { %4011 = vmatpush1.bf16.msra.mxu0 %v4902_v13  ;;  %2654 = vmatprep.mubr.f32.mxu0 %v4534_v1 }
0x244b   :  { %4013 = vmatprep.subr.bf16.mxu0 %v4904_v14 }
0x244e   :  { %4015 = vmatpush1.bf16.msra.mxu0 %v4908_v18 }
0x244f   :  { %4025 = vmatprep.subr.bf16.mxu0 %v4895_v63 }
0x251c   :  { %v2450_v35 = vpop.f32.mrb[22].mxu0 }
0x251d   :  { %v2452_v41 = vpop.f32.mrb[23].mxu0 }
0x251e   :  { %v2455_v42 = vadd.f32 %v2452_v41, %v2348_v20 }
0x2520   :  { %v2456_v7 = vadd.f32 %v2455_v42, %v4968_v17 }
0x2522   :  { %4270 = vtanh.f32 %v2456_v7  ;;  %v3665_v9 = vmul.f32 -1.442695, %v2456_v7 }
0x2524   :  { %4272 = vpow2.f32 %v3665_v9 }
0x252c   :  { %v4271_v43 = vpop.eup %4270 }
0x252d   :  { %2466 = vrot.lane.b32.xlu0 %v4271_v43, %s4535_s25 }
0x252e   :  { %v4273_v44 = vpop.eup %4272 }
0x252f   :  { %v2460_v45 = vadd.f32 1.0, %v4273_v44 }
0x2531   :  { %4274 = vrcp.f32 %v2460_v45 }
0x253b   :  { %v4275_v46 = vpop.eup %4274 }
0x253c   :  { %v2464_v50 = vmul.f32 %v4275_v46, %v5010_v11 }
0x259f   :  { %v2467_v48 = vpop.permute.xlu0 %2466 }
0x25a0   :  { %v2469_v49 = vmul.f32 %v4275_v46, %v2467_v48 }
0x25a2   :  { %2471 = vrot.lane.b32.xlu1 %v2469_v49, %s4536_s30 }
0x2614   :  { %v2472_v52 = vpop.permute.xlu1 %2471 }
0x2615   :  { %v5041_v53 = vadd.f32 %v2472_v52, %v2464_v50 }
0x2617   :  { %4276 = vtanh.f32 %v5041_v53 }
0x2621   :  { %v4277_v54 = vpop.eup %4276 }
0x2622   :  { %2477 = vrot.lane.b32.xlu0 %v4277_v54, %s4535_s25 }
0x2694   :  { %v2478_v55 = vpop.permute.xlu0 %2477 }
0x2695   :  { %v2480_v47 = vmul.f32 %v4275_v46, %v2478_v55 }
0x2697   :  { %2482 = vrot.lane.b32.xlu1 %v2480_v47, %s4536_s30 }
0x2709   :  { %v2483_v59 = vpop.permute.xlu1 %2482 }
0x270a   :  { %2485 = vst.msk [vmem:[#allocation3 + $0x5] sm:$0x1] %vm2072_vm2, %v2483_v59  ;;  %3666 = vmatmul.mubr.msk.f32.vlgmr.msra.gmra.mrb[22].mxu1 %vm137_vm1, %v2483_v59 }
0x270b   :  { %4019 = vmatpush1.bf16.msra.mxu1 %v4938_v57  ;;  %2758 = vmatprep.mubr.f32.mxu1 %v4534_v1 }
0x270c   :  { %4021 = vmatprep.subr.bf16.mxu1 %v4940_v58 }
0x270f   :  { %4023 = vmatpush1.bf16.msra.mxu1 %v4945_v60 }
0x2710   :  { %4033 = vmatprep.subr.bf16.mxu1 %v4936_v51 }
0x27dd   :  { %v2554_v56 = vpop.f32.mrb[22].mxu1 }
0x27de   :  { %v2556_v27 = vpop.f32.mrb[23].mxu1 }
0x27df   :  { %v2559_v61 = vadd.f32 %v2556_v27, %v4989_v38 }
0x27e1   :  { %v2560_v62 = vadd.f32 %v2559_v61, %v2450_v35 }
0x27e3   :  { %4278 = vtanh.f32 %v2560_v62  ;;  %v3667_v3 = vmul.f32 -1.442695, %v2560_v62 }
0x27e5   :  { %4280 = vpow2.f32 %v3667_v3 }
0x27ed   :  { %v4279_v2 = vpop.eup %4278 }
0x27ee   :  { %2570 = vrot.lane.b32.xlu0 %v4279_v2, %s4535_s25 }
0x27ef   :  { %v4281_v4 = vpop.eup %4280 }
0x27f0   :  { %v2564_v5 = vadd.f32 1.0, %v4281_v4 }
0x27f2   :  { %4282 = vrcp.f32 %v2564_v5 }
0x27fc   :  { %v4283_v6 = vpop.eup %4282 }
0x27fd   :  { %v2568_v11 = vmul.f32 %v4283_v6, %v5026_v40 }
0x2860   :  { %v2571_v8 = vpop.permute.xlu0 %2570 }
0x2861   :  { %v2573_v10 = vmul.f32 %v4283_v6, %v2571_v8 }
0x2863   :  { %2575 = vrot.lane.b32.xlu1 %v2573_v10, %s4536_s30 }
0x28d5   :  { %v2576_v12 = vpop.permute.xlu1 %2575 }
0x28d6   :  { %v5057_v15 = vadd.f32 %v2576_v12, %v2568_v11 }
0x28d8   :  { %4284 = vtanh.f32 %v5057_v15 }
0x28e2   :  { %v4285_v16 = vpop.eup %4284 }
0x28e3   :  { %2581 = vrot.lane.b32.xlu0 %v4285_v16, %s4535_s25 }
0x2955   :  { %v2582_v19 = vpop.permute.xlu0 %2581 }
0x2956   :  { %v2584_v20 = vmul.f32 %v4283_v6, %v2582_v19 }
0x2958   :  { %2586 = vrot.lane.b32.xlu1 %v2584_v20, %s4536_s30 }
0x29ca   :  { %v2587_v21 = vpop.permute.xlu1 %2586 }
0x29cb   :  { %3668 = vmatmul.mubr.msk.f32.vlgmr.msra.gmra.mrb[24].mxu0 %vm137_vm1, %v2587_v21 }
0x29cc   :  { %4027 = vmatpush1.bf16.msra.mxu0 %v4902_v13  ;;  %2860 = vmatprep.mubr.f32.mxu0 %v4534_v1 }
0x29cd   :  { %4029 = vmatprep.subr.bf16.mxu0 %v4904_v14 }
0x29d0   :  { %4031 = vmatpush1.bf16.msra.mxu0 %v4908_v18 }
0x29d1   :  { %4041 = vmatprep.subr.bf16.mxu0 %v4895_v63 }
0x2a9e   :  { %v2656_v22 = vpop.f32.mrb[24].mxu0 }
0x2a9f   :  { %v2658_v23 = vpop.f32.mrb[25].mxu0 }
0x2aa0   :  { %v2661_v24 = vadd.f32 %v2658_v23, %v2554_v56 }
0x2aa2   :  { %v2662_v25 = vadd.f32 %v2661_v24, %v4968_v17 }
0x2aa4   :  { %4286 = vtanh.f32 %v2662_v25  ;;  %v3669_v28 = vmul.f32 -1.442695, %v2662_v25 }
0x2aa6   :  { %4288 = vpow2.f32 %v3669_v28 }
0x2aae   :  { %v4287_v26 = vpop.eup %4286 }
0x2aaf   :  { %2672 = vrot.lane.b32.xlu0 %v4287_v26, %s4535_s25 }
0x2ab0   :  { %v4289_v29 = vpop.eup %4288 }
0x2ab1   :  { %v2666_v30 = vadd.f32 1.0, %v4289_v29 }
0x2ab3   :  { %4290 = vrcp.f32 %v2666_v30 }
0x2abd   :  { %v4291_v33 = vpop.eup %4290 }
0x2abe   :  { %v2670_v40 = vmul.f32 %v4291_v33, %v5041_v53 }
0x2b21   :  { %v2673_v34 = vpop.permute.xlu0 %2672 }
0x2b22   :  { %v2675_v36 = vmul.f32 %v4291_v33, %v2673_v34 }
0x2b24   :  { %2677 = vrot.lane.b32.xlu1 %v2675_v36, %s4536_s30 }
0x2b96   :  { %v2678_v31 = vpop.permute.xlu1 %2677 }
0x2b97   :  { %v5072_v37 = vadd.f32 %v2678_v31, %v2670_v40 }
0x2b99   :  { %4292 = vtanh.f32 %v5072_v37 }
0x2ba3   :  { %v4293_v32 = vpop.eup %4292 }
0x2ba4   :  { %2683 = vrot.lane.b32.xlu0 %v4293_v32, %s4535_s25 }
0x2c16   :  { %v2684_v39 = vpop.permute.xlu0 %2683 }
0x2c17   :  { %v2686_v35 = vmul.f32 %v4291_v33, %v2684_v39 }
0x2c19   :  { %2688 = vrot.lane.b32.xlu1 %v2686_v35, %s4536_s30 }
0x2c8b   :  { %v2689_v41 = vpop.permute.xlu1 %2688 }
0x2c8c   :  { %2691 = vst.msk [vmem:[#allocation3 + $0x4] sm:$0x1] %vm2072_vm2, %v2689_v41  ;;  %3670 = vmatmul.mubr.msk.f32.vlgmr.msra.gmra.mrb[24].mxu1 %vm137_vm1, %v2689_v41 }
0x2c8d   :  { %4035 = vmatpush1.bf16.msra.mxu1 %v4938_v57  ;;  %2964 = vmatprep.mubr.f32.mxu1 %v4534_v1 }
0x2c8e   :  { %4037 = vmatprep.subr.bf16.mxu1 %v4940_v58 }
0x2c91   :  { %4039 = vmatpush1.bf16.msra.mxu1 %v4945_v60 }
0x2c92   :  { %4049 = vmatprep.subr.bf16.mxu1 %v4936_v51 }
0x2d5f   :  { %v2760_v42 = vpop.f32.mrb[24].mxu1 }
0x2d60   :  { %v2762_v7 = vpop.f32.mrb[25].mxu1 }
0x2d61   :  { %v2765_v43 = vadd.f32 %v2762_v7, %v4989_v38 }
0x2d63   :  { %v2766_v9 = vadd.f32 %v2765_v43, %v2656_v22 }
0x2d65   :  { %4294 = vtanh.f32 %v2766_v9  ;;  %v3671_v45 = vmul.f32 -1.442695, %v2766_v9 }
0x2d67   :  { %4296 = vpow2.f32 %v3671_v45 }
0x2d6f   :  { %v4295_v44 = vpop.eup %4294 }
0x2d70   :  { %2776 = vrot.lane.b32.xlu0 %v4295_v44, %s4535_s25 }
0x2d71   :  { %v4297_v46 = vpop.eup %4296 }
0x2d72   :  { %v2770_v48 = vadd.f32 1.0, %v4297_v46 }
0x2d74   :  { %4298 = vrcp.f32 %v2770_v48 }
0x2d7e   :  { %v4299_v49 = vpop.eup %4298 }
0x2d7f   :  { %v2774_v53 = vmul.f32 %v4299_v49, %v5057_v15 }
0x2de2   :  { %v2777_v50 = vpop.permute.xlu0 %2776 }
0x2de3   :  { %v2779_v52 = vmul.f32 %v4299_v49, %v2777_v50 }
0x2de5   :  { %2781 = vrot.lane.b32.xlu1 %v2779_v52, %s4536_s30 }
0x2e57   :  { %v2782_v54 = vpop.permute.xlu1 %2781 }
0x2e58   :  { %v5088_v55 = vadd.f32 %v2782_v54, %v2774_v53 }
0x2e5a   :  { %4300 = vtanh.f32 %v5088_v55 }
0x2e64   :  { %v4301_v47 = vpop.eup %4300 }
0x2e65   :  { %2787 = vrot.lane.b32.xlu0 %v4301_v47, %s4535_s25 }
0x2ed7   :  { %v2788_v59 = vpop.permute.xlu0 %2787 }
0x2ed8   :  { %v2790_v56 = vmul.f32 %v4299_v49, %v2788_v59 }
0x2eda   :  { %2792 = vrot.lane.b32.xlu1 %v2790_v56, %s4536_s30 }
0x2f4c   :  { %v2793_v27 = vpop.permute.xlu1 %2792 }
0x2f4d   :  { %3672 = vmatmul.mubr.msk.f32.vlgmr.msra.gmra.mrb[26].mxu0 %vm137_vm1, %v2793_v27 }
0x2f4e   :  { %4043 = vmatpush1.bf16.msra.mxu0 %v4902_v13  ;;  %3066 = vmatprep.mubr.f32.mxu0 %v4534_v1 }
0x2f4f   :  { %4045 = vmatprep.subr.bf16.mxu0 %v4904_v14 }
0x2f52   :  { %4047 = vmatpush1.bf16.msra.mxu0 %v4908_v18 }
0x2f53   :  { %4057 = vmatprep.subr.bf16.mxu0 %v4895_v63 }
0x3020   :  { %v2862_v61 = vpop.f32.mrb[26].mxu0 }
0x3021   :  { %v2864_v62 = vpop.f32.mrb[27].mxu0 }
0x3022   :  { %v2867_v2 = vadd.f32 %v2864_v62, %v2760_v42 }
0x3024   :  { %v2868_v3 = vadd.f32 %v2867_v2, %v4968_v17 }
0x3026   :  { %4302 = vtanh.f32 %v2868_v3  ;;  %v3673_v5 = vmul.f32 -1.442695, %v2868_v3 }
0x3028   :  { %4304 = vpow2.f32 %v3673_v5 }
0x3030   :  { %v4303_v4 = vpop.eup %4302 }
0x3031   :  { %2878 = vrot.lane.b32.xlu0 %v4303_v4, %s4535_s25 }
0x3032   :  { %v4305_v6 = vpop.eup %4304 }
0x3033   :  { %v2872_v8 = vadd.f32 1.0, %v4305_v6 }
0x3035   :  { %4306 = vrcp.f32 %v2872_v8 }
0x303f   :  { %v4307_v10 = vpop.eup %4306 }
0x3040   :  { %v2876_v15 = vmul.f32 %v4307_v10, %v5072_v37 }
0x30a3   :  { %v2879_v11 = vpop.permute.xlu0 %2878 }
0x30a4   :  { %v2881_v12 = vmul.f32 %v4307_v10, %v2879_v11 }
0x30a6   :  { %2883 = vrot.lane.b32.xlu1 %v2881_v12, %s4536_s30 }
0x3118   :  { %v2884_v16 = vpop.permute.xlu1 %2883 }
0x3119   :  { %v5103_v19 = vadd.f32 %v2884_v16, %v2876_v15 }
0x311b   :  { %4308 = vtanh.f32 %v5103_v19 }
0x3125   :  { %v4309_v20 = vpop.eup %4308 }
0x3126   :  { %2889 = vrot.lane.b32.xlu0 %v4309_v20, %s4535_s25 }
0x3198   :  { %v2890_v21 = vpop.permute.xlu0 %2889 }
0x3199   :  { %v2892_v22 = vmul.f32 %v4307_v10, %v2890_v21 }
0x319b   :  { %2894 = vrot.lane.b32.xlu1 %v2892_v22, %s4536_s30 }
0x320d   :  { %v2895_v23 = vpop.permute.xlu1 %2894 }
0x320e   :  { %2897 = vst.msk [vmem:[#allocation3 + $0x3] sm:$0x1] %vm2072_vm2, %v2895_v23  ;;  %3674 = vmatmul.mubr.msk.f32.vlgmr.msra.gmra.mrb[26].mxu1 %vm137_vm1, %v2895_v23 }
0x320f   :  { %4051 = vmatpush1.bf16.msra.mxu1 %v4938_v57  ;;  %3170 = vmatprep.mubr.f32.mxu1 %v4534_v1 }
0x3210   :  { %4053 = vmatprep.subr.bf16.mxu1 %v4940_v58 }
0x3213   :  { %4055 = vmatpush1.bf16.msra.mxu1 %v4945_v60 }
0x3214   :  { %4065 = vmatprep.subr.bf16.mxu1 %v4936_v51 }
0x32e1   :  { %v2966_v24 = vpop.f32.mrb[26].mxu1 }
0x32e2   :  { %v2968_v25 = vpop.f32.mrb[27].mxu1 }
0x32e3   :  { %v2971_v26 = vadd.f32 %v2968_v25, %v4989_v38 }
0x32e5   :  { %v2972_v28 = vadd.f32 %v2971_v26, %v2862_v61 }
0x32e7   :  { %4310 = vtanh.f32 %v2972_v28  ;;  %v3675_v30 = vmul.f32 -1.442695, %v2972_v28 }
0x32e9   :  { %4312 = vpow2.f32 %v3675_v30 }
0x32f1   :  { %v4311_v29 = vpop.eup %4310 }
0x32f2   :  { %2982 = vrot.lane.b32.xlu0 %v4311_v29, %s4535_s25 }
0x32f3   :  { %v4313_v33 = vpop.eup %4312 }
0x32f4   :  { %v2976_v34 = vadd.f32 1.0, %v4313_v33 }
0x32f6   :  { %4314 = vrcp.f32 %v2976_v34 }
0x3300   :  { %v4315_v36 = vpop.eup %4314 }
0x3301   :  { %v2980_v51 = vmul.f32 %v4315_v36, %v5088_v55 }
0x3364   :  { %v2983_v40 = vpop.permute.xlu0 %2982 }
0x3365   :  { %v2985_v31 = vmul.f32 %v4315_v36, %v2983_v40 }
0x3367   :  { %2987 = vrot.lane.b32.xlu1 %v2985_v31, %s4536_s30 }
0x33d9   :  { %v2988_v37 = vpop.permute.xlu1 %2987 }
0x33da   :  { %v5119_v32 = vadd.f32 %v2988_v37, %v2980_v51 }
0x33dc   :  { %4316 = vtanh.f32 %v5119_v32 }
0x33e6   :  { %v4317_v39 = vpop.eup %4316 }
0x33e7   :  { %2993 = vrot.lane.b32.xlu0 %v4317_v39, %s4535_s25 }
0x3459   :  { %v2994_v35 = vpop.permute.xlu0 %2993 }
0x345a   :  { %v2996_v41 = vmul.f32 %v4315_v36, %v2994_v35 }
0x345c   :  { %2998 = vrot.lane.b32.xlu1 %v2996_v41, %s4536_s30 }
0x34ce   :  { %v2999_v42 = vpop.permute.xlu1 %2998 }
0x34cf   :  { %3676 = vmatmul.mubr.msk.f32.vlgmr.msra.gmra.mrb[28].mxu0 %vm137_vm1, %v2999_v42 }
0x34d0   :  { %4059 = vmatpush1.bf16.msra.mxu0 %v4902_v13  ;;  %3272 = vmatprep.mubr.f32.mxu0 %v4534_v1 }
0x34d1   :  { %4061 = vmatprep.subr.bf16.mxu0 %v4904_v14 }
0x34d4   :  { %4063 = vmatpush1.bf16.msra.mxu0 %v4908_v18 }
0x34d5   :  { %4073 = vmatprep.subr.bf16.mxu0 %v4895_v63 }
0x35a2   :  { %v3068_v7 = vpop.f32.mrb[28].mxu0 }
0x35a3   :  { %v3070_v43 = vpop.f32.mrb[29].mxu0 }
0x35a4   :  { %v3073_v9 = vadd.f32 %v3070_v43, %v2966_v24 }
0x35a6   :  { %v3074_v44 = vadd.f32 %v3073_v9, %v4968_v17 }
0x35a8   :  { %4318 = vtanh.f32 %v3074_v44  ;;  %v3677_v46 = vmul.f32 -1.442695, %v3074_v44 }
0x35aa   :  { %4320 = vpow2.f32 %v3677_v46 }
0x35b2   :  { %v4319_v45 = vpop.eup %4318 }
0x35b3   :  { %3084 = vrot.lane.b32.xlu0 %v4319_v45, %s4535_s25 }
0x35b4   :  { %v4321_v48 = vpop.eup %4320 }
0x35b5   :  { %v3078_v49 = vadd.f32 1.0, %v4321_v48 }
0x35b7   :  { %4322 = vrcp.f32 %v3078_v49 }
0x35c1   :  { %v4323_v50 = vpop.eup %4322 }
0x35c2   :  { %v3082_v63 = vmul.f32 %v4323_v50, %v5103_v19 }
0x3625   :  { %v3085_v52 = vpop.permute.xlu0 %3084 }
0x3626   :  { %v3087_v53 = vmul.f32 %v4323_v50, %v3085_v52 }
0x3628   :  { %3089 = vrot.lane.b32.xlu1 %v3087_v53, %s4536_s30 }
0x369a   :  { %v3090_v54 = vpop.permute.xlu1 %3089 }
0x369b   :  { %v3092_v55 = vadd.f32 %v3090_v54, %v3082_v63 }
0x369d   :  { %4324 = vtanh.f32 %v3092_v55 }
0x36a7   :  { %v4325_v47 = vpop.eup %4324 }
0x36a8   :  { %3095 = vrot.lane.b32.xlu0 %v4325_v47, %s4535_s25 }
0x371a   :  { %v3096_v59 = vpop.permute.xlu0 %3095 }
0x371b   :  { %v3098_v56 = vmul.f32 %v4323_v50, %v3096_v59 }
0x371d   :  { %3100 = vrot.lane.b32.xlu1 %v3098_v56, %s4536_s30 }
0x378f   :  { %v3101_v27 = vpop.permute.xlu1 %3100 }
0x3790   :  { %3103 = vst.msk [vmem:[#allocation3 + $0x2] sm:$0x1] %vm2072_vm2, %v3101_v27  ;;  %3678 = vmatmul.mubr.msk.f32.vlgmr.msra.gmra.mrb[28].mxu1 %vm137_vm1, %v3101_v27 }
0x3791   :  { %4067 = vmatpush1.bf16.msra.mxu1 %v4938_v57  ;;  %3376 = vmatprep.mubr.f32.mxu1 %v4534_v1 }
0x3792   :  { %4069 = vmatprep.subr.bf16.mxu1 %v4940_v58 }
0x3795   :  { %4071 = vmatpush1.bf16.msra.mxu1 %v4945_v60 }
0x3796   :  { %4080 = vmatprep.subr.bf16.mxu1 %v4532_v0 }
0x3863   :  { %v3172_v61 = vpop.f32.mrb[28].mxu1 }
0x3864   :  { %v3174_v62 = vpop.f32.mrb[29].mxu1 }
0x3865   :  { %v3177_v2 = vadd.f32 %v3174_v62, %v4989_v38 }
0x3867   :  { %v3178_v3 = vadd.f32 %v3177_v2, %v3068_v7 }
0x3869   :  { %4326 = vtanh.f32 %v3178_v3  ;;  %v3679_v5 = vmul.f32 -1.442695, %v3178_v3 }
0x386b   :  { %4328 = vpow2.f32 %v3679_v5 }
0x3873   :  { %v4327_v4 = vpop.eup %4326 }
0x3874   :  { %3188 = vrot.lane.b32.xlu0 %v4327_v4, %s4535_s25 }
0x3875   :  { %v4329_v57 = vpop.eup %4328 }
0x3876   :  { %v3182_v6 = vadd.f32 1.0, %v4329_v57 }
0x3878   :  { %4330 = vrcp.f32 %v3182_v6  ;;  %v3517_v6 = vld [vmem:[%s5215_s11 + $0x8] sm:$0xff] }
0x3882   :  { %v4331_v8 = vpop.eup %4330 }
0x3883   :  { %v3186_v60 = vmul.f32 %v4331_v8, %v5119_v32 }
0x38e6   :  { %v3189_v58 = vpop.permute.xlu0 %3188 }
0x38e7   :  { %v3191_v10 = vmul.f32 %v4331_v8, %v3189_v58  ;;  %v3518_v58 = vld [vmem:[%s5215_s11 + $0x10] sm:$0xff] }
0x38e9   :  { %3193 = vrot.lane.b32.xlu1 %v3191_v10, %s4536_s30  ;;  %v3519_v10 = vld [vmem:[%s5215_s11 + $0x18] sm:$0xff] }
0x395b   :  { %v3194_v11 = vpop.permute.xlu1 %3193 }
0x395c   :  { %v3196_v12 = vadd.f32 %v3194_v11, %v3186_v60  ;;  %v4084_v60 = vpack.c.bf16 %v3519_v10, %v3518_v58 }
0x395e   :  { %4332 = vtanh.f32 %v3196_v12 }
0x3968   :  { %v4333_v15 = vpop.eup %4332 }
0x3969   :  { %3199 = vrot.lane.b32.xlu0 %v4333_v15, %s4535_s25 }
0x39db   :  { %v3200_v16 = vpop.permute.xlu0 %3199 }
0x39dc   :  { %v3202_v19 = vmul.f32 %v4331_v8, %v3200_v16 }
0x39de   :  { %3204 = vrot.lane.b32.xlu1 %v3202_v19, %s4536_s30  ;;  %v3686_v19 = vld [vmem:[%s5216_s12] ss:$0 sm:$0xff] }
0x3a50   :  { %v3205_v20 = vpop.permute.xlu1 %3204 }
0x3a51   :  { %3680 = vmatmul.mubr.msk.f32.vlgmr.msra.gmra.mrb[30].mxu0 %vm137_vm1, %v3205_v20 }
0x3a52   :  { %4075 = vmatpush1.bf16.msra.mxu0 %v4902_v13  ;;  %3478 = vmatprep.mubr.f32.mxu0 %v4534_v1 }
0x3a53   :  { %4077 = vmatprep.subr.bf16.mxu0 %v4904_v14 }
0x3a56   :  { %4079 = vmatpush1.bf16.msra.mxu0 %v4908_v18 }
0x3b24   :  { %v3274_v21 = vpop.f32.mrb[30].mxu0 }
0x3b25   :  { %v3276_v22 = vpop.f32.mrb[31].mxu0 }
0x3b26   :  { %v3279_v23 = vadd.f32 %v3276_v22, %v3172_v61 }
0x3b28   :  { %v3280_v24 = vadd.f32 %v3279_v23, %v4968_v17 }
0x3b2a   :  { %4334 = vtanh.f32 %v3280_v24  ;;  %v3681_v26 = vmul.f32 -1.442695, %v3280_v24 }
0x3b2c   :  { %4336 = vpow2.f32 %v3681_v26 }
0x3b34   :  { %v4335_v25 = vpop.eup %4334 }
0x3b35   :  { %3290 = vrot.lane.b32.xlu0 %v4335_v25, %s4535_s25 }
0x3b36   :  { %v4337_v28 = vpop.eup %4336 }
0x3b37   :  { %v3284_v29 = vadd.f32 1.0, %v4337_v28 }
0x3b39   :  { %4338 = vrcp.f32 %v3284_v29 }
0x3b43   :  { %v4339_v13 = vpop.eup %4338 }
0x3b44   :  { %v3288_v14 = vmul.f32 %v4339_v13, %v3092_v55 }
0x3ba7   :  { %v3291_v30 = vpop.permute.xlu0 %3290 }
0x3ba8   :  { %v3293_v33 = vmul.f32 %v4339_v13, %v3291_v30 }
0x3baa   :  { %3295 = vrot.lane.b32.xlu1 %v3293_v33, %s4536_s30 }
0x3c1c   :  { %v3296_v18 = vpop.permute.xlu1 %3295 }
0x3c1d   :  { %v3298_v34 = vadd.f32 %v3296_v18, %v3288_v14 }
0x3c1f   :  { %4340 = vtanh.f32 %v3298_v34 }
0x3c29   :  { %v4341_v36 = vpop.eup %4340 }
0x3c2a   :  { %3301 = vrot.lane.b32.xlu0 %v4341_v36, %s4535_s25 }
0x3c9c   :  { %v3302_v40 = vpop.permute.xlu0 %3301 }
0x3c9d   :  { %v3304_v31 = vmul.f32 %v4339_v13, %v3302_v40 }
0x3c9f   :  { %3306 = vrot.lane.b32.xlu1 %v3304_v31, %s4536_s30 }
0x3d11   :  { %v3307_v51 = vpop.permute.xlu1 %3306 }
0x3d12   :  { %3309 = vst.msk [vmem:[#allocation3 + $0x1] sm:$0x1] %vm2072_vm2, %v3307_v51  ;;  %3682 = vmatmul.mubr.msk.f32.vlgmr.msra.gmra.mrb[30].mxu1 %vm137_vm1, %v3307_v51 }
0x3d13   :  { %3829 = vmatprep.mubr.msk.f32.mxu1 %vm4533_vm0, %v4534_v1 }
0x3de5   :  { %v3378_v37 = vpop.f32.mrb[30].mxu1 }
0x3de6   :  { %v3380_v32 = vpop.f32.mrb[31].mxu1 }
0x3de7   :  { %v3383_v39 = vadd.f32 %v3380_v32, %v4989_v38 }
0x3de9   :  { %v3384_v35 = vadd.f32 %v3383_v39, %v3274_v21 }
0x3deb   :  { %4342 = vtanh.f32 %v3384_v35  ;;  %v3683_v42 = vmul.f32 -1.442695, %v3384_v35 }
0x3ded   :  { %4344 = vpow2.f32 %v3683_v42 }
0x3df5   :  { %v4343_v41 = vpop.eup %4342 }
0x3df6   :  { %3394 = vrot.lane.b32.xlu0 %v4343_v41, %s4535_s25 }
0x3df7   :  { %v4345_v7 = vpop.eup %4344 }
0x3df8   :  { %v3388_v43 = vadd.f32 1.0, %v4345_v7 }
0x3dfa   :  { %4346 = vrcp.f32 %v3388_v43 }
0x3e04   :  { %v4347_v9 = vpop.eup %4346 }
0x3e05   :  { %v3392_v1 = vmul.f32 %v4347_v9, %v3196_v12 }
0x3e68   :  { %v3395_v44 = vpop.permute.xlu0 %3394 }
0x3e69   :  { %v3397_v45 = vmul.f32 %v4347_v9, %v3395_v44 }
0x3e6b   :  { %3399 = vrot.lane.b32.xlu1 %v3397_v45, %s4536_s30 }
0x3edd   :  { %v3400_v46 = vpop.permute.xlu1 %3399 }
0x3ede   :  { %v3402_v48 = vadd.f32 %v3400_v46, %v3392_v1 }
0x3ee0   :  { %4348 = vtanh.f32 %v3402_v48 }
0x3eea   :  { %v4349_v38 = vpop.eup %4348 }
0x3eeb   :  { %3405 = vrot.lane.b32.xlu0 %v4349_v38, %s4535_s25 }
0x3f5d   :  { %v3406_v49 = vpop.permute.xlu0 %3405 }
0x3f5e   :  { %v3408_v50 = vmul.f32 %v4347_v9, %v3406_v49 }
0x3f60   :  { %3410 = vrot.lane.b32.xlu1 %v3408_v50, %s4536_s30 }
0x3fd2   :  { %v3411_v52 = vpop.permute.xlu1 %3410 }
0x3fd3   :  { %3684 = vmatmul.mubr.msk.f32.vlgmr.msra.gmra.mrb[32].mxu0 %vm137_vm1, %v3411_v52 }
0x40a6   :  { %v3480_v53 = vpop.f32.mrb[32].mxu0 }
0x40a7   :  { %v3481_v63 = vpop.f32.mrb[33].mxu0 }
0x40a8   :  { %v3484_v54 = vadd.f32 %v3481_v63, %v3378_v37 }
0x40aa   :  { %v3485_v55 = vadd.f32 %v3484_v54, %v4968_v17  ;;  %v3516_v17 = vld [vmem:[%s5215_s11] sm:$0xff]  ;;  %s4537_s11 = smov [#allocation15]  }
0x40ab   :  { %v4081_v8 = vpack.c.bf16 %v3517_v6, %v3516_v17  ;;  %s3608_s24 = sshll.u32 %s4537_s11, 4  ;;  %s3609_s24 = int_to_ptr.vmem [resolvable:$true] %s3608_s24 }
0x40ac   :  { %4350 = vtanh.f32 %v3485_v55  ;;  %v3685_v59 = vmul.f32 -1.442695, %v3485_v55  ;;  %s4490_s27 = scalar_lea.vmem %s3609_s24, 128  ;;  %p4495_p7 = scmp.lt.s32.totalorder %s3609_s24, %s3609_s24 }
0x40ad   :  { %4082 = vmatpush3.bf16.msra.mxu1 %v4081_v8  ;;  %p4491_p6 = scmp.ne.s32.totalorder %s3609_s24, %s4490_s27  ;;  %p4496_p8 = scmp.lt.s32.totalorder %s4490_s27, %s4490_s27 }
0x40ae   :  { %4352 = vpow2.f32 %v3685_v59  ;;  %4083 = vmatprep.subr.bf16.mxu1 %v4532_v0 }
0x40af   :  { %p4497_p9 = por %p4496_p8, %p4495_p7 }
0x40b1   :  { %4085 = vmatpush3.bf16.msra.mxu1 %v4084_v60  ;;  %p4498_p10 = pnand %p4497_p9, %p4491_p6 }
0x40b6   :  { %v4351_v47 = vpop.eup %4350 }
0x40b7   :  { %3495 = vrot.lane.b32.xlu0 %v4351_v47, %s4535_s25 }
0x40b8   :  { %v4353_v56 = vpop.eup %4352 }
0x40b9   :  { %v3489_v27 = vadd.f32 1.0, %v4353_v56 }
0x40bb   :  { %4354 = vrcp.f32 %v3489_v27 }
0x40c5   :  { %v4355_v61 = vpop.eup %4354 }
0x40c6   :  { %v3493_v3 = vmul.f32 %v4355_v61, %v3298_v34 }
0x4129   :  { %v3496_v62 = vpop.permute.xlu0 %3495 }
0x412a   :  { %v3498_v2 = vmul.f32 %v4355_v61, %v3496_v62 }
0x412c   :  { %3500 = vrot.lane.b32.xlu1 %v3498_v2, %s4536_s30 }
0x419e   :  { %v3501_v4 = vpop.permute.xlu1 %3500 }
0x419f   :  { %v3503_v5 = vadd.f32 %v3501_v4, %v3493_v3 }
0x41a1   :  { %4356 = vtanh.f32 %v3503_v5 }
0x41ab   :  { %v4357_v57 = vpop.eup %4356 }
0x41ac   :  { %3506 = vrot.lane.b32.xlu0 %v4357_v57, %s4535_s25 }
0x421e   :  { %v3507_v11 = vpop.permute.xlu0 %3506 }
0x421f   :  { %v3509_v12 = vmul.f32 %v4355_v61, %v3507_v11 }
0x4221   :  { %3511 = vrot.lane.b32.xlu1 %v3509_v12, %s4536_s30 }
0x4293   :  { %v3512_v15 = vpop.permute.xlu1 %3511 }
0x4294   :  { %3514 = vst.msk [vmem:[#allocation3] sm:$0x1] %vm2072_vm2, %v3512_v15 }
0x429b   :  { %v3515_v16 = vld [vmem:[#allocation3] sm:$0xff] }
0x429c   :  { %3830 = vmatmul.mubr.msk.f32.vlgmr.msra.gmra.mrb[32].mxu1 %vm137_vm1, %v3515_v16 }
0x436f   :  { %v3596_v20 = vpop.f32.mrb[32].mxu1 }
0x4370   :  { %v3597_v0 = vadd.f32 %v3686_v19, %v3596_v20  ;;  %v3831_v21 = vpop.f32.mrb[33].mxu1 }
0x4372   :  { %3601 = vst.msk [vmem:[#allocation15] sm:$0xff] %vm3600_vm3, %v3597_v0 }
0x4373   :  { %4501 = shalt.err (!%p4498_p10)
}
0x4374   :  { %s4502_s6 = scalar_lea.hbm %s5217_s13, 128 }
0x4375   :  { %p4503_p11 = scmp.ne.s32.totalorder %s5217_s13, %s4502_s6  ;;  %p4506_p12 = scmp.lt.u32.totalorder %s4502_s6, %s5217_s13 }
0x4377   :  { %p4508_p13 = pnand %p4506_p12, %p4503_p11 }
0x4379   :  { %4511 = shalt.err (!%p4508_p13)
}
0x437a   :  { %3611 = dma.vmem_to_hbm [thread:$0]  %s3609_s24, 128, %s5217_s13, [#allocation6]  }
0x437b   :  { %4520 = dma.done.wait [#allocation6], 128  }
0x437c   :  { %4521 = vsyncadd [#allocation6], 4294967168 }
0x437d   :  { %3615 = vsyncpa [#allocation5], 1 }
0x437e   :  { %3616 = vsyncpa [#allocation8], 1 }
0x437f   :  { %3617 = vsyncpa [#allocation11], 1 }
0x4380   :  { %3618 = vsyncpa [#allocation14], 1 }
0x4381   :  { %3619 = vsyncpa [#allocation6], 1 }

</bundles_post_ra>
